<compile_context>
chip_gen: v6e
topology: v6e:2x2x1
jax: 0.10.0
libtpu: 0.0.40
codegen_flags: <defaults>
</compile_context>

<pallas_src>
import functools

import jax
import jax.numpy as jnp
from jax.experimental import pallas as pl
from jax.experimental.pallas import tpu as pltpu


# ----------------------------------------------------------------------------
# Small helpers
# ----------------------------------------------------------------------------
def _round_up(x, m):
    return ((x + m - 1) // m) * m


@functools.lru_cache(maxsize=1)
def _vmem_limit_bytes():
    """Hardware-aware VMEM request (<= 48 MiB and <= 3/4 of physical VMEM)."""
    cap = 128 * 1024 * 1024
    try:
        cap = int(pltpu.get_tpu_info().vmem_capacity_bytes)
    except Exception:
        pass
    return min(48 * 1024 * 1024, (3 * cap) // 4)


def _compiler_params():
    return pltpu.CompilerParams(
        dimension_semantics=("parallel",),
        vmem_limit_bytes=_vmem_limit_bytes(),
    )


def _probe_copy_kernel(x_ref, o_ref):
    o_ref[...] = x_ref[...]


@functools.lru_cache(maxsize=1)
def _buffered_supported():
    """True if pl.Buffered(1) (single-buffered input blocks) works on this JAX/TPU."""
    try:
        f = pl.pallas_call(
            _probe_copy_kernel,
            out_shape=jax.ShapeDtypeStruct((8, 128), jnp.float32),
            grid=(1,),
            in_specs=[pl.BlockSpec((8, 128), lambda i: (0, 0),
                                   pipeline_mode=pl.Buffered(1))],
            out_specs=pl.BlockSpec((8, 128), lambda i: (0, 0)),
        )
        jax.block_until_ready(f(jnp.zeros((8, 128), jnp.float32)))
        return True
    except Exception:
        return False


def _const_block_kwargs():
    # Weights / biases have a constant index_map: single-buffer them when possible.
    if _buffered_supported():
        return {"pipeline_mode": pl.Buffered(1)}
    return {}


def _pick_m_tile(M, target=256):
    """Pick a row tile (multiple of 8) and the padded row count."""
    if M <= 8:
        return 8, 8
    if M <= target:
        tm = _round_up(M, 8)
        return tm, tm
    for cand in range(target, 7, -8):
        if M % cand == 0:
            return cand, M
    return target, _round_up(M, target)


def _pick_pool_tile(rows, target=256):
    """Largest multiple-of-8 divisor of `rows` giving >=2 grid steps, else rows."""
    start = (min(target, rows // 2) // 8) * 8
    for cand in range(start, 7, -8):
        if rows % cand == 0:
            return cand
    return rows


def _stable_sigmoid(y):
    z = jnp.exp(-jnp.abs(y))
    return jnp.where(y >= 0.0, 1.0 / (1.0 + z), z / (1.0 + z))


# ----------------------------------------------------------------------------
# Pallas kernels
# ----------------------------------------------------------------------------
def _apply_act(y, act):
    if act == "relu":
        return jnp.maximum(y, 0.0)
    if act == "sigmoid":
        return _stable_sigmoid(y)
    return y


def _linear_act_kernel(x_ref, w_ref, b_ref, o_ref, *, act):
    """One (tm, K) x (K, N) matmul tile (bf16 in, f32 accumulate) + bias + act."""
    y = jnp.dot(x_ref[...], w_ref[...], preferred_element_type=jnp.float32)
    y = _apply_act(y + b_ref[...], act)
    o_ref[...] = y.astype(o_ref.dtype)


def _mlp_head_kernel(x_ref, w1_ref, b1_ref, w2_ref, b2_ref, w3_ref, b3_ref, o_ref):
    """fc1(relu) -> fc2(relu) -> fc3(sigmoid), fused into one kernel launch."""
    h = jnp.dot(x_ref[...], w1_ref[...], preferred_element_type=jnp.float32)
    h = jnp.maximum(h + b1_ref[...], 0.0).astype(jnp.bfloat16)
    h = jnp.dot(h, w2_ref[...], preferred_element_type=jnp.float32)
    h = jnp.maximum(h + b2_ref[...], 0.0).astype(jnp.bfloat16)
    y = jnp.dot(h, w3_ref[...], preferred_element_type=jnp.float32)
    o_ref[...] = _stable_sigmoid(y + b3_ref[...]).astype(o_ref.dtype)


def _maxpool_kernel(x_ref, o_ref, *, W, C):
    """2x2/2 max pool on a lane-dense (rows, 2*W*C) view of an (N,H,W,C) tensor."""
    wc = W * C
    v = jnp.maximum(x_ref[:, :wc], x_ref[:, wc:])          # max over the 2 H-rows
    for j in range(W // 2):                                 # max over the 2 W-cols
        o_ref[:, j * C:(j + 1) * C] = jnp.maximum(
            v[:, (2 * j) * C:(2 * j + 1) * C],
            v[:, (2 * j + 1) * C:(2 * j + 2) * C],
        )


# ----------------------------------------------------------------------------
# pallas_call wrappers
# ----------------------------------------------------------------------------
def linear_act(x, w, b, act, out_dtype, tm_target=256):
    """y = act(x @ w + b).  x: (M, K) bf16, w: (K, N) bf16, b: (1, N) f32."""
    M, K = x.shape
    Kw, N = w.shape
    assert K == Kw, (K, Kw)
    tm, Mp = _pick_m_tile(M, tm_target)
    xp = x if Mp == M else jnp.zeros((Mp, K), x.dtype).at[:M, :].set(x)
    ck = _const_block_kwargs()
    out = pl.pallas_call(
        functools.partial(_linear_act_kernel, act=act),
        out_shape=jax.ShapeDtypeStruct((Mp, N), out_dtype),
        grid=(Mp // tm,),
        in_specs=[
            pl.BlockSpec((tm, K), lambda i: (i, 0)),
            pl.BlockSpec((K, N), lambda i: (0, 0), **ck),
            pl.BlockSpec((1, N), lambda i: (0, 0), **ck),
        ],
        out_specs=pl.BlockSpec((tm, N), lambda i: (i, 0)),
        compiler_params=_compiler_params(),
    )(xp, w, b)
    return out if Mp == M else out[:M]


def mlp_head(x, p, out_dtype=jnp.float32, tm_target=256):
    """Fused fc1 -> fc2 -> fc3 head.  x: (M, 2304) bf16."""
    M, K1 = x.shape
    N1 = p["fc1_w"].shape[1]
    N2 = p["fc2_w"].shape[1]
    N3 = p["fc3_w"].shape[1]
    tm, Mp = _pick_m_tile(M, tm_target)
    xp = x if Mp == M else jnp.zeros((Mp, K1), x.dtype).at[:M, :].set(x)
    ck = _const_block_kwargs()

    def const_spec(shape):
        return pl.BlockSpec(shape, lambda i: (0,) * len(shape), **ck)

    out = pl.pallas_call(
        _mlp_head_kernel,
        out_shape=jax.ShapeDtypeStruct((Mp, N3), out_dtype),
        grid=(Mp // tm,),
        in_specs=[
            pl.BlockSpec((tm, K1), lambda i: (i, 0)),
            const_spec((K1, N1)), const_spec((1, N1)),
            const_spec((N1, N2)), const_spec((1, N2)),
            const_spec((N2, N3)), const_spec((1, N3)),
        ],
        out_specs=pl.BlockSpec((tm, N3), lambda i: (i, 0)),
        compiler_params=_compiler_params(),
    )(xp, p["fc1_w"], p["fc1_b"], p["fc2_w"], p["fc2_b"], p["fc3_w"], p["fc3_b"])
    return out if Mp == M else out[:M]


def maxpool2x2(x):
    """2x2 max pool, stride 2.  x: (N, H, W, C) NHWC."""
    N, H, W, C = x.shape
    rows = N * (H // 2)
    xv = x.reshape(rows, 2 * W * C)            # contiguous -> free lane-dense view
    tr = _pick_pool_tile(rows)
    out = pl.pallas_call(
        functools.partial(_maxpool_kernel, W=W, C=C),
        out_shape=jax.ShapeDtypeStruct((rows, (W // 2) * C), x.dtype),
        grid=(rows // tr,),
        in_specs=[pl.BlockSpec((tr, 2 * W * C), lambda i: (i, 0))],
        out_specs=pl.BlockSpec((tr, (W // 2) * C), lambda i: (i, 0)),
        compiler_params=_compiler_params(),
    )(xv)
    return out.reshape(N, H // 2, W // 2, C)


def conv3x3_relu(x, w_mat, b):
    """3x3 'same' conv + ReLU.  x: (N,H,W,Cin) bf16; w_mat: (9*Cin, Cout) bf16."""
    N, H, W, Cin = x.shape
    Cout = w_mat.shape[1]
    xp = jnp.pad(x, ((0, 0), (1, 1), (1, 1), (0, 0)))
    # im2col with feature ordering (kh, kw, cin), matching w_mat's row ordering.
    # TODO(synk): fold this patch extraction into the matmul kernel itself
    # (9-tap accumulation over the padded input) to avoid the HBM round trip.
    cols = jnp.concatenate(
        [xp[:, kh:kh + H, kw:kw + W, :] for kh in range(3) for kw in range(3)],
        axis=-1,
    ).reshape(N * H * W, 9 * Cin)
    y = linear_act(cols, w_mat, b, act="relu", out_dtype=jnp.bfloat16)
    return y.reshape(N, H, W, Cout)


# ----------------------------------------------------------------------------
# Parameters: PyTorch-layout init + one-time kernel-ready preparation
# ----------------------------------------------------------------------------
def init_params(key, num_classes):
    ks = jax.random.split(key, 12)
    s = 0.05
    return {
        "conv1_w": jax.random.normal(ks[0], (16, 3, 3, 3), jnp.float32) * s,
        "conv1_b": jax.random.normal(ks[1], (16,), jnp.float32) * s,
        "conv2_w": jax.random.normal(ks[2], (32, 16, 3, 3), jnp.float32) * s,
        "conv2_b": jax.random.normal(ks[3], (32,), jnp.float32) * s,
        "conv3_w": jax.random.normal(ks[4], (64, 32, 3, 3), jnp.float32) * s,
        "conv3_b": jax.random.normal(ks[5], (64,), jnp.float32) * s,
        "fc1_w": jax.random.normal(ks[6], (512, 64 * 6 * 6), jnp.float32) * s,
        "fc1_b": jax.random.normal(ks[7], (512,), jnp.float32) * s,
        "fc2_w": jax.random.normal(ks[8], (256, 512), jnp.float32) * s,
        "fc2_b": jax.random.normal(ks[9], (256,), jnp.float32) * s,
        "fc3_w": jax.random.normal(ks[10], (num_classes, 256), jnp.float32) * s,
        "fc3_b": jax.random.normal(ks[11], (num_classes,), jnp.float32) * s,
    }


def prepare_params(params):
    """One-time weight relayout / cast, hoisted out of the per-call path."""
    def conv_w(w):  # (Cout, Cin, 3, 3) -> (9*Cin, Cout), rows ordered (kh, kw, cin)
        cout = w.shape[0]
        return jnp.transpose(w, (2, 3, 1, 0)).reshape(-1, cout).astype(jnp.bfloat16)

    def bias(b):
        return b.reshape(1, -1).astype(jnp.float32)

    # fc1 consumes PyTorch's NCHW flatten order (c, h, w); permute its columns once
    # so the kernel can consume the NHWC flatten (h, w, c) directly (no transpose
    # of the activation in the forward path).
    fc1 = params["fc1_w"]                              # (512, 64*6*6)
    fc1 = fc1.reshape(fc1.shape[0], 64, 6, 6)          # (out, c, h, w)
    fc1 = jnp.transpose(fc1, (2, 3, 1, 0)).reshape(6 * 6 * 64, fc1.shape[0])

    return {
        "conv1_w": conv_w(params["conv1_w"]), "conv1_b": bias(params["conv1_b"]),
        "conv2_w": conv_w(params["conv2_w"]), "conv2_b": bias(params["conv2_b"]),
        "conv3_w": conv_w(params["conv3_w"]), "conv3_b": bias(params["conv3_b"]),
        "fc1_w": fc1.astype(jnp.bfloat16),             "fc1_b": bias(params["fc1_b"]),
        "fc2_w": params["fc2_w"].T.astype(jnp.bfloat16), "fc2_b": bias(params["fc2_b"]),
        "fc3_w": params["fc3_w"].T.astype(jnp.bfloat16), "fc3_b": bias(params["fc3_b"]),
    }


# ----------------------------------------------------------------------------
# Forward pass (mirrors NetworkImageCNN.forward)
# ----------------------------------------------------------------------------
@jax.jit
def network_image_cnn_forward(p, x_nchw):
    # PyTorch NCHW -> NHWC once; activations flow in bf16 (f32 accumulation on MXU).
    x = jnp.transpose(x_nchw, (0, 2, 3, 1)).astype(jnp.bfloat16)   # (N,48,48,3)

    x = conv3x3_relu(x, p["conv1_w"], p["conv1_b"])                # (N,48,48,16)
    x = maxpool2x2(x)                                              # (N,24,24,16)
    x = conv3x3_relu(x, p["conv2_w"], p["conv2_b"])                # (N,24,24,32)
    x = maxpool2x2(x)                                              # (N,12,12,32)
    x = conv3x3_relu(x, p["conv3_w"], p["conv3_b"])                # (N,12,12,64)
    x = maxpool2x2(x)                                              # (N,6,6,64)

    # fc1's columns were pre-permuted to NHWC flatten order -> flatten directly.
    x = x.reshape(x.shape[0], 6 * 6 * 64)                          # (N, 2304)
    return mlp_head(x, p, out_dtype=jnp.float32)                   # (N, num_classes)


# ----------------------------------------------------------------------------
if __name__ == "__main__":
    num_classes = 10
    batch = 2

    key = jax.random.PRNGKey(0)
    k_params, k_input = jax.random.split(key)

    params = init_params(k_params, num_classes)
    prepared = prepare_params(params)

    # Architecture implies 48x48 inputs (48 -> 24 -> 12 -> 6 after three pools).
    x = jax.random.normal(k_input, (batch, 3, 48, 48), jnp.float32)

    # Warm the (cached) hardware probes outside of jit tracing.
    _ = _vmem_limit_bytes()
    _ = _buffered_supported()

    out = network_image_cnn_forward(prepared, x)
    out = jax.block_until_ready(out)

    assert out.shape == (batch, num_classes), out.shape
    assert bool(jnp.all(jnp.isfinite(out)))
    assert bool(jnp.all((out >= 0.0) & (out <= 1.0)))  # sigmoid range
    print("KERNEL_OK")
</pallas_src>

<mosaic_0001>
module attributes {stable_mosaic.version = 11 : i64} {
  func.func @_probe_copy_kernel(%arg0: i32, %arg1: memref<8x128xf32, #tpu.memory_space<vmem>>, %arg2: memref<8x128xf32, #tpu.memory_space<vmem>>) attributes {dimension_semantics = [#tpu.dimension_semantics<arbitrary>], iteration_bounds = array<i64: 1>, scalar_prefetch = 0 : i64, scratch_operands = 0 : i64, tpu.core_type = #tpu.core_type<tc>, window_params = [{pipeline_mode = #tpu.pipeline_mode<synchronous>, transform_indices = @transform_0, window_bounds = array<i64: 8, 128>}, {pipeline_mode = #tpu.pipeline_mode<synchronous>, transform_indices = @transform_1, window_bounds = array<i64: 8, 128>}]} {
    %c0 = arith.constant 0 : index
    %c0_0 = arith.constant 0 : index
    %0 = vector.load %arg1[%c0, %c0_0] : memref<8x128xf32, #tpu.memory_space<vmem>>, vector<8x128xf32>
    %c0_1 = arith.constant 0 : index
    %c0_2 = arith.constant 0 : index
    %1 = vector.load %arg2[%c0_1, %c0_2] : memref<8x128xf32, #tpu.memory_space<vmem>>, vector<8x128xf32>
    tpu.vector_store %arg2[%c0_1, %c0_2], %0 {strides = array<i32>} : memref<8x128xf32, #tpu.memory_space<vmem>>, vector<8x128xf32>,
    return
  }
  func.func @transform_0(%arg0: i32) -> (i32, i32) {
    %c0_i32 = arith.constant 0 : i32
    %c0_i32_0 = arith.constant 0 : i32
    %c0_i32_1 = arith.constant 0 : i32
    return %c0_i32, %c0_i32_0 : i32, i32
  }
  func.func @transform_1(%arg0: i32) -> (i32, i32) {
    %c0_i32 = arith.constant 0 : i32
    %c0_i32_0 = arith.constant 0 : i32
    %c0_i32_1 = arith.constant 0 : i32
    return %c0_i32, %c0_i32_0 : i32, i32
  }
}

module attributes {stable_mosaic.version = 11 : i64} {
  func.func @_linear_act_kernel(%arg0: i32, %arg1: memref<256x27xbf16, #tpu.memory_space<vmem>>, %arg2: memref<27x16xbf16, #tpu.memory_space<vmem>>, %arg3: memref<1x16xf32, #tpu.memory_space<vmem>>, %arg4: memref<256x16xbf16, #tpu.memory_space<vmem>>) attributes {dimension_semantics = [#tpu.dimension_semantics<parallel>], iteration_bounds = array<i64: 18>, scalar_prefetch = 0 : i64, scratch_operands = 0 : i64, tpu.core_type = #tpu.core_type<tc>, window_params = [{transform_indices = @transform_0, window_bounds = array<i64: 256, 27>}, {pipeline_mode = #tpu.pipeline_mode<synchronous>, transform_indices = @transform_1, window_bounds = array<i64: 27, 16>}, {pipeline_mode = #tpu.pipeline_mode<synchronous>, transform_indices = @transform_2, window_bounds = array<i64: 1, 16>}, {transform_indices = @transform_3, window_bounds = array<i64: 256, 16>}]} {
    %c0 = arith.constant 0 : index
    %c0_0 = arith.constant 0 : index
    %0 = vector.load %arg1[%c0, %c0_0] : memref<256x27xbf16, #tpu.memory_space<vmem>>, vector<256x27xbf16>
    %c0_1 = arith.constant 0 : index
    %c0_2 = arith.constant 0 : index
    %1 = vector.load %arg2[%c0_1, %c0_2] : memref<27x16xbf16, #tpu.memory_space<vmem>>, vector<27x16xbf16>
    %cst = arith.constant dense<0.000000e+00> : vector<256x16xf32>
    %2 = tpu.matmul %0, %1, %cst {dimension_numbers = #tpu.dot_dimension_numbers<[1], [0], [0], [1], [0, 0, 1, 1], [], []>} : vector<256x27xbf16>, vector<27x16xbf16>, vector<256x16xf32> -> vector<256x16xf32>
    %c0_3 = arith.constant 0 : index
    %c0_4 = arith.constant 0 : index
    %3 = vector.load %arg3[%c0_3, %c0_4] : memref<1x16xf32, #tpu.memory_space<vmem>>, vector<1x16xf32>
    %4 = vector.broadcast %3 : vector<1x16xf32> to vector<256x16xf32>
    %5 = arith.addf %2, %4 : vector<256x16xf32>
    %cst_5 = arith.constant 0.000000e+00 : f32
    %6 = vector.broadcast %cst_5 : f32 to vector<256x16xf32>
    %7 = arith.maximumf %5, %6 : vector<256x16xf32>
    %8 = arith.truncf %7 : vector<256x16xf32> to vector<256x16xbf16>
    %c0_6 = arith.constant 0 : index
    %c0_7 = arith.constant 0 : index
    %9 = vector.load %arg4[%c0_6, %c0_7] : memref<256x16xbf16, #tpu.memory_space<vmem>>, vector<256x16xbf16>
    tpu.vector_store %arg4[%c0_6, %c0_7], %8 {strides = array<i32>} : memref<256x16xbf16, #tpu.memory_space<vmem>>, vector<256x16xbf16>,
    return
  }
  func.func @transform_0(%arg0: i32) -> (i32, i32) {
    %c0_i32 = arith.constant 0 : i32
    %c0_i32_0 = arith.constant 0 : i32
    return %arg0, %c0_i32 : i32, i32
  }
  func.func @transform_1(%arg0: i32) -> (i32, i32) {
    %c0_i32 = arith.constant 0 : i32
    %c0_i32_0 = arith.constant 0 : i32
    %c0_i32_1 = arith.constant 0 : i32
    return %c0_i32, %c0_i32_0 : i32, i32
  }
  func.func @transform_2(%arg0: i32) -> (i32, i32) {
    %c0_i32 = arith.constant 0 : i32
    %c0_i32_0 = arith.constant 0 : i32
    %c0_i32_1 = arith.constant 0 : i32
    return %c0_i32, %c0_i32_0 : i32, i32
  }
  func.func @transform_3(%arg0: i32) -> (i32, i32) {
    %c0_i32 = arith.constant 0 : i32
    %c0_i32_0 = arith.constant 0 : i32
    return %arg0, %c0_i32 : i32, i32
  }
}

module attributes {stable_mosaic.version = 11 : i64} {
  func.func @_maxpool_kernel(%arg0: i32, %arg1: memref<24x1536xbf16, #tpu.memory_space<vmem>>, %arg2: memref<24x384xbf16, #tpu.memory_space<vmem>>) attributes {dimension_semantics = [#tpu.dimension_semantics<parallel>], iteration_bounds = array<i64: 2>, scalar_prefetch = 0 : i64, scratch_operands = 0 : i64, tpu.core_type = #tpu.core_type<tc>, window_params = [{transform_indices = @transform_0, window_bounds = array<i64: 24, 1536>}, {transform_indices = @transform_1, window_bounds = array<i64: 24, 384>}]} {
    %c0 = arith.constant 0 : index
    %c0_0 = arith.constant 0 : index
    %0 = vector.load %arg1[%c0, %c0_0] : memref<24x1536xbf16, #tpu.memory_space<vmem>>, vector<24x768xbf16>
    %c0_1 = arith.constant 0 : index
    %c768 = arith.constant 768 : index
    %1 = vector.load %arg1[%c0_1, %c768] : memref<24x1536xbf16, #tpu.memory_space<vmem>>, vector<24x768xbf16>
    %2 = arith.maximumf %0, %1 : vector<24x768xbf16>
    %3 = vector.extract_strided_slice %2 {offsets = [0, 0], sizes = [24, 16], strides = [1, 1]} : vector<24x768xbf16> to vector<24x16xbf16>
    %4 = vector.extract_strided_slice %2 {offsets = [0, 16], sizes = [24, 16], strides = [1, 1]} : vector<24x768xbf16> to vector<24x16xbf16>
    %5 = arith.maximumf %3, %4 : vector<24x16xbf16>
    %c0_2 = arith.constant 0 : index
    %c0_3 = arith.constant 0 : index
    %6 = vector.load %arg2[%c0_2, %c0_3] : memref<24x384xbf16, #tpu.memory_space<vmem>>, vector<24x16xbf16>
    tpu.vector_store %arg2[%c0_2, %c0_3], %5 {strides = array<i32>} : memref<24x384xbf16, #tpu.memory_space<vmem>>, vector<24x16xbf16>,
    %7 = vector.extract_strided_slice %2 {offsets = [0, 32], sizes = [24, 16], strides = [1, 1]} : vector<24x768xbf16> to vector<24x16xbf16>
    %8 = vector.extract_strided_slice %2 {offsets = [0, 48], sizes = [24, 16], strides = [1, 1]} : vector<24x768xbf16> to vector<24x16xbf16>
    %9 = arith.maximumf %7, %8 : vector<24x16xbf16>
    %c0_4 = arith.constant 0 : index
    %c16 = arith.constant 16 : index
    %10 = vector.load %arg2[%c0_4, %c16] : memref<24x384xbf16, #tpu.memory_space<vmem>>, vector<24x16xbf16>
    tpu.vector_store %arg2[%c0_4, %c16], %9 {strides = array<i32>} : memref<24x384xbf16, #tpu.memory_space<vmem>>, vector<24x16xbf16>,
    %11 = vector.extract_strided_slice %2 {offsets = [0, 64], sizes = [24, 16], strides = [1, 1]} : vector<24x768xbf16> to vector<24x16xbf16>
    %12 = vector.extract_strided_slice %2 {offsets = [0, 80], sizes = [24, 16], strides = [1, 1]} : vector<24x768xbf16> to vector<24x16xbf16>
    %13 = arith.maximumf %11, %12 : vector<24x16xbf16>
    %c0_5 = arith.constant 0 : index
    %c32 = arith.constant 32 : index
    %14 = vector.load %arg2[%c0_5, %c32] : memref<24x384xbf16, #tpu.memory_space<vmem>>, vector<24x16xbf16>
    tpu.vector_store %arg2[%c0_5, %c32], %13 {strides = array<i32>} : memref<24x384xbf16, #tpu.memory_space<vmem>>, vector<24x16xbf16>,
    %15 = vector.extract_strided_slice %2 {offsets = [0, 96], sizes = [24, 16], strides = [1, 1]} : vector<24x768xbf16> to vector<24x16xbf16>
    %16 = vector.extract_strided_slice %2 {offsets = [0, 112], sizes = [24, 16], strides = [1, 1]} : vector<24x768xbf16> to vector<24x16xbf16>
    %17 = arith.maximumf %15, %16 : vector<24x16xbf16>
    %c0_6 = arith.constant 0 : index
    %c48 = arith.constant 48 : index
    %18 = vector.load %arg2[%c0_6, %c48] : memref<24x384xbf16, #tpu.memory_space<vmem>>, vector<24x16xbf16>
    tpu.vector_store %arg2[%c0_6, %c48], %17 {strides = array<i32>} : memref<24x384xbf16, #tpu.memory_space<vmem>>, vector<24x16xbf16>,
    %19 = vector.extract_strided_slice %2 {offsets = [0, 128], sizes = [24, 16], strides = [1, 1]} : vector<24x768xbf16> to vector<24x16xbf16>
    %20 = vector.extract_strided_slice %2 {offsets = [0, 144], sizes = [24, 16], strides = [1, 1]} : vector<24x768xbf16> to vector<24x16xbf16>
    %21 = arith.maximumf %19, %20 : vector<24x16xbf16>
    %c0_7 = arith.constant 0 : index
    %c64 = arith.constant 64 : index
    %22 = vector.load %arg2[%c0_7, %c64] : memref<24x384xbf16, #tpu.memory_space<vmem>>, vector<24x16xbf16>
    tpu.vector_store %arg2[%c0_7, %c64], %21 {strides = array<i32>} : memref<24x384xbf16, #tpu.memory_space<vmem>>, vector<24x16xbf16>,
    %23 = vector.extract_strided_slice %2 {offsets = [0, 160], sizes = [24, 16], strides = [1, 1]} : vector<24x768xbf16> to vector<24x16xbf16>
    %24 = vector.extract_strided_slice %2 {offsets = [0, 176], sizes = [24, 16], strides = [1, 1]} : vector<24x768xbf16> to vector<24x16xbf16>
    %25 = arith.maximumf %23, %24 : vector<24x16xbf16>
    %c0_8 = arith.constant 0 : index
    %c80 = arith.constant 80 : index
    %26 = vector.load %arg2[%c0_8, %c80] : memref<24x384xbf16, #tpu.memory_space<vmem>>, vector<24x16xbf16>
    tpu.vector_store %arg2[%c0_8, %c80], %25 {strides = array<i32>} : memref<24x384xbf16, #tpu.memory_space<vmem>>, vector<24x16xbf16>,
    %27 = vector.extract_strided_slice %2 {offsets = [0, 192], sizes = [24, 16], strides = [1, 1]} : vector<24x768xbf16> to vector<24x16xbf16>
    %28 = vector.extract_strided_slice %2 {offsets = [0, 208], sizes = [24, 16], strides = [1, 1]} : vector<24x768xbf16> to vector<24x16xbf16>
    %29 = arith.maximumf %27, %28 : vector<24x16xbf16>
    %c0_9 = arith.constant 0 : index
    %c96 = arith.constant 96 : index
    %30 = vector.load %arg2[%c0_9, %c96] : memref<24x384xbf16, #tpu.memory_space<vmem>>, vector<24x16xbf16>
    tpu.vector_store %arg2[%c0_9, %c96], %29 {strides = array<i32>} : memref<24x384xbf16, #tpu.memory_space<vmem>>, vector<24x16xbf16>,
    %31 = vector.extract_strided_slice %2 {offsets = [0, 224], sizes = [24, 16], strides = [1, 1]} : vector<24x768xbf16> to vector<24x16xbf16>
    %32 = vector.extract_strided_slice %2 {offsets = [0, 240], sizes = [24, 16], strides = [1, 1]} : vector<24x768xbf16> to vector<24x16xbf16>
    %33 = arith.maximumf %31, %32 : vector<24x16xbf16>
    %c0_10 = arith.constant 0 : index
    %c112 = arith.constant 112 : index
    %34 = vector.load %arg2[%c0_10, %c112] : memref<24x384xbf16, #tpu.memory_space<vmem>>, vector<24x16xbf16>
    tpu.vector_store %arg2[%c0_10, %c112], %33 {strides = array<i32>} : memref<24x384xbf16, #tpu.memory_space<vmem>>, vector<24x16xbf16>,
    %35 = vector.extract_strided_slice %2 {offsets = [0, 256], sizes = [24, 16], strides = [1, 1]} : vector<24x768xbf16> to vector<24x16xbf16>
    %36 = vector.extract_strided_slice %2 {offsets = [0, 272], sizes = [24, 16], strides = [1, 1]} : vector<24x768xbf16> to vector<24x16xbf16>
    %37 = arith.maximumf %35, %36 : vector<24x16xbf16>
    %c0_11 = arith.constant 0 : index
    %c128 = arith.constant 128 : index
    %38 = vector.load %arg2[%c0_11, %c128] : memref<24x384xbf16, #tpu.memory_space<vmem>>, vector<24x16xbf16>
    tpu.vector_store %arg2[%c0_11, %c128], %37 {strides = array<i32>} : memref<24x384xbf16, #tpu.memory_space<vmem>>, vector<24x16xbf16>,
    %39 = vector.extract_strided_slice %2 {offsets = [0, 288], sizes = [24, 16], strides = [1, 1]} : vector<24x768xbf16> to vector<24x16xbf16>
    %40 = vector.extract_strided_slice %2 {offsets = [0, 304], sizes = [24, 16], strides = [1, 1]} : vector<24x768xbf16> to vector<24x16xbf16>
    %41 = arith.maximumf %39, %40 : vector<24x16xbf16>
    %c0_12 = arith.constant 0 : index
    %c144 = arith.constant 144 : index
    %42 = vector.load %arg2[%c0_12, %c144] : memref<24x384xbf16, #tpu.memory_space<vmem>>, vector<24x16xbf16>
    tpu.vector_store %arg2[%c0_12, %c144], %41 {strides = array<i32>} : memref<24x384xbf16, #tpu.memory_space<vmem>>, vector<24x16xbf16>,
    %43 = vector.extract_strided_slice %2 {offsets = [0, 320], sizes = [24, 16], strides = [1, 1]} : vector<24x768xbf16> to vector<24x16xbf16>
    %44 = vector.extract_strided_slice %2 {offsets = [0, 336], sizes = [24, 16], strides = [1, 1]} : vector<24x768xbf16> to vector<24x16xbf16>
    %45 = arith.maximumf %43, %44 : vector<24x16xbf16>
    %c0_13 = arith.constant 0 : index
    %c160 = arith.constant 160 : index
    %46 = vector.load %arg2[%c0_13, %c160] : memref<24x384xbf16, #tpu.memory_space<vmem>>, vector<24x16xbf16>
    tpu.vector_store %arg2[%c0_13, %c160], %45 {strides = array<i32>} : memref<24x384xbf16, #tpu.memory_space<vmem>>, vector<24x16xbf16>,
    %47 = vector.extract_strided_slice %2 {offsets = [0, 352], sizes = [24, 16], strides = [1, 1]} : vector<24x768xbf16> to vector<24x16xbf16>
    %48 = vector.extract_strided_slice %2 {offsets = [0, 368], sizes = [24, 16], strides = [1, 1]} : vector<24x768xbf16> to vector<24x16xbf16>
    %49 = arith.maximumf %47, %48 : vector<24x16xbf16>
    %c0_14 = arith.constant 0 : index
    %c176 = arith.constant 176 : index
    %50 = vector.load %arg2[%c0_14, %c176] : memref<24x384xbf16, #tpu.memory_space<vmem>>, vector<24x16xbf16>
    tpu.vector_store %arg2[%c0_14, %c176], %49 {strides = array<i32>} : memref<24x384xbf16, #tpu.memory_space<vmem>>, vector<24x16xbf16>,
    %51 = vector.extract_strided_slice %2 {offsets = [0, 384], sizes = [24, 16], strides = [1, 1]} : vector<24x768xbf16> to vector<24x16xbf16>
    %52 = vector.extract_strided_slice %2 {offsets = [0, 400], sizes = [24, 16], strides = [1, 1]} : vector<24x768xbf16> to vector<24x16xbf16>
    %53 = arith.maximumf %51, %52 : vector<24x16xbf16>
    %c0_15 = arith.constant 0 : index
    %c192 = arith.constant 192 : index
    %54 = vector.load %arg2[%c0_15, %c192] : memref<24x384xbf16, #tpu.memory_space<vmem>>, vector<24x16xbf16>
    tpu.vector_store %arg2[%c0_15, %c192], %53 {strides = array<i32>} : memref<24x384xbf16, #tpu.memory_space<vmem>>, vector<24x16xbf16>,
    %55 = vector.extract_strided_slice %2 {offsets = [0, 416], sizes = [24, 16], strides = [1, 1]} : vector<24x768xbf16> to vector<24x16xbf16>
    %56 = vector.extract_strided_slice %2 {offsets = [0, 432], sizes = [24, 16], strides = [1, 1]} : vector<24x768xbf16> to vector<24x16xbf16>
    %57 = arith.maximumf %55, %56 : vector<24x16xbf16>
    %c0_16 = arith.constant 0 : index
    %c208 = arith.constant 208 : index
    %58 = vector.load %arg2[%c0_16, %c208] : memref<24x384xbf16, #tpu.memory_space<vmem>>, vector<24x16xbf16>
    tpu.vector_store %arg2[%c0_16, %c208], %57 {strides = array<i32>} : memref<24x384xbf16, #tpu.memory_space<vmem>>, vector<24x16xbf16>,
    %59 = vector.extract_strided_slice %2 {offsets = [0, 448], sizes = [24, 16], strides = [1, 1]} : vector<24x768xbf16> to vector<24x16xbf16>
    %60 = vector.extract_strided_slice %2 {offsets = [0, 464], sizes = [24, 16], strides = [1, 1]} : vector<24x768xbf16> to vector<24x16xbf16>
    %61 = arith.maximumf %59, %60 : vector<24x16xbf16>
    %c0_17 = arith.constant 0 : index
    %c224 = arith.constant 224 : index
    %62 = vector.load %arg2[%c0_17, %c224] : memref<24x384xbf16, #tpu.memory_space<vmem>>, vector<24x16xbf16>
    tpu.vector_store %arg2[%c0_17, %c224], %61 {strides = array<i32>} : memref<24x384xbf16, #tpu.memory_space<vmem>>, vector<24x16xbf16>,
    %63 = vector.extract_strided_slice %2 {offsets = [0, 480], sizes = [24, 16], strides = [1, 1]} : vector<24x768xbf16> to vector<24x16xbf16>
    %64 = vector.extract_strided_slice %2 {offsets = [0, 496], sizes = [24, 16], strides = [1, 1]} : vector<24x768xbf16> to vector<24x16xbf16>
    %65 = arith.maximumf %63, %64 : vector<24x16xbf16>
    %c0_18 = arith.constant 0 : index
    %c240 = arith.constant 240 : index
    %66 = vector.load %arg2[%c0_18, %c240] : memref<24x384xbf16, #tpu.memory_space<vmem>>, vector<24x16xbf16>
    tpu.vector_store %arg2[%c0_18, %c240], %65 {strides = array<i32>} : memref<24x384xbf16, #tpu.memory_space<vmem>>, vector<24x16xbf16>,
    %67 = vector.extract_strided_slice %2 {offsets = [0, 512], sizes = [24, 16], strides = [1, 1]} : vector<24x768xbf16> to vector<24x16xbf16>
    %68 = vector.extract_strided_slice %2 {offsets = [0, 528], sizes = [24, 16], strides = [1, 1]} : vector<24x768xbf16> to vector<24x16xbf16>
    %69 = arith.maximumf %67, %68 : vector<24x16xbf16>
    %c0_19 = arith.constant 0 : index
    %c256 = arith.constant 256 : index
    %70 = vector.load %arg2[%c0_19, %c256] : memref<24x384xbf16, #tpu.memory_space<vmem>>, vector<24x16xbf16>
    tpu.vector_store %arg2[%c0_19, %c256], %69 {strides = array<i32>} : memref<24x384xbf16, #tpu.memory_space<vmem>>, vector<24x16xbf16>,
    %71 = vector.extract_strided_slice %2 {offsets = [0, 544], sizes = [24, 16], strides = [1, 1]} : vector<24x768xbf16> to vector<24x16xbf16>
    %72 = vector.extract_strided_slice %2 {offsets = [0, 560], sizes = [24, 16], strides = [1, 1]} : vector<24x768xbf16> to vector<24x16xbf16>
    %73 = arith.maximumf %71, %72 : vector<24x16xbf16>
    %c0_20 = arith.constant 0 : index
    %c272 = arith.constant 272 : index
    %74 = vector.load %arg2[%c0_20, %c272] : memref<24x384xbf16, #tpu.memory_space<vmem>>, vector<24x16xbf16>
    tpu.vector_store %arg2[%c0_20, %c272], %73 {strides = array<i32>} : memref<24x384xbf16, #tpu.memory_space<vmem>>, vector<24x16xbf16>,
    %75 = vector.extract_strided_slice %2 {offsets = [0, 576], sizes = [24, 16], strides = [1, 1]} : vector<24x768xbf16> to vector<24x16xbf16>
    %76 = vector.extract_strided_slice %2 {offsets = [0, 592], sizes = [24, 16], strides = [1, 1]} : vector<24x768xbf16> to vector<24x16xbf16>
    %77 = arith.maximumf %75, %76 : vector<24x16xbf16>
    %c0_21 = arith.constant 0 : index
    %c288 = arith.constant 288 : index
    %78 = vector.load %arg2[%c0_21, %c288] : memref<24x384xbf16, #tpu.memory_space<vmem>>, vector<24x16xbf16>
    tpu.vector_store %arg2[%c0_21, %c288], %77 {strides = array<i32>} : memref<24x384xbf16, #tpu.memory_space<vmem>>, vector<24x16xbf16>,
    %79 = vector.extract_strided_slice %2 {offsets = [0, 608], sizes = [24, 16], strides = [1, 1]} : vector<24x768xbf16> to vector<24x16xbf16>
    %80 = vector.extract_strided_slice %2 {offsets = [0, 624], sizes = [24, 16], strides = [1, 1]} : vector<24x768xbf16> to vector<24x16xbf16>
    %81 = arith.maximumf %79, %80 : vector<24x16xbf16>
    %c0_22 = arith.constant 0 : index
    %c304 = arith.constant 304 : index
    %82 = vector.load %arg2[%c0_22, %c304] : memref<24x384xbf16, #tpu.memory_space<vmem>>, vector<24x16xbf16>
    tpu.vector_store %arg2[%c0_22, %c304], %81 {strides = array<i32>} : memref<24x384xbf16, #tpu.memory_space<vmem>>, vector<24x16xbf16>,
    %83 = vector.extract_strided_slice %2 {offsets = [0, 640], sizes = [24, 16], strides = [1, 1]} : vector<24x768xbf16> to vector<24x16xbf16>
    %84 = vector.extract_strided_slice %2 {offsets = [0, 656], sizes = [24, 16], strides = [1, 1]} : vector<24x768xbf16> to vector<24x16xbf16>
    %85 = arith.maximumf %83, %84 : vector<24x16xbf16>
    %c0_23 = arith.constant 0 : index
    %c320 = arith.constant 320 : index
    %86 = vector.load %arg2[%c0_23, %c320] : memref<24x384xbf16, #tpu.memory_space<vmem>>, vector<24x16xbf16>
    tpu.vector_store %arg2[%c0_23, %c320], %85 {strides = array<i32>} : memref<24x384xbf16, #tpu.memory_space<vmem>>, vector<24x16xbf16>,
    %87 = vector.extract_strided_slice %2 {offsets = [0, 672], sizes = [24, 16], strides = [1, 1]} : vector<24x768xbf16> to vector<24x16xbf16>
    %88 = vector.extract_strided_slice %2 {offsets = [0, 688], sizes = [24, 16], strides = [1, 1]} : vector<24x768xbf16> to vector<24x16xbf16>
    %89 = arith.maximumf %87, %88 : vector<24x16xbf16>
    %c0_24 = arith.constant 0 : index
    %c336 = arith.constant 336 : index
    %90 = vector.load %arg2[%c0_24, %c336] : memref<24x384xbf16, #tpu.memory_space<vmem>>, vector<24x16xbf16>
    tpu.vector_store %arg2[%c0_24, %c336], %89 {strides = array<i32>} : memref<24x384xbf16, #tpu.memory_space<vmem>>, vector<24x16xbf16>,
    %91 = vector.extract_strided_slice %2 {offsets = [0, 704], sizes = [24, 16], strides = [1, 1]} : vector<24x768xbf16> to vector<24x16xbf16>
    %92 = vector.extract_strided_slice %2 {offsets = [0, 720], sizes = [24, 16], strides = [1, 1]} : vector<24x768xbf16> to vector<24x16xbf16>
    %93 = arith.maximumf %91, %92 : vector<24x16xbf16>
    %c0_25 = arith.constant 0 : index
    %c352 = arith.constant 352 : index
    %94 = vector.load %arg2[%c0_25, %c352] : memref<24x384xbf16, #tpu.memory_space<vmem>>, vector<24x16xbf16>
    tpu.vector_store %arg2[%c0_25, %c352], %93 {strides = array<i32>} : memref<24x384xbf16, #tpu.memory_space<vmem>>, vector<24x16xbf16>,
    %95 = vector.extract_strided_slice %2 {offsets = [0, 736], sizes = [24, 16], strides = [1, 1]} : vector<24x768xbf16> to vector<24x16xbf16>
    %96 = vector.extract_strided_slice %2 {offsets = [0, 752], sizes = [24, 16], strides = [1, 1]} : vector<24x768xbf16> to vector<24x16xbf16>
    %97 = arith.maximumf %95, %96 : vector<24x16xbf16>
    %c0_26 = arith.constant 0 : index
    %c368 = arith.constant 368 : index
    %98 = vector.load %arg2[%c0_26, %c368] : memref<24x384xbf16, #tpu.memory_space<vmem>>, vector<24x16xbf16>
    tpu.vector_store %arg2[%c0_26, %c368], %97 {strides = array<i32>} : memref<24x384xbf16, #tpu.memory_space<vmem>>, vector<24x16xbf16>,
    return
  }
  func.func @transform_0(%arg0: i32) -> (i32, i32) {
    %c0_i32 = arith.constant 0 : i32
    %c0_i32_0 = arith.constant 0 : i32
    return %arg0, %c0_i32 : i32, i32
  }
  func.func @transform_1(%arg0: i32) -> (i32, i32) {
    %c0_i32 = arith.constant 0 : i32
    %c0_i32_0 = arith.constant 0 : i32
    return %arg0, %c0_i32 : i32, i32
  }
}

module attributes {stable_mosaic.version = 11 : i64} {
  func.func @_linear_act_kernel(%arg0: i32, %arg1: memref<192x144xbf16, #tpu.memory_space<vmem>>, %arg2: memref<144x32xbf16, #tpu.memory_space<vmem>>, %arg3: memref<1x32xf32, #tpu.memory_space<vmem>>, %arg4: memref<192x32xbf16, #tpu.memory_space<vmem>>) attributes {dimension_semantics = [#tpu.dimension_semantics<parallel>], iteration_bounds = array<i64: 6>, scalar_prefetch = 0 : i64, scratch_operands = 0 : i64, tpu.core_type = #tpu.core_type<tc>, window_params = [{transform_indices = @transform_0, window_bounds = array<i64: 192, 144>}, {pipeline_mode = #tpu.pipeline_mode<synchronous>, transform_indices = @transform_1, window_bounds = array<i64: 144, 32>}, {pipeline_mode = #tpu.pipeline_mode<synchronous>, transform_indices = @transform_2, window_bounds = array<i64: 1, 32>}, {transform_indices = @transform_3, window_bounds = array<i64: 192, 32>}]} {
    %c0 = arith.constant 0 : index
    %c0_0 = arith.constant 0 : index
    %0 = vector.load %arg1[%c0, %c0_0] : memref<192x144xbf16, #tpu.memory_space<vmem>>, vector<192x144xbf16>
    %c0_1 = arith.constant 0 : index
    %c0_2 = arith.constant 0 : index
    %1 = vector.load %arg2[%c0_1, %c0_2] : memref<144x32xbf16, #tpu.memory_space<vmem>>, vector<144x32xbf16>
    %cst = arith.constant dense<0.000000e+00> : vector<192x32xf32>
    %2 = tpu.matmul %0, %1, %cst {dimension_numbers = #tpu.dot_dimension_numbers<[1], [0], [0], [1], [0, 0, 1, 1], [], []>} : vector<192x144xbf16>, vector<144x32xbf16>, vector<192x32xf32> -> vector<192x32xf32>
    %c0_3 = arith.constant 0 : index
    %c0_4 = arith.constant 0 : index
    %3 = vector.load %arg3[%c0_3, %c0_4] : memref<1x32xf32, #tpu.memory_space<vmem>>, vector<1x32xf32>
    %4 = vector.broadcast %3 : vector<1x32xf32> to vector<192x32xf32>
    %5 = arith.addf %2, %4 : vector<192x32xf32>
    %cst_5 = arith.constant 0.000000e+00 : f32
    %6 = vector.broadcast %cst_5 : f32 to vector<192x32xf32>
    %7 = arith.maximumf %5, %6 : vector<192x32xf32>
    %8 = arith.truncf %7 : vector<192x32xf32> to vector<192x32xbf16>
    %c0_6 = arith.constant 0 : index
    %c0_7 = arith.constant 0 : index
    %9 = vector.load %arg4[%c0_6, %c0_7] : memref<192x32xbf16, #tpu.memory_space<vmem>>, vector<192x32xbf16>
    tpu.vector_store %arg4[%c0_6, %c0_7], %8 {strides = array<i32>} : memref<192x32xbf16, #tpu.memory_space<vmem>>, vector<192x32xbf16>,
    return
  }
  func.func @transform_0(%arg0: i32) -> (i32, i32) {
    %c0_i32 = arith.constant 0 : i32
    %c0_i32_0 = arith.constant 0 : i32
    return %arg0, %c0_i32 : i32, i32
  }
  func.func @transform_1(%arg0: i32) -> (i32, i32) {
    %c0_i32 = arith.constant 0 : i32
    %c0_i32_0 = arith.constant 0 : i32
    %c0_i32_1 = arith.constant 0 : i32
    return %c0_i32, %c0_i32_0 : i32, i32
  }
  func.func @transform_2(%arg0: i32) -> (i32, i32) {
    %c0_i32 = arith.constant 0 : i32
    %c0_i32_0 = arith.constant 0 : i32
    %c0_i32_1 = arith.constant 0 : i32
    return %c0_i32, %c0_i32_0 : i32, i32
  }
  func.func @transform_3(%arg0: i32) -> (i32, i32) {
    %c0_i32 = arith.constant 0 : i32
    %c0_i32_0 = arith.constant 0 : i32
    return %arg0, %c0_i32 : i32, i32
  }
}

module attributes {stable_mosaic.version = 11 : i64} {
  func.func @_maxpool_kernel(%arg0: i32, %arg1: memref<8x1536xbf16, #tpu.memory_space<vmem>>, %arg2: memref<8x384xbf16, #tpu.memory_space<vmem>>) attributes {dimension_semantics = [#tpu.dimension_semantics<parallel>], iteration_bounds = array<i64: 3>, scalar_prefetch = 0 : i64, scratch_operands = 0 : i64, tpu.core_type = #tpu.core_type<tc>, window_params = [{transform_indices = @transform_0, window_bounds = array<i64: 8, 1536>}, {transform_indices = @transform_1, window_bounds = array<i64: 8, 384>}]} {
    %c0 = arith.constant 0 : index
    %c0_0 = arith.constant 0 : index
    %0 = vector.load %arg1[%c0, %c0_0] : memref<8x1536xbf16, #tpu.memory_space<vmem>>, vector<8x768xbf16>
    %c0_1 = arith.constant 0 : index
    %c768 = arith.constant 768 : index
    %1 = vector.load %arg1[%c0_1, %c768] : memref<8x1536xbf16, #tpu.memory_space<vmem>>, vector<8x768xbf16>
    %2 = arith.maximumf %0, %1 : vector<8x768xbf16>
    %3 = vector.extract_strided_slice %2 {offsets = [0, 0], sizes = [8, 32], strides = [1, 1]} : vector<8x768xbf16> to vector<8x32xbf16>
    %4 = vector.extract_strided_slice %2 {offsets = [0, 32], sizes = [8, 32], strides = [1, 1]} : vector<8x768xbf16> to vector<8x32xbf16>
    %5 = arith.maximumf %3, %4 : vector<8x32xbf16>
    %c0_2 = arith.constant 0 : index
    %c0_3 = arith.constant 0 : index
    %6 = vector.load %arg2[%c0_2, %c0_3] : memref<8x384xbf16, #tpu.memory_space<vmem>>, vector<8x32xbf16>
    tpu.vector_store %arg2[%c0_2, %c0_3], %5 {strides = array<i32>} : memref<8x384xbf16, #tpu.memory_space<vmem>>, vector<8x32xbf16>,
    %7 = vector.extract_strided_slice %2 {offsets = [0, 64], sizes = [8, 32], strides = [1, 1]} : vector<8x768xbf16> to vector<8x32xbf16>
    %8 = vector.extract_strided_slice %2 {offsets = [0, 96], sizes = [8, 32], strides = [1, 1]} : vector<8x768xbf16> to vector<8x32xbf16>
    %9 = arith.maximumf %7, %8 : vector<8x32xbf16>
    %c0_4 = arith.constant 0 : index
    %c32 = arith.constant 32 : index
    %10 = vector.load %arg2[%c0_4, %c32] : memref<8x384xbf16, #tpu.memory_space<vmem>>, vector<8x32xbf16>
    tpu.vector_store %arg2[%c0_4, %c32], %9 {strides = array<i32>} : memref<8x384xbf16, #tpu.memory_space<vmem>>, vector<8x32xbf16>,
    %11 = vector.extract_strided_slice %2 {offsets = [0, 128], sizes = [8, 32], strides = [1, 1]} : vector<8x768xbf16> to vector<8x32xbf16>
    %12 = vector.extract_strided_slice %2 {offsets = [0, 160], sizes = [8, 32], strides = [1, 1]} : vector<8x768xbf16> to vector<8x32xbf16>
    %13 = arith.maximumf %11, %12 : vector<8x32xbf16>
    %c0_5 = arith.constant 0 : index
    %c64 = arith.constant 64 : index
    %14 = vector.load %arg2[%c0_5, %c64] : memref<8x384xbf16, #tpu.memory_space<vmem>>, vector<8x32xbf16>
    tpu.vector_store %arg2[%c0_5, %c64], %13 {strides = array<i32>} : memref<8x384xbf16, #tpu.memory_space<vmem>>, vector<8x32xbf16>,
    %15 = vector.extract_strided_slice %2 {offsets = [0, 192], sizes = [8, 32], strides = [1, 1]} : vector<8x768xbf16> to vector<8x32xbf16>
    %16 = vector.extract_strided_slice %2 {offsets = [0, 224], sizes = [8, 32], strides = [1, 1]} : vector<8x768xbf16> to vector<8x32xbf16>
    %17 = arith.maximumf %15, %16 : vector<8x32xbf16>
    %c0_6 = arith.constant 0 : index
    %c96 = arith.constant 96 : index
    %18 = vector.load %arg2[%c0_6, %c96] : memref<8x384xbf16, #tpu.memory_space<vmem>>, vector<8x32xbf16>
    tpu.vector_store %arg2[%c0_6, %c96], %17 {strides = array<i32>} : memref<8x384xbf16, #tpu.memory_space<vmem>>, vector<8x32xbf16>,
    %19 = vector.extract_strided_slice %2 {offsets = [0, 256], sizes = [8, 32], strides = [1, 1]} : vector<8x768xbf16> to vector<8x32xbf16>
    %20 = vector.extract_strided_slice %2 {offsets = [0, 288], sizes = [8, 32], strides = [1, 1]} : vector<8x768xbf16> to vector<8x32xbf16>
    %21 = arith.maximumf %19, %20 : vector<8x32xbf16>
    %c0_7 = arith.constant 0 : index
    %c128 = arith.constant 128 : index
    %22 = vector.load %arg2[%c0_7, %c128] : memref<8x384xbf16, #tpu.memory_space<vmem>>, vector<8x32xbf16>
    tpu.vector_store %arg2[%c0_7, %c128], %21 {strides = array<i32>} : memref<8x384xbf16, #tpu.memory_space<vmem>>, vector<8x32xbf16>,
    %23 = vector.extract_strided_slice %2 {offsets = [0, 320], sizes = [8, 32], strides = [1, 1]} : vector<8x768xbf16> to vector<8x32xbf16>
    %24 = vector.extract_strided_slice %2 {offsets = [0, 352], sizes = [8, 32], strides = [1, 1]} : vector<8x768xbf16> to vector<8x32xbf16>
    %25 = arith.maximumf %23, %24 : vector<8x32xbf16>
    %c0_8 = arith.constant 0 : index
    %c160 = arith.constant 160 : index
    %26 = vector.load %arg2[%c0_8, %c160] : memref<8x384xbf16, #tpu.memory_space<vmem>>, vector<8x32xbf16>
    tpu.vector_store %arg2[%c0_8, %c160], %25 {strides = array<i32>} : memref<8x384xbf16, #tpu.memory_space<vmem>>, vector<8x32xbf16>,
    %27 = vector.extract_strided_slice %2 {offsets = [0, 384], sizes = [8, 32], strides = [1, 1]} : vector<8x768xbf16> to vector<8x32xbf16>
    %28 = vector.extract_strided_slice %2 {offsets = [0, 416], sizes = [8, 32], strides = [1, 1]} : vector<8x768xbf16> to vector<8x32xbf16>
    %29 = arith.maximumf %27, %28 : vector<8x32xbf16>
    %c0_9 = arith.constant 0 : index
    %c192 = arith.constant 192 : index
    %30 = vector.load %arg2[%c0_9, %c192] : memref<8x384xbf16, #tpu.memory_space<vmem>>, vector<8x32xbf16>
    tpu.vector_store %arg2[%c0_9, %c192], %29 {strides = array<i32>} : memref<8x384xbf16, #tpu.memory_space<vmem>>, vector<8x32xbf16>,
    %31 = vector.extract_strided_slice %2 {offsets = [0, 448], sizes = [8, 32], strides = [1, 1]} : vector<8x768xbf16> to vector<8x32xbf16>
    %32 = vector.extract_strided_slice %2 {offsets = [0, 480], sizes = [8, 32], strides = [1, 1]} : vector<8x768xbf16> to vector<8x32xbf16>
    %33 = arith.maximumf %31, %32 : vector<8x32xbf16>
    %c0_10 = arith.constant 0 : index
    %c224 = arith.constant 224 : index
    %34 = vector.load %arg2[%c0_10, %c224] : memref<8x384xbf16, #tpu.memory_space<vmem>>, vector<8x32xbf16>
    tpu.vector_store %arg2[%c0_10, %c224], %33 {strides = array<i32>} : memref<8x384xbf16, #tpu.memory_space<vmem>>, vector<8x32xbf16>,
    %35 = vector.extract_strided_slice %2 {offsets = [0, 512], sizes = [8, 32], strides = [1, 1]} : vector<8x768xbf16> to vector<8x32xbf16>
    %36 = vector.extract_strided_slice %2 {offsets = [0, 544], sizes = [8, 32], strides = [1, 1]} : vector<8x768xbf16> to vector<8x32xbf16>
    %37 = arith.maximumf %35, %36 : vector<8x32xbf16>
    %c0_11 = arith.constant 0 : index
    %c256 = arith.constant 256 : index
    %38 = vector.load %arg2[%c0_11, %c256] : memref<8x384xbf16, #tpu.memory_space<vmem>>, vector<8x32xbf16>
    tpu.vector_store %arg2[%c0_11, %c256], %37 {strides = array<i32>} : memref<8x384xbf16, #tpu.memory_space<vmem>>, vector<8x32xbf16>,
    %39 = vector.extract_strided_slice %2 {offsets = [0, 576], sizes = [8, 32], strides = [1, 1]} : vector<8x768xbf16> to vector<8x32xbf16>
    %40 = vector.extract_strided_slice %2 {offsets = [0, 608], sizes = [8, 32], strides = [1, 1]} : vector<8x768xbf16> to vector<8x32xbf16>
    %41 = arith.maximumf %39, %40 : vector<8x32xbf16>
    %c0_12 = arith.constant 0 : index
    %c288 = arith.constant 288 : index
    %42 = vector.load %arg2[%c0_12, %c288] : memref<8x384xbf16, #tpu.memory_space<vmem>>, vector<8x32xbf16>
    tpu.vector_store %arg2[%c0_12, %c288], %41 {strides = array<i32>} : memref<8x384xbf16, #tpu.memory_space<vmem>>, vector<8x32xbf16>,
    %43 = vector.extract_strided_slice %2 {offsets = [0, 640], sizes = [8, 32], strides = [1, 1]} : vector<8x768xbf16> to vector<8x32xbf16>
    %44 = vector.extract_strided_slice %2 {offsets = [0, 672], sizes = [8, 32], strides = [1, 1]} : vector<8x768xbf16> to vector<8x32xbf16>
    %45 = arith.maximumf %43, %44 : vector<8x32xbf16>
    %c0_13 = arith.constant 0 : index
    %c320 = arith.constant 320 : index
    %46 = vector.load %arg2[%c0_13, %c320] : memref<8x384xbf16, #tpu.memory_space<vmem>>, vector<8x32xbf16>
    tpu.vector_store %arg2[%c0_13, %c320], %45 {strides = array<i32>} : memref<8x384xbf16, #tpu.memory_space<vmem>>, vector<8x32xbf16>,
    %47 = vector.extract_strided_slice %2 {offsets = [0, 704], sizes = [8, 32], strides = [1, 1]} : vector<8x768xbf16> to vector<8x32xbf16>
    %48 = vector.extract_strided_slice %2 {offsets = [0, 736], sizes = [8, 32], strides = [1, 1]} : vector<8x768xbf16> to vector<8x32xbf16>
    %49 = arith.maximumf %47, %48 : vector<8x32xbf16>
    %c0_14 = arith.constant 0 : index
    %c352 = arith.constant 352 : index
    %50 = vector.load %arg2[%c0_14, %c352] : memref<8x384xbf16, #tpu.memory_space<vmem>>, vector<8x32xbf16>
    tpu.vector_store %arg2[%c0_14, %c352], %49 {strides = array<i32>} : memref<8x384xbf16, #tpu.memory_space<vmem>>, vector<8x32xbf16>,
    return
  }
  func.func @transform_0(%arg0: i32) -> (i32, i32) {
    %c0_i32 = arith.constant 0 : i32
    %c0_i32_0 = arith.constant 0 : i32
    return %arg0, %c0_i32 : i32, i32
  }
  func.func @transform_1(%arg0: i32) -> (i32, i32) {
    %c0_i32 = arith.constant 0 : i32
    %c0_i32_0 = arith.constant 0 : i32
    return %arg0, %c0_i32 : i32, i32
  }
}

module attributes {stable_mosaic.version = 11 : i64} {
  func.func @_linear_act_kernel(%arg0: i32, %arg1: memref<144x288xbf16, #tpu.memory_space<vmem>>, %arg2: memref<288x64xbf16, #tpu.memory_space<vmem>>, %arg3: memref<1x64xf32, #tpu.memory_space<vmem>>, %arg4: memref<144x64xbf16, #tpu.memory_space<vmem>>) attributes {dimension_semantics = [#tpu.dimension_semantics<parallel>], iteration_bounds = array<i64: 2>, scalar_prefetch = 0 : i64, scratch_operands = 0 : i64, tpu.core_type = #tpu.core_type<tc>, window_params = [{transform_indices = @transform_0, window_bounds = array<i64: 144, 288>}, {pipeline_mode = #tpu.pipeline_mode<synchronous>, transform_indices = @transform_1, window_bounds = array<i64: 288, 64>}, {pipeline_mode = #tpu.pipeline_mode<synchronous>, transform_indices = @transform_2, window_bounds = array<i64: 1, 64>}, {transform_indices = @transform_3, window_bounds = array<i64: 144, 64>}]} {
    %c0 = arith.constant 0 : index
    %c0_0 = arith.constant 0 : index
    %0 = vector.load %arg1[%c0, %c0_0] : memref<144x288xbf16, #tpu.memory_space<vmem>>, vector<144x288xbf16>
    %c0_1 = arith.constant 0 : index
    %c0_2 = arith.constant 0 : index
    %1 = vector.load %arg2[%c0_1, %c0_2] : memref<288x64xbf16, #tpu.memory_space<vmem>>, vector<288x64xbf16>
    %cst = arith.constant dense<0.000000e+00> : vector<144x64xf32>
    %2 = tpu.matmul %0, %1, %cst {dimension_numbers = #tpu.dot_dimension_numbers<[1], [0], [0], [1], [0, 0, 1, 1], [], []>} : vector<144x288xbf16>, vector<288x64xbf16>, vector<144x64xf32> -> vector<144x64xf32>
    %c0_3 = arith.constant 0 : index
    %c0_4 = arith.constant 0 : index
    %3 = vector.load %arg3[%c0_3, %c0_4] : memref<1x64xf32, #tpu.memory_space<vmem>>, vector<1x64xf32>
    %4 = vector.broadcast %3 : vector<1x64xf32> to vector<144x64xf32>
    %5 = arith.addf %2, %4 : vector<144x64xf32>
    %cst_5 = arith.constant 0.000000e+00 : f32
    %6 = vector.broadcast %cst_5 : f32 to vector<144x64xf32>
    %7 = arith.maximumf %5, %6 : vector<144x64xf32>
    %8 = arith.truncf %7 : vector<144x64xf32> to vector<144x64xbf16>
    %c0_6 = arith.constant 0 : index
    %c0_7 = arith.constant 0 : index
    %9 = vector.load %arg4[%c0_6, %c0_7] : memref<144x64xbf16, #tpu.memory_space<vmem>>, vector<144x64xbf16>
    tpu.vector_store %arg4[%c0_6, %c0_7], %8 {strides = array<i32>} : memref<144x64xbf16, #tpu.memory_space<vmem>>, vector<144x64xbf16>,
    return
  }
  func.func @transform_0(%arg0: i32) -> (i32, i32) {
    %c0_i32 = arith.constant 0 : i32
    %c0_i32_0 = arith.constant 0 : i32
    return %arg0, %c0_i32 : i32, i32
  }
  func.func @transform_1(%arg0: i32) -> (i32, i32) {
    %c0_i32 = arith.constant 0 : i32
    %c0_i32_0 = arith.constant 0 : i32
    %c0_i32_1 = arith.constant 0 : i32
    return %c0_i32, %c0_i32_0 : i32, i32
  }
  func.func @transform_2(%arg0: i32) -> (i32, i32) {
    %c0_i32 = arith.constant 0 : i32
    %c0_i32_0 = arith.constant 0 : i32
    %c0_i32_1 = arith.constant 0 : i32
    return %c0_i32, %c0_i32_0 : i32, i32
  }
  func.func @transform_3(%arg0: i32) -> (i32, i32) {
    %c0_i32 = arith.constant 0 : i32
    %c0_i32_0 = arith.constant 0 : i32
    return %arg0, %c0_i32 : i32, i32
  }
}

module attributes {stable_mosaic.version = 11 : i64} {
  func.func @_maxpool_kernel(%arg0: i32, %arg1: memref<12x1536xbf16, #tpu.memory_space<vmem>>, %arg2: memref<12x384xbf16, #tpu.memory_space<vmem>>) attributes {dimension_semantics = [#tpu.dimension_semantics<parallel>], iteration_bounds = array<i64: 1>, scalar_prefetch = 0 : i64, scratch_operands = 0 : i64, tpu.core_type = #tpu.core_type<tc>, window_params = [{transform_indices = @transform_0, window_bounds = array<i64: 12, 1536>}, {transform_indices = @transform_1, window_bounds = array<i64: 12, 384>}]} {
    %c0 = arith.constant 0 : index
    %c0_0 = arith.constant 0 : index
    %0 = vector.load %arg1[%c0, %c0_0] : memref<12x1536xbf16, #tpu.memory_space<vmem>>, vector<12x768xbf16>
    %c0_1 = arith.constant 0 : index
    %c768 = arith.constant 768 : index
    %1 = vector.load %arg1[%c0_1, %c768] : memref<12x1536xbf16, #tpu.memory_space<vmem>>, vector<12x768xbf16>
    %2 = arith.maximumf %0, %1 : vector<12x768xbf16>
    %3 = vector.extract_strided_slice %2 {offsets = [0, 0], sizes = [12, 64], strides = [1, 1]} : vector<12x768xbf16> to vector<12x64xbf16>
    %4 = vector.extract_strided_slice %2 {offsets = [0, 64], sizes = [12, 64], strides = [1, 1]} : vector<12x768xbf16> to vector<12x64xbf16>
    %5 = arith.maximumf %3, %4 : vector<12x64xbf16>
    %c0_2 = arith.constant 0 : index
    %c0_3 = arith.constant 0 : index
    %6 = vector.load %arg2[%c0_2, %c0_3] : memref<12x384xbf16, #tpu.memory_space<vmem>>, vector<12x64xbf16>
    tpu.vector_store %arg2[%c0_2, %c0_3], %5 {strides = array<i32>} : memref<12x384xbf16, #tpu.memory_space<vmem>>, vector<12x64xbf16>,
    %7 = vector.extract_strided_slice %2 {offsets = [0, 128], sizes = [12, 64], strides = [1, 1]} : vector<12x768xbf16> to vector<12x64xbf16>
    %8 = vector.extract_strided_slice %2 {offsets = [0, 192], sizes = [12, 64], strides = [1, 1]} : vector<12x768xbf16> to vector<12x64xbf16>
    %9 = arith.maximumf %7, %8 : vector<12x64xbf16>
    %c0_4 = arith.constant 0 : index
    %c64 = arith.constant 64 : index
    %10 = vector.load %arg2[%c0_4, %c64] : memref<12x384xbf16, #tpu.memory_space<vmem>>, vector<12x64xbf16>
    tpu.vector_store %arg2[%c0_4, %c64], %9 {strides = array<i32>} : memref<12x384xbf16, #tpu.memory_space<vmem>>, vector<12x64xbf16>,
    %11 = vector.extract_strided_slice %2 {offsets = [0, 256], sizes = [12, 64], strides = [1, 1]} : vector<12x768xbf16> to vector<12x64xbf16>
    %12 = vector.extract_strided_slice %2 {offsets = [0, 320], sizes = [12, 64], strides = [1, 1]} : vector<12x768xbf16> to vector<12x64xbf16>
    %13 = arith.maximumf %11, %12 : vector<12x64xbf16>
    %c0_5 = arith.constant 0 : index
    %c128 = arith.constant 128 : index
    %14 = vector.load %arg2[%c0_5, %c128] : memref<12x384xbf16, #tpu.memory_space<vmem>>, vector<12x64xbf16>
    tpu.vector_store %arg2[%c0_5, %c128], %13 {strides = array<i32>} : memref<12x384xbf16, #tpu.memory_space<vmem>>, vector<12x64xbf16>,
    %15 = vector.extract_strided_slice %2 {offsets = [0, 384], sizes = [12, 64], strides = [1, 1]} : vector<12x768xbf16> to vector<12x64xbf16>
    %16 = vector.extract_strided_slice %2 {offsets = [0, 448], sizes = [12, 64], strides = [1, 1]} : vector<12x768xbf16> to vector<12x64xbf16>
    %17 = arith.maximumf %15, %16 : vector<12x64xbf16>
    %c0_6 = arith.constant 0 : index
    %c192 = arith.constant 192 : index
    %18 = vector.load %arg2[%c0_6, %c192] : memref<12x384xbf16, #tpu.memory_space<vmem>>, vector<12x64xbf16>
    tpu.vector_store %arg2[%c0_6, %c192], %17 {strides = array<i32>} : memref<12x384xbf16, #tpu.memory_space<vmem>>, vector<12x64xbf16>,
    %19 = vector.extract_strided_slice %2 {offsets = [0, 512], sizes = [12, 64], strides = [1, 1]} : vector<12x768xbf16> to vector<12x64xbf16>
    %20 = vector.extract_strided_slice %2 {offsets = [0, 576], sizes = [12, 64], strides = [1, 1]} : vector<12x768xbf16> to vector<12x64xbf16>
    %21 = arith.maximumf %19, %20 : vector<12x64xbf16>
    %c0_7 = arith.constant 0 : index
    %c256 = arith.constant 256 : index
    %22 = vector.load %arg2[%c0_7, %c256] : memref<12x384xbf16, #tpu.memory_space<vmem>>, vector<12x64xbf16>
    tpu.vector_store %arg2[%c0_7, %c256], %21 {strides = array<i32>} : memref<12x384xbf16, #tpu.memory_space<vmem>>, vector<12x64xbf16>,
    %23 = vector.extract_strided_slice %2 {offsets = [0, 640], sizes = [12, 64], strides = [1, 1]} : vector<12x768xbf16> to vector<12x64xbf16>
    %24 = vector.extract_strided_slice %2 {offsets = [0, 704], sizes = [12, 64], strides = [1, 1]} : vector<12x768xbf16> to vector<12x64xbf16>
    %25 = arith.maximumf %23, %24 : vector<12x64xbf16>
    %c0_8 = arith.constant 0 : index
    %c320 = arith.constant 320 : index
    %26 = vector.load %arg2[%c0_8, %c320] : memref<12x384xbf16, #tpu.memory_space<vmem>>, vector<12x64xbf16>
    tpu.vector_store %arg2[%c0_8, %c320], %25 {strides = array<i32>} : memref<12x384xbf16, #tpu.memory_space<vmem>>, vector<12x64xbf16>,
    return
  }
  func.func @transform_0(%arg0: i32) -> (i32, i32) {
    %c0_i32 = arith.constant 0 : i32
    %c0_i32_0 = arith.constant 0 : i32
    return %arg0, %c0_i32 : i32, i32
  }
  func.func @transform_1(%arg0: i32) -> (i32, i32) {
    %c0_i32 = arith.constant 0 : i32
    %c0_i32_0 = arith.constant 0 : i32
    return %arg0, %c0_i32 : i32, i32
  }
}

module attributes {stable_mosaic.version = 11 : i64} {
  func.func @_mlp_head_kernel(%arg0: i32, %arg1: memref<8x2304xbf16, #tpu.memory_space<vmem>>, %arg2: memref<2304x512xbf16, #tpu.memory_space<vmem>>, %arg3: memref<1x512xf32, #tpu.memory_space<vmem>>, %arg4: memref<512x256xbf16, #tpu.memory_space<vmem>>, %arg5: memref<1x256xf32, #tpu.memory_space<vmem>>, %arg6: memref<256x10xbf16, #tpu.memory_space<vmem>>, %arg7: memref<1x10xf32, #tpu.memory_space<vmem>>, %arg8: memref<8x10xf32, #tpu.memory_space<vmem>>) attributes {dimension_semantics = [#tpu.dimension_semantics<parallel>], iteration_bounds = array<i64: 1>, scalar_prefetch = 0 : i64, scratch_operands = 0 : i64, tpu.core_type = #tpu.core_type<tc>, window_params = [{transform_indices = @transform_0, window_bounds = array<i64: 8, 2304>}, {pipeline_mode = #tpu.pipeline_mode<synchronous>, transform_indices = @transform_1, window_bounds = array<i64: 2304, 512>}, {pipeline_mode = #tpu.pipeline_mode<synchronous>, transform_indices = @transform_2, window_bounds = array<i64: 1, 512>}, {pipeline_mode = #tpu.pipeline_mode<synchronous>, transform_indices = @transform_3, window_bounds = array<i64: 512, 256>}, {pipeline_mode = #tpu.pipeline_mode<synchronous>, transform_indices = @transform_4, window_bounds = array<i64: 1, 256>}, {pipeline_mode = #tpu.pipeline_mode<synchronous>, transform_indices = @transform_5, window_bounds = array<i64: 256, 10>}, {pipeline_mode = #tpu.pipeline_mode<synchronous>, transform_indices = @transform_6, window_bounds = array<i64: 1, 10>}, {transform_indices = @transform_7, window_bounds = array<i64: 8, 10>}]} {
    %c0 = arith.constant 0 : index
    %c0_0 = arith.constant 0 : index
    %0 = vector.load %arg1[%c0, %c0_0] : memref<8x2304xbf16, #tpu.memory_space<vmem>>, vector<8x2304xbf16>
    %c0_1 = arith.constant 0 : index
    %c0_2 = arith.constant 0 : index
    %1 = vector.load %arg2[%c0_1, %c0_2] : memref<2304x512xbf16, #tpu.memory_space<vmem>>, vector<2304x512xbf16>
    %cst = arith.constant dense<0.000000e+00> : vector<8x512xf32>
    %2 = tpu.matmul %0, %1, %cst {dimension_numbers = #tpu.dot_dimension_numbers<[1], [0], [0], [1], [0, 0, 1, 1], [], []>} : vector<8x2304xbf16>, vector<2304x512xbf16>, vector<8x512xf32> -> vector<8x512xf32>
    %c0_3 = arith.constant 0 : index
    %c0_4 = arith.constant 0 : index
    %3 = vector.load %arg3[%c0_3, %c0_4] : memref<1x512xf32, #tpu.memory_space<vmem>>, vector<1x512xf32>
    %4 = vector.broadcast %3 : vector<1x512xf32> to vector<8x512xf32>
    %5 = arith.addf %2, %4 : vector<8x512xf32>
    %cst_5 = arith.constant 0.000000e+00 : f32
    %6 = vector.broadcast %cst_5 : f32 to vector<8x512xf32>
    %7 = arith.maximumf %5, %6 : vector<8x512xf32>
    %8 = arith.truncf %7 : vector<8x512xf32> to vector<8x512xbf16>
    %c0_6 = arith.constant 0 : index
    %c0_7 = arith.constant 0 : index
    %9 = vector.load %arg4[%c0_6, %c0_7] : memref<512x256xbf16, #tpu.memory_space<vmem>>, vector<512x256xbf16>
    %cst_8 = arith.constant dense<0.000000e+00> : vector<8x256xf32>
    %10 = tpu.matmul %8, %9, %cst_8 {dimension_numbers = #tpu.dot_dimension_numbers<[1], [0], [0], [1], [0, 0, 1, 1], [], []>} : vector<8x512xbf16>, vector<512x256xbf16>, vector<8x256xf32> -> vector<8x256xf32>
    %c0_9 = arith.constant 0 : index
    %c0_10 = arith.constant 0 : index
    %11 = vector.load %arg5[%c0_9, %c0_10] : memref<1x256xf32, #tpu.memory_space<vmem>>, vector<1x256xf32>
    %12 = vector.broadcast %11 : vector<1x256xf32> to vector<8x256xf32>
    %13 = arith.addf %10, %12 : vector<8x256xf32>
    %cst_11 = arith.constant 0.000000e+00 : f32
    %14 = vector.broadcast %cst_11 : f32 to vector<8x256xf32>
    %15 = arith.maximumf %13, %14 : vector<8x256xf32>
    %16 = arith.truncf %15 : vector<8x256xf32> to vector<8x256xbf16>
    %c0_12 = arith.constant 0 : index
    %c0_13 = arith.constant 0 : index
    %17 = vector.load %arg6[%c0_12, %c0_13] : memref<256x10xbf16, #tpu.memory_space<vmem>>, vector<256x10xbf16>
    %cst_14 = arith.constant dense<0.000000e+00> : vector<8x10xf32>
    %18 = tpu.matmul %16, %17, %cst_14 {dimension_numbers = #tpu.dot_dimension_numbers<[1], [0], [0], [1], [0, 0, 1, 1], [], []>} : vector<8x256xbf16>, vector<256x10xbf16>, vector<8x10xf32> -> vector<8x10xf32>
    %c0_15 = arith.constant 0 : index
    %c0_16 = arith.constant 0 : index
    %19 = vector.load %arg7[%c0_15, %c0_16] : memref<1x10xf32, #tpu.memory_space<vmem>>, vector<1x10xf32>
    %20 = vector.broadcast %19 : vector<1x10xf32> to vector<8x10xf32>
    %21 = arith.addf %18, %20 : vector<8x10xf32>
    %22 = math.absf %21 : vector<8x10xf32>
    %cst_17 = arith.constant 0.000000e+00 : f32
    %23 = vector.broadcast %cst_17 : f32 to vector<8x10xf32>
    %24 = arith.subf %23, %22 : vector<8x10xf32>
    %25 = math.exp %24 : vector<8x10xf32>
    %cst_18 = arith.constant 0.000000e+00 : f32
    %26 = vector.broadcast %cst_18 : f32 to vector<8x10xf32>
    %27 = arith.cmpf oge, %21, %26 : vector<8x10xf32>
    %cst_19 = arith.constant 1.000000e+00 : f32
    %28 = vector.broadcast %cst_19 : f32 to vector<8x10xf32>
    %29 = arith.addf %28, %25 : vector<8x10xf32>
    %cst_20 = arith.constant 1.000000e+00 : f32
    %30 = vector.broadcast %cst_20 : f32 to vector<8x10xf32>
    %31 = arith.divf %30, %29 : vector<8x10xf32>
    %cst_21 = arith.constant 1.000000e+00 : f32
    %32 = vector.broadcast %cst_21 : f32 to vector<8x10xf32>
    %33 = arith.addf %32, %25 : vector<8x10xf32>
    %34 = arith.divf %25, %33 : vector<8x10xf32>
    %35 = arith.select %27, %31, %34 : vector<8x10xi1>, vector<8x10xf32>
    %c0_22 = arith.constant 0 : index
    %c0_23 = arith.constant 0 : index
    %36 = vector.load %arg8[%c0_22, %c0_23] : memref<8x10xf32, #tpu.memory_space<vmem>>, vector<8x10xf32>
    tpu.vector_store %arg8[%c0_22, %c0_23], %35 {strides = array<i32>} : memref<8x10xf32, #tpu.memory_space<vmem>>, vector<8x10xf32>,
    return
  }
  func.func @transform_0(%arg0: i32) -> (i32, i32) {
    %c0_i32 = arith.constant 0 : i32
    %c0_i32_0 = arith.constant 0 : i32
    return %arg0, %c0_i32 : i32, i32
  }
  func.func @transform_1(%arg0: i32) -> (i32, i32) {
    %c0_i32 = arith.constant 0 : i32
    %c0_i32_0 = arith.constant 0 : i32
    %c0_i32_1 = arith.constant 0 : i32
    return %c0_i32, %c0_i32_0 : i32, i32
  }
  func.func @transform_2(%arg0: i32) -> (i32, i32) {
    %c0_i32 = arith.constant 0 : i32
    %c0_i32_0 = arith.constant 0 : i32
    %c0_i32_1 = arith.constant 0 : i32
    return %c0_i32, %c0_i32_0 : i32, i32
  }
  func.func @transform_3(%arg0: i32) -> (i32, i32) {
    %c0_i32 = arith.constant 0 : i32
    %c0_i32_0 = arith.constant 0 : i32
    %c0_i32_1 = arith.constant 0 : i32
    return %c0_i32, %c0_i32_0 : i32, i32
  }
  func.func @transform_4(%arg0: i32) -> (i32, i32) {
    %c0_i32 = arith.constant 0 : i32
    %c0_i32_0 = arith.constant 0 : i32
    %c0_i32_1 = arith.constant 0 : i32
    return %c0_i32, %c0_i32_0 : i32, i32
  }
  func.func @transform_5(%arg0: i32) -> (i32, i32) {
    %c0_i32 = arith.constant 0 : i32
    %c0_i32_0 = arith.constant 0 : i32
    %c0_i32_1 = arith.constant 0 : i32
    return %c0_i32, %c0_i32_0 : i32, i32
  }
  func.func @transform_6(%arg0: i32) -> (i32, i32) {
    %c0_i32 = arith.constant 0 : i32
    %c0_i32_0 = arith.constant 0 : i32
    %c0_i32_1 = arith.constant 0 : i32
    return %c0_i32, %c0_i32_0 : i32, i32
  }
  func.func @transform_7(%arg0: i32) -> (i32, i32) {
    %c0_i32 = arith.constant 0 : i32
    %c0_i32_0 = arith.constant 0 : i32
    return %arg0, %c0_i32 : i32, i32
  }
}

</mosaic_0001>

<bundles_post_ra>
// kernel: tpu_custom_call.1
= control target key start
LH: loop header
LB: loop body
LE: loop exit
PB: predicated region body
PF: predicated region fallthrough
CT: control target
= control target key end

     0   :  { %6 = vsyncpa [#allocation3], 0  ;;  %s102_s0 = inlined_call_operand.hbm [shape: f32[8,128], index: 0, kind: input, shape index: {}]   ;;  %s103_s1 = inlined_call_operand.hbm [shape: f32[8,128], index: 1, kind: output, shape index: {}]  }
   0x1   :  { %7 = vsyncpa [#allocation4], 0  ;;  %s84_s6 = smov [#allocation2]  }
   0x2   :  { %s14_s7 = sshll.u32 %s84_s6, 4  ;;  %s15_s7 = int_to_ptr.vmem [resolvable:$true] %s14_s7 }
   0x3   :  { %s48_s8 = scalar_lea.vmem %s15_s7, 128  ;;  %p53_p1 = scmp.lt.s32.totalorder %s15_s7, %s15_s7 }
   0x4   :  { %p49_p0 = scmp.ne.s32.totalorder %s15_s7, %s48_s8  ;;  %p54_p2 = scmp.lt.s32.totalorder %s48_s8, %s48_s8 }
   0x6   :  { %p55_p3 = por %p54_p2, %p53_p1 }
   0x8   :  { %p56_p4 = pnand %p55_p3, %p49_p0 }
   0xa   :  { %59 = shalt.err (!%p56_p4)
}
   0xb   :  { %17 = dma.hbm_to_vmem [thread:$0]  %s102_s0, 128, %s15_s7, [#allocation3]  }
   0xc   :  { %80 = dma.done.wait [#allocation3], 128  }
   0xd   :  { %81 = vsyncadd [#allocation3], 4294967168  ;;  %s85_s11 = smov [#allocation5]   ;;  %v21_v0 = vld [vmem:[#allocation2] sm:$0xff] }
   0xe   :  { %s29_s12 = sshll.u32 %s85_s11, 4  ;;  %22 = vst [vmem:[#allocation5] sm:$0xff] %v21_v0  ;;  %s30_s12 = int_to_ptr.vmem [resolvable:$true] %s29_s12 }
   0xf   :  { %s60_s13 = scalar_lea.vmem %s30_s12, 128  ;;  %p65_p6 = scmp.lt.s32.totalorder %s30_s12, %s30_s12 }
  0x10   :  { %p61_p5 = scmp.ne.s32.totalorder %s30_s12, %s60_s13  ;;  %p66_p7 = scmp.lt.s32.totalorder %s60_s13, %s60_s13 }
  0x12   :  { %p67_p8 = por %p66_p7, %p65_p6 }
  0x14   :  { %p68_p9 = pnand %p67_p8, %p61_p5 }
  0x16   :  { %71 = shalt.err (!%p68_p9)
}
  0x17   :  { %32 = dma.vmem_to_hbm [thread:$0]  %s30_s12, 128, %s103_s1, [#allocation4]  }
  0x18   :  { %82 = dma.done.wait [#allocation4], 128  }
  0x19   :  { %83 = vsyncadd [#allocation4], 4294967168 }
  0x1a   :  { %36 = vsyncpa [#allocation3], 1 }
  0x1b   :  { %37 = vsyncpa [#allocation4], 1 }

// kernel: network_image_cnn_forward.7
= control target key start
LH: loop header
LB: loop body
LE: loop exit
PB: predicated region body
PF: predicated region fallthrough
CT: control target
= control target key end

     0   :  { %s999_s12 = smov 0   ;;  %s1166_s0 = inlined_call_operand.vmem [shape: bf16[4608,27], index: 0, kind: input, shape index: {}]   ;;  %s1167_s1 = inlined_call_operand.vmem [shape: bf16[27,16], index: 1, kind: input, shape index: {}]   ;;  %s1168_s2 = inlined_call_operand.vmem [shape: f32[1,16], index: 2, kind: input, shape index: {}]   ;;  %s1169_s3 = inlined_call_operand.vmem [shape: bf16[4608,16], index: 3, kind: output, shape index: {}]  }
   0x1 LB: > { %s775_s13 = sadd.s32 4294967295, %s976_s12   ;;  %p779_p0 = scmp.ge.s32.totalorder %s976_s12, 1  ;;  %s976_s12 = sphi %s999_s12, %s13_s12  }
   0x2   : > { %p138_p1 = scmp.lt.s32.totalorder %s976_s12, 19 }
   0x4   : > { %p139_p2 = pnand %p779_p0, %p138_p1 }
   0x5   : > { %s780_s16 = sshll.u32 (!%p139_p2), %s775_s13, 5 }
   0x6   : > { %142 = sbr.rel (%p139_p2) target bundleno = 255 (0xff), region = 32  ;;  %p163_p3 = scmp.lt.s32.totalorder (!%p139_p2), %s780_s16, 575 }
   0xb   : > { %v952_v0 = vld [vmem:[%s1167_s1 + $0x8] sm:$0x3f]   ;;  %vm358_vm0 = vcmask 1044480   ;;  %vm359_vm1 = vcmask 1045504   ;;  %v978_v1 = vmov 65535   ;;  %v953_v5 = vld [vmem:[%s1167_s1] sm:$0xff]  }
   0xc   : > { %v360_v2 = vsel %vm358_vm0, 4294967295, %v978_v1  ;;  %s1171_s16 = smov (!%p163_p3, %s780_s16), 575  ;;  %vm309_vm2 = vcmask 220160   ;;  %v1058_v22 = vld [vmem:[%s1168_s2] ss:$0 sm:$0xff]  ;;  %vm686_vm3 = vcmask 125952  }
   0xd   : > { %v361_v3 = vsel %vm359_vm1, %v360_v2, 0  ;;  %s781_s19 = sshll.u32 %s1171_s16, 2 }
   0xe   : > { %v363_v4 = vand.u32 %v952_v0, %v361_v3  ;;  %s1021_s22 = scalar_lea.vmem %s1166_s0, %s781_s19  ;;  %s1069_s27 = scalar_lea.vmem %s1169_s3, %s781_s19 }
   0xf   : > { %v954_v6 = vld [vmem:[%s1021_s22] sm:$0xff]   ;;  %v956_v8 = vld [vmem:[%s1021_s22 + $0x8] sm:$0xff]   ;;  %v958_v10 = vld [vmem:[%s1021_s22 + $0x10] sm:$0xff]  }
  0x10   : > { %903 = vmatprep.subr.bf16.mxu0 %v363_v4  ;;  %939 = vmatprep.subr.bf16.mxu1 %v363_v4  ;;  %v955_v7 = vld [vmem:[%s1021_s22 + $0x40] sm:$0xff]   ;;  %v957_v9 = vld [vmem:[%s1021_s22 + $0x48] sm:$0xff]   ;;  %v959_v11 = vld [vmem:[%s1021_s22 + $0x50] sm:$0xff]  }
  0x11   : > { %904 = vmatpush3.bf16.msra.mxu0 %v363_v4  ;;  %941 = vmatpush3.bf16.msra.mxu1 %v363_v4  ;;  %v960_v12 = vld [vmem:[%s1021_s22 + $0x18] sm:$0xff]   ;;  %v962_v14 = vld [vmem:[%s1021_s22 + $0x20] sm:$0xff]   ;;  %v964_v16 = vld [vmem:[%s1021_s22 + $0x28] sm:$0xff]  }
  0x12   : > { %905 = vmatprep.subr.bf16.mxu0 %v953_v5  ;;  %940 = vmatprep.subr.bf16.mxu1 %v953_v5  ;;  %v961_v13 = vld [vmem:[%s1021_s22 + $0x58] sm:$0xff]   ;;  %v963_v15 = vld [vmem:[%s1021_s22 + $0x60] sm:$0xff]   ;;  %v965_v17 = vld [vmem:[%s1021_s22 + $0x68] sm:$0xff]  }
  0x13   : > { %907 = vmatprep.mubr.msk.bf16.mxu0 %vm309_vm2, %v954_v6  ;;  %923 = vmatprep.mubr.msk.bf16.mxu1 %vm309_vm2, %v955_v7  ;;  %v966_v18 = vld [vmem:[%s1021_s22 + $0x30] sm:$0xff]   ;;  %v968_v20 = vld [vmem:[%s1021_s22 + $0x38] sm:$0xff]  }
  0x14   : > { %v967_v19 = vld [vmem:[%s1021_s22 + $0x70] sm:$0xff]   ;;  %v969_v21 = vld [vmem:[%s1021_s22 + $0x78] sm:$0xff]  }
  0x15   : > { %906 = vmatpush3.bf16.msra.mxu0 %v953_v5  ;;  %942 = vmatpush3.bf16.msra.mxu1 %v953_v5 }
  0x18   : > { %908 = vmatmul.mubr.msk.bf16.vlgmr.msra.gmra.mxu0 %vm309_vm2, %v956_v8  ;;  %924 = vmatmul.mubr.msk.bf16.vlgmr.msra.gmra.mxu1 %vm309_vm2, %v957_v9 }
  0x19   : > { %911 = vmatprep.mubr.msk.bf16.mxu0 %vm309_vm2, %v958_v10  ;;  %927 = vmatprep.mubr.msk.bf16.mxu1 %vm309_vm2, %v959_v11 }
  0x20   : > { %912 = vmatmul.mubr.msk.bf16.gmra.mxu0 %vm309_vm2, %v960_v12  ;;  %928 = vmatmul.mubr.msk.bf16.gmra.mxu1 %vm309_vm2, %v961_v13 }
  0x21   : > { %915 = vmatprep.mubr.msk.bf16.mxu0 %vm309_vm2, %v962_v14  ;;  %931 = vmatprep.mubr.msk.bf16.mxu1 %vm309_vm2, %v963_v15 }
  0x28   : > { %916 = vmatmul.mubr.msk.bf16.gmra.mxu0 %vm309_vm2, %v964_v16  ;;  %932 = vmatmul.mubr.msk.bf16.gmra.mxu1 %vm309_vm2, %v965_v17 }
  0x29   : > { %919 = vmatprep.mubr.msk.bf16.mxu0 %vm309_vm2, %v966_v18  ;;  %935 = vmatprep.mubr.msk.bf16.mxu1 %vm309_vm2, %v967_v19 }
  0x30   : > { %920 = vmatmul.mubr.msk.bf16.gmra.mxu0 %vm309_vm2, %v968_v20  ;;  %936 = vmatmul.mubr.msk.bf16.gmra.mxu1 %vm309_vm2, %v969_v21 }
  0xd8   : > { %v909_v23 = vpop.f32.mrf.mxu0  ;;  %v925_v24 = vpop.f32.mrf.mxu1 }
  0xd9   : > { %v408_v25 = vadd.f32 %v909_v23, %v1058_v22  ;;  %v472_v26 = vadd.f32 %v925_v24, %v1058_v22 }
  0xda   : > { %v399_v27 = vpop.f32.mrf.mxu0  ;;  %v463_v28 = vpop.f32.mrf.mxu1 }
  0xdb   : > { %v528_v29 = vmax.f32 %v408_v25, 0.0  ;;  %v544_v30 = vmax.f32 %v472_v26, 0.0  ;;  %v400_v31 = vadd.f32 %v1058_v22, %v399_v27  ;;  %v464_v32 = vadd.f32 %v1058_v22, %v463_v28 }
  0xdc   : > { %v910_v33 = vpop.f32.mrf.mxu0  ;;  %v926_v34 = vpop.f32.mrf.mxu1 }
  0xdd   : > { %v855_v35 = vpack.c.bf16 %v528_v29, %v528_v29  ;;  %v871_v36 = vpack.c.bf16 %v544_v30, %v544_v30  ;;  %v526_v37 = vmax.f32 %v400_v31, 0.0  ;;  %v542_v38 = vmax.f32 %v464_v32, 0.0 }
  0xde   : > { %v411_v39 = vadd.f32 %v910_v33, %v1058_v22  ;;  %v475_v40 = vadd.f32 %v926_v34, %v1058_v22  ;;  %v402_v41 = vpop.f32.mrf.mxu0  ;;  %v466_v42 = vpop.f32.mrf.mxu1 }
  0xdf   : > { %689 = vst.msk [vmem:[%s1069_s27 + $0x8] sm:$0xf] %vm686_vm3, %v855_v35  ;;  %705 = vst.msk [vmem:[%s1069_s27 + $0x48] sm:$0xf] %vm686_vm3, %v871_v36  ;;  %v853_v43 = vpack.c.bf16 %v526_v37, %v526_v37  ;;  %v869_v44 = vpack.c.bf16 %v542_v38, %v542_v38  ;;  %v403_v45 = vadd.f32 %v1058_v22, %v402_v41 }
  0xe0   : > { %v467_v46 = vadd.f32 %v1058_v22, %v466_v42  ;;  %v529_v47 = vmax.f32 %v411_v39, 0.0  ;;  %v545_v48 = vmax.f32 %v475_v40, 0.0  ;;  %v913_v49 = vpop.f32.mrf.mxu0  ;;  %v929_v50 = vpop.f32.mrf.mxu1 }
  0xe1   : > { %687 = vst.msk [vmem:[%s1069_s27] sm:$0xf] %vm686_vm3, %v853_v43  ;;  %703 = vst.msk [vmem:[%s1069_s27 + $0x40] sm:$0xf] %vm686_vm3, %v869_v44  ;;  %v527_v51 = vmax.f32 %v403_v45, 0.0  ;;  %v424_v53 = vadd.f32 %v913_v49, %v1058_v22  ;;  %v488_v54 = vadd.f32 %v929_v50, %v1058_v22 }
  0xe2   : > { %v543_v52 = vmax.f32 %v467_v46, 0.0  ;;  %v856_v55 = vpack.c.bf16 %v529_v47, %v529_v47  ;;  %v872_v56 = vpack.c.bf16 %v545_v48, %v545_v48  ;;  %v415_v57 = vpop.f32.mrf.mxu0  ;;  %v479_v58 = vpop.f32.mrf.mxu1 }
  0xe3   : > { %v854_v59 = vpack.c.bf16 %v527_v51, %v527_v51  ;;  %v532_v61 = vmax.f32 %v424_v53, 0.0  ;;  %v548_v62 = vmax.f32 %v488_v54, 0.0  ;;  %v416_v63 = vadd.f32 %v1058_v22, %v415_v57 }
  0xe4   : > { %v870_v60 = vpack.c.bf16 %v543_v52, %v543_v52  ;;  %690 = vst.msk [vmem:[%s1069_s27 + $0xc] sm:$0xf] %vm686_vm3, %v856_v55  ;;  %706 = vst.msk [vmem:[%s1069_s27 + $0x4c] sm:$0xf] %vm686_vm3, %v872_v56  ;;  %v480_v0 = vadd.f32 %v1058_v22, %v479_v58  ;;  %v914_v1 = vpop.f32.mrf.mxu0  ;;  %v930_v2 = vpop.f32.mrf.mxu1 }
  0xe5   : > { %688 = vst.msk [vmem:[%s1069_s27 + $0x4] sm:$0xf] %vm686_vm3, %v854_v59  ;;  %v859_v3 = vpack.c.bf16 %v532_v61, %v532_v61  ;;  %v875_v4 = vpack.c.bf16 %v548_v62, %v548_v62  ;;  %v427_v5 = vadd.f32 %v914_v1, %v1058_v22  ;;  %v491_v6 = vadd.f32 %v930_v2, %v1058_v22 }
  0xe6   : > { %704 = vst.msk [vmem:[%s1069_s27 + $0x44] sm:$0xf] %vm686_vm3, %v870_v60  ;;  %v530_v7 = vmax.f32 %v416_v63, 0.0  ;;  %v546_v8 = vmax.f32 %v480_v0, 0.0  ;;  %v418_v9 = vpop.f32.mrf.mxu0  ;;  %v482_v10 = vpop.f32.mrf.mxu1 }
  0xe7   : > { %693 = vst.msk [vmem:[%s1069_s27 + $0x18] sm:$0xf] %vm686_vm3, %v859_v3  ;;  %709 = vst.msk [vmem:[%s1069_s27 + $0x58] sm:$0xf] %vm686_vm3, %v875_v4  ;;  %v533_v11 = vmax.f32 %v427_v5, 0.0  ;;  %v549_v12 = vmax.f32 %v491_v6, 0.0  ;;  %v419_v13 = vadd.f32 %v1058_v22, %v418_v9  ;;  %v483_v14 = vadd.f32 %v1058_v22, %v482_v10 }
  0xe8   : > { %v857_v15 = vpack.c.bf16 %v530_v7, %v530_v7  ;;  %v873_v16 = vpack.c.bf16 %v546_v8, %v546_v8  ;;  %v917_v17 = vpop.f32.mrf.mxu0  ;;  %v933_v18 = vpop.f32.mrf.mxu1 }
  0xe9   : > { %v860_v19 = vpack.c.bf16 %v533_v11, %v533_v11  ;;  %v876_v20 = vpack.c.bf16 %v549_v12, %v549_v12  ;;  %v531_v21 = vmax.f32 %v419_v13, 0.0  ;;  %v547_v23 = vmax.f32 %v483_v14, 0.0 }
  0xea   : > { %691 = vst.msk [vmem:[%s1069_s27 + $0x10] sm:$0xf] %vm686_vm3, %v857_v15  ;;  %707 = vst.msk [vmem:[%s1069_s27 + $0x50] sm:$0xf] %vm686_vm3, %v873_v16  ;;  %v440_v24 = vadd.f32 %v917_v17, %v1058_v22  ;;  %v504_v25 = vadd.f32 %v933_v18, %v1058_v22  ;;  %v431_v26 = vpop.f32.mrf.mxu0  ;;  %v495_v27 = vpop.f32.mrf.mxu1 }
  0xeb   : > { %694 = vst.msk [vmem:[%s1069_s27 + $0x1c] sm:$0xf] %vm686_vm3, %v860_v19  ;;  %710 = vst.msk [vmem:[%s1069_s27 + $0x5c] sm:$0xf] %vm686_vm3, %v876_v20  ;;  %v858_v28 = vpack.c.bf16 %v531_v21, %v531_v21  ;;  %v874_v29 = vpack.c.bf16 %v547_v23, %v547_v23  ;;  %v432_v30 = vadd.f32 %v1058_v22, %v431_v26 }
  0xec   : > { %v496_v31 = vadd.f32 %v1058_v22, %v495_v27  ;;  %v536_v32 = vmax.f32 %v440_v24, 0.0  ;;  %v552_v33 = vmax.f32 %v504_v25, 0.0  ;;  %v918_v34 = vpop.f32.mrf.mxu0  ;;  %v934_v35 = vpop.f32.mrf.mxu1 }
  0xed   : > { %692 = vst.msk [vmem:[%s1069_s27 + $0x14] sm:$0xf] %vm686_vm3, %v858_v28  ;;  %708 = vst.msk [vmem:[%s1069_s27 + $0x54] sm:$0xf] %vm686_vm3, %v874_v29  ;;  %v534_v36 = vmax.f32 %v432_v30, 0.0  ;;  %v443_v38 = vadd.f32 %v918_v34, %v1058_v22  ;;  %v507_v39 = vadd.f32 %v934_v35, %v1058_v22 }
  0xee   : > { %v550_v37 = vmax.f32 %v496_v31, 0.0  ;;  %v863_v40 = vpack.c.bf16 %v536_v32, %v536_v32  ;;  %v879_v41 = vpack.c.bf16 %v552_v33, %v552_v33  ;;  %v434_v42 = vpop.f32.mrf.mxu0  ;;  %v498_v43 = vpop.f32.mrf.mxu1 }
  0xef   : > { %v861_v44 = vpack.c.bf16 %v534_v36, %v534_v36  ;;  %v537_v46 = vmax.f32 %v443_v38, 0.0  ;;  %v553_v47 = vmax.f32 %v507_v39, 0.0  ;;  %v435_v48 = vadd.f32 %v1058_v22, %v434_v42 }
  0xf0   : > { %v877_v45 = vpack.c.bf16 %v550_v37, %v550_v37  ;;  %697 = vst.msk [vmem:[%s1069_s27 + $0x28] sm:$0xf] %vm686_vm3, %v863_v40  ;;  %713 = vst.msk [vmem:[%s1069_s27 + $0x68] sm:$0xf] %vm686_vm3, %v879_v41  ;;  %v499_v49 = vadd.f32 %v1058_v22, %v498_v43  ;;  %v921_v50 = vpop.f32.mrf.mxu0  ;;  %v937_v51 = vpop.f32.mrf.mxu1 }
  0xf1   : > { %695 = vst.msk [vmem:[%s1069_s27 + $0x20] sm:$0xf] %vm686_vm3, %v861_v44  ;;  %v864_v52 = vpack.c.bf16 %v537_v46, %v537_v46  ;;  %v880_v53 = vpack.c.bf16 %v553_v47, %v553_v47  ;;  %v456_v54 = vadd.f32 %v921_v50, %v1058_v22  ;;  %v520_v55 = vadd.f32 %v937_v51, %v1058_v22 }
  0xf2   : > { %711 = vst.msk [vmem:[%s1069_s27 + $0x60] sm:$0xf] %vm686_vm3, %v877_v45  ;;  %v535_v56 = vmax.f32 %v435_v48, 0.0  ;;  %v551_v57 = vmax.f32 %v499_v49, 0.0  ;;  %v447_v58 = vpop.f32.mrf.mxu0  ;;  %v511_v59 = vpop.f32.mrf.mxu1 }
  0xf3   : > { %698 = vst.msk [vmem:[%s1069_s27 + $0x2c] sm:$0xf] %vm686_vm3, %v864_v52  ;;  %714 = vst.msk [vmem:[%s1069_s27 + $0x6c] sm:$0xf] %vm686_vm3, %v880_v53  ;;  %v540_v60 = vmax.f32 %v456_v54, 0.0  ;;  %v556_v61 = vmax.f32 %v520_v55, 0.0  ;;  %v448_v62 = vadd.f32 %v1058_v22, %v447_v58  ;;  %v512_v63 = vadd.f32 %v1058_v22, %v511_v59 }
  0xf4   : > { %v862_v0 = vpack.c.bf16 %v535_v56, %v535_v56  ;;  %v878_v1 = vpack.c.bf16 %v551_v57, %v551_v57  ;;  %v922_v2 = vpop.f32.mrf.mxu0  ;;  %v938_v3 = vpop.f32.mrf.mxu1 }
  0xf5   : > { %v867_v4 = vpack.c.bf16 %v540_v60, %v540_v60  ;;  %v883_v5 = vpack.c.bf16 %v556_v61, %v556_v61  ;;  %v538_v6 = vmax.f32 %v448_v62, 0.0  ;;  %v554_v7 = vmax.f32 %v512_v63, 0.0 }
  0xf6   : > { %696 = vst.msk [vmem:[%s1069_s27 + $0x24] sm:$0xf] %vm686_vm3, %v862_v0  ;;  %712 = vst.msk [vmem:[%s1069_s27 + $0x64] sm:$0xf] %vm686_vm3, %v878_v1  ;;  %v459_v8 = vadd.f32 %v922_v2, %v1058_v22  ;;  %v523_v9 = vadd.f32 %v938_v3, %v1058_v22  ;;  %v450_v10 = vpop.f32.mrf.mxu0  ;;  %v514_v11 = vpop.f32.mrf.mxu1 }
  0xf7   : > { %701 = vst.msk [vmem:[%s1069_s27 + $0x38] sm:$0xf] %vm686_vm3, %v867_v4  ;;  %717 = vst.msk [vmem:[%s1069_s27 + $0x78] sm:$0xf] %vm686_vm3, %v883_v5  ;;  %v865_v12 = vpack.c.bf16 %v538_v6, %v538_v6  ;;  %v881_v13 = vpack.c.bf16 %v554_v7, %v554_v7  ;;  %v451_v14 = vadd.f32 %v1058_v22, %v450_v10 }
  0xf8   : > { %v515_v15 = vadd.f32 %v1058_v22, %v514_v11  ;;  %v541_v16 = vmax.f32 %v459_v8, 0.0  ;;  %v557_v17 = vmax.f32 %v523_v9, 0.0 }
  0xf9   : > { %699 = vst.msk [vmem:[%s1069_s27 + $0x30] sm:$0xf] %vm686_vm3, %v865_v12  ;;  %715 = vst.msk [vmem:[%s1069_s27 + $0x70] sm:$0xf] %vm686_vm3, %v881_v13  ;;  %v539_v18 = vmax.f32 %v451_v14, 0.0 }
  0xfa   : > { %v555_v19 = vmax.f32 %v515_v15, 0.0  ;;  %v868_v20 = vpack.c.bf16 %v541_v16, %v541_v16  ;;  %v884_v21 = vpack.c.bf16 %v557_v17, %v557_v17 }
  0xfb   : > { %v866_v23 = vpack.c.bf16 %v539_v18, %v539_v18 }
  0xfc   : > { %v882_v24 = vpack.c.bf16 %v555_v19, %v555_v19  ;;  %702 = vst.msk [vmem:[%s1069_s27 + $0x3c] sm:$0xf] %vm686_vm3, %v868_v20  ;;  %718 = vst.msk [vmem:[%s1069_s27 + $0x7c] sm:$0xf] %vm686_vm3, %v884_v21 }
  0xfd   : > { %700 = vst.msk [vmem:[%s1069_s27 + $0x34] sm:$0xf] %vm686_vm3, %v866_v23 }
  0xfe   : > { %716 = vst.msk [vmem:[%s1069_s27 + $0x74] sm:$0xf] %vm686_vm3, %v882_v24 }
  0xff PF: > { %s13_s12 = sadd.s32 1, %s976_s12  }
 0x100   : > { %p10_p4 = scmp.ge.s32.totalorder %s13_s12, 20  }
 0x102   :  { %12 = sbr.rel (!%p10_p4) target bundleno = 1 (0x1), region = 62 }

// kernel: network_image_cnn_forward.8
= control target key start
LH: loop header
LB: loop body
LE: loop exit
PB: predicated region body
PF: predicated region fallthrough
CT: control target
= control target key end

     0   :  { %s908_s6 = smov 0   ;;  %s1429_s0 = inlined_call_operand.vmem [shape: bf16[48,1536], index: 0, kind: input, shape index: {}]   ;;  %s1430_s1 = inlined_call_operand.vmem [shape: bf16[48,384], index: 1, kind: output, shape index: {}]  }
   0x1 LB: > { %s857_s7 = sadd.s32 4294967295, %s889_s6   ;;  %p861_p0 = scmp.ge.s32.totalorder %s889_s6, 1  ;;  %s889_s6 = sphi %s908_s6, %s11_s6  }
   0x2   : > { %p89_p1 = scmp.lt.s32.totalorder %s889_s6, 3 }
   0x4   : > { %p90_p2 = pnand %p861_p0, %p89_p1 }
   0x5   : > { %s111_s8 = smul.u32 (!%p90_p2), 3, %s857_s7  ;;  %s891_s13 = smov (!%p90_p2), 112  }
   0x6   : > { %93 = sbr.rel (%p90_p2) target bundleno = 523 (0x20b), region = 24  ;;  %s892_s14 = smov (!%p90_p2), 96  }
   0x7   : > { %p112_p3 = scmp.lt.s32.totalorder (!%p90_p2), %s111_s8, 5  ;;  %s893_s15 = smov (!%p90_p2), 80  }
   0x8   : > { %s894_s16 = smov (!%p90_p2), 64   ;;  %s895_s17 = smov (!%p90_p2), 48  }
   0x9   : > { %s896_s18 = smov (!%p90_p2), 32   ;;  %s897_s19 = smov (!%p90_p2), 16  }
   0xb   : > { %s1432_s8 = smov (!%p112_p3, %s111_s8), 5  ;;  %vm167_vm0 = vcmask 125952   ;;  %vm183_vm1 = vcmask 257152   ;;  %vm196_vm2 = vcmask 388352   ;;  %vm209_vm3 = vcmask 519552  }
   0xc   : > { %s866_s9 = smul.u32 48, %s1432_s8  ;;  %vm240_vm4 = vcmask 650752   ;;  %vm283_vm5 = vcmask 781952   ;;  %vm326_vm6 = vcmask 913152   ;;  %vm369_vm7 = vcmask 1044352  }
   0xd   : > { %s867_s20 = smul.u32 12, %s1432_s8 }
   0xe   : > { %s922_s12 = scalar_lea.vmem %s1429_s0, %s866_s9 }
   0xf   : > { %v131_v0 = vld [vmem:[%s922_s12 + $0x60] sm:$0xff]  ;;  %v140_v1 = vld [vmem:[%s922_s12 + $0x78] sm:$0xff]  ;;  %v128_v5 = vld [vmem:[%s922_s12 + $0x30] sm:$0xff]  ;;  %s1026_s23 = scalar_lea.vmem %s1430_s1, %s867_s20 }
  0x10   : > { %v125_v2 = vld [vmem:[%s922_s12] sm:$0xff]  ;;  %v927_v3 = vmax.bf16 %v140_v1, %v131_v0  ;;  %v134_v4 = vld [vmem:[%s922_s12 + $0x18] sm:$0xff]  ;;  %v137_v6 = vld [vmem:[%s922_s12 + $0x48] sm:$0xff] }
  0x11   : > { %v932_v7 = vmax.bf16 %v134_v4, %v125_v2  ;;  %v938_v8 = vmax.bf16 %v137_v6, %v128_v5  ;;  %v129_v9 = vld [vmem:[%s922_s12 + $0x38] sm:$0xff]  ;;  %v138_v10 = vld [vmem:[%s922_s12 + $0x50] sm:$0xff]  ;;  %v126_v12 = vld [vmem:[%s922_s12 + $0x8] sm:$0xff] }
  0x12   : > { %159 = vrot.lane.b32.xlu1 %v927_v3, %s891_s13  ;;  %v976_v11 = vmax.bf16 %v138_v10, %v129_v9  ;;  %v135_v13 = vld [vmem:[%s922_s12 + $0x20] sm:$0xff]  ;;  %v132_v15 = vld [vmem:[%s922_s12 + $0x68] sm:$0xff]  ;;  %v139_v19 = vld [vmem:[%s922_s12 + $0x58] sm:$0xff]  ;;  %v215_v1 = vrot.slane %v927_v3, 4 }
  0x13   : > { %155 = vrot.lane.b32.xlu0 %v932_v7, %s891_s13  ;;  %v986_v14 = vmax.bf16 %v135_v13, %v126_v12  ;;  %v141_v16 = vld [vmem:[%s922_s12 + $0x80] sm:$0xff]  ;;  %v127_v21 = vld [vmem:[%s922_s12 + $0x10] sm:$0xff]  ;;  %v136_v22 = vld [vmem:[%s922_s12 + $0x28] sm:$0xff]  ;;  %v213_v59 = vrot.slane %v932_v7, 4  ;;  %v214_v4 = vrot.slane %v938_v8, 4 }
  0x14   : > { %v994_v17 = vmax.bf16 %v141_v16, %v132_v15  ;;  %v130_v18 = vld [vmem:[%s922_s12 + $0x40] sm:$0xff]  ;;  %v1016_v23 = vmax.bf16 %v136_v22, %v127_v21 }
  0x15   : > { %v1004_v20 = vmax.bf16 %v139_v19, %v130_v18 }
  0x16   : > { %244 = vrot.lane.b32.xlu1 %v932_v7, %s892_s14 }
  0x17   : > { %157 = vrot.lane.b32.xlu0 %v938_v8, %s891_s13 }
  0x1a   : > { %248 = vrot.lane.b32.xlu1 %v927_v3, %s892_s14 }
  0x1b   : > { %246 = vrot.lane.b32.xlu0 %v938_v8, %s892_s14 }
  0x1e   : > { %258 = vrot.lane.b32.xlu1 %v938_v8, %s893_s15 }
  0x1f   : > { %256 = vrot.lane.b32.xlu0 %v932_v7, %s893_s15 }
  0x22   : > { %289 = vrot.lane.b32.xlu1 %v938_v8, %s894_s16 }
  0x23   : > { %260 = vrot.lane.b32.xlu0 %v927_v3, %s893_s15 }
  0x26   : > { %299 = vrot.lane.b32.xlu1 %v932_v7, %s895_s17 }
  0x27   : > { %287 = vrot.lane.b32.xlu0 %v932_v7, %s894_s16 }
  0x2a   : > { %303 = vrot.lane.b32.xlu1 %v927_v3, %s895_s17 }
  0x2b   : > { %291 = vrot.lane.b32.xlu0 %v927_v3, %s894_s16 }
  0x2e   : > { %330 = vrot.lane.b32.xlu1 %v932_v7, %s896_s18 }
  0x2f   : > { %301 = vrot.lane.b32.xlu0 %v938_v8, %s895_s17 }
  0x32   : > { %334 = vrot.lane.b32.xlu1 %v927_v3, %s896_s18 }
  0x33   : > { %332 = vrot.lane.b32.xlu0 %v938_v8, %s896_s18 }
  0x36   : > { %344 = vrot.lane.b32.xlu1 %v938_v8, %s897_s19 }
  0x37   : > { %342 = vrot.lane.b32.xlu0 %v932_v7, %s897_s19 }
  0x3a   : > { %378 = vrot.lane.b32.xlu1 %v976_v11, %s891_s13 }
  0x3b   : > { %346 = vrot.lane.b32.xlu0 %v927_v3, %s897_s19 }
  0x3e   : > { %460 = vrot.lane.b32.xlu1 %v986_v14, %s892_s14 }
  0x3f   : > { %376 = vrot.lane.b32.xlu0 %v986_v14, %s891_s13 }
  0x42   : > { %464 = vrot.lane.b32.xlu1 %v994_v17, %s892_s14 }
  0x43   : > { %380 = vrot.lane.b32.xlu0 %v994_v17, %s891_s13 }
  0x46   : > { %474 = vrot.lane.b32.xlu1 %v976_v11, %s893_s15 }
  0x47   : > { %462 = vrot.lane.b32.xlu0 %v976_v11, %s892_s14 }
  0x4a   : > { %591 = vrot.lane.b32.xlu1 %v1004_v20, %s891_s13 }
  0x4b   : > { %472 = vrot.lane.b32.xlu0 %v986_v14, %s893_s15 }
  0x4f   : > { %476 = vrot.lane.b32.xlu0 %v994_v17, %s893_s15 }
  0x53   : > { %589 = vrot.lane.b32.xlu0 %v1016_v23, %s891_s13 }
  0x84   : > { %v1021_v24 = vpop.permute.xlu1 %159 }
  0x85   : > { %v166_v25 = vmax.bf16 %v1021_v24, %v927_v3  ;;  %v156_v26 = vpop.permute.xlu0 %155  ;;  %v221_v63 = vrot.slane %v1021_v24, 4 }
  0x86   : > { %v164_v27 = vmax.bf16 %v156_v26, %v932_v7  ;;  %v219_v58 = vrot.slane %v156_v26, 4 }
  0x87   : > { %170 = vst.msk [vmem:[%s1026_s23 + $0x18] sm:$0xf] %vm167_vm0, %v166_v25  ;;  %v227_v7 = vmax.bf16 %v221_v63, %v215_v1 }
  0x88   : > { %174 = vrot.lane.b32.xlu1 %v164_v27, %s891_s13  ;;  %v1034_v28 = vpop.permute.xlu1 %244  ;;  %168 = vst.msk [vmem:[%s1026_s23] sm:$0xf] %vm167_vm0, %v164_v27  ;;  %v225_v0 = vmax.bf16 %v219_v58, %v213_v59  ;;  %v431_v58 = vrot.slane %v976_v11, 4 }
  0x89   : > { %v1038_v29 = vpop.permute.xlu0 %157  ;;  %v250_v18 = vrot.slane %v1034_v28, 4 }
  0x8a   : > { %v165_v30 = vmax.bf16 %v1038_v29, %v938_v8  ;;  %v220_v2 = vrot.slane %v1038_v29, 4 }
  0x8c   : > { %178 = vrot.lane.b32.xlu1 %v166_v25, %s891_s13  ;;  %176 = vrot.lane.b32.xlu0 %v165_v30, %s891_s13  ;;  %v1044_v31 = vpop.permute.xlu1 %248  ;;  %169 = vst.msk [vmem:[%s1026_s23 + $0xc] sm:$0xf] %vm167_vm0, %v165_v30  ;;  %v226_v10 = vmax.bf16 %v220_v2, %v214_v4 }
  0x8d   : > { %v1048_v32 = vpop.permute.xlu0 %246  ;;  %v252_v26 = vrot.slane %v1044_v31, 4  ;;  %v430_v31 = vrot.slane %v986_v14, 4 }
  0x8e   : > { %v251_v9 = vrot.slane %v1048_v32, 4 }
  0x90   : > { %189 = vrot.lane.b32.xlu1 %v165_v30, %s892_s14  ;;  %187 = vrot.lane.b32.xlu0 %v164_v27, %s892_s14  ;;  %v259_v33 = vpop.permute.xlu1 %258 }
  0x91   : > { %v1052_v34 = vpop.permute.xlu0 %256  ;;  %v263_v6 = vrot.slane %v259_v33, 4 }
  0x92   : > { %v262_v3 = vrot.slane %v1052_v34, 4 }
  0x93   : > { %v269_v13 = vmax.bf16 %v263_v6, %v251_v9 }
  0x94   : > { %200 = vrot.lane.b32.xlu1 %v164_v27, %s893_s15  ;;  %191 = vrot.lane.b32.xlu0 %v166_v25, %s892_s14  ;;  %v1056_v35 = vpop.permute.xlu1 %289  ;;  %v268_v19 = vmax.bf16 %v262_v3, %v250_v18 }
  0x95   : > { %v1058_v36 = vpop.permute.xlu0 %260  ;;  %v294_v32 = vrot.slane %v1056_v35, 4  ;;  %v432_v35 = vrot.slane %v994_v17, 4 }
  0x96   : > { %v264_v21 = vrot.slane %v1058_v36, 4 }
  0x98   : > { %204 = vrot.lane.b32.xlu1 %v166_v25, %s893_s15  ;;  %202 = vrot.lane.b32.xlu0 %v165_v30, %s893_s15  ;;  %v1062_v37 = vpop.permute.xlu1 %299  ;;  %v270_v27 = vmax.bf16 %v264_v21, %v252_v26 }
  0x99   : > { %v1064_v38 = vpop.permute.xlu0 %287  ;;  %v305_v15 = vrot.slane %v1062_v37, 4 }
  0x9a   : > { %v293_v8 = vrot.slane %v1064_v38, 4 }
  0x9c   : > { %v1066_v39 = vpop.permute.xlu1 %303  ;;  %v311_v22 = vmax.bf16 %v305_v15, %v293_v8 }
  0x9d   : > { %v1068_v40 = vpop.permute.xlu0 %291  ;;  %v307_v24 = vrot.slane %v1066_v39, 4 }
  0x9e   : > { %v295_v25 = vrot.slane %v1068_v40, 4 }
  0xa0   : > { %v1070_v41 = vpop.permute.xlu1 %330  ;;  %v313_v28 = vmax.bf16 %v307_v24, %v295_v25 }
  0xa1   : > { %v1072_v42 = vpop.permute.xlu0 %301  ;;  %v336_v39 = vrot.slane %v1070_v41, 4  ;;  %v142_v41 = vld [vmem:[%s922_s12 + $0x88] sm:$0xff] }
  0xa2   : > { %v306_v29 = vrot.slane %v1072_v42, 4 }
  0xa4   : > { %v1074_v43 = vpop.permute.xlu1 %334  ;;  %v312_v34 = vmax.bf16 %v306_v29, %v294_v32 }
  0xa5   : > { %v1076_v44 = vpop.permute.xlu0 %332 }
  0xa6   : > { %v337_v33 = vrot.slane %v1076_v44, 4 }
  0xa8   : > { %v1078_v45 = vpop.permute.xlu1 %344 }
  0xa9   : > { %v1080_v46 = vpop.permute.xlu0 %342  ;;  %v349_v30 = vrot.slane %v1078_v45, 4 }
  0xaa   : > { %v348_v37 = vrot.slane %v1080_v46, 4  ;;  %v133_v46 = vld [vmem:[%s922_s12 + $0x70] sm:$0xff] }
  0xab   : > { %v355_v36 = vmax.bf16 %v349_v30, %v337_v33 }
  0xac   : > { %v1082_v47 = vpop.permute.xlu1 %378  ;;  %v354_v40 = vmax.bf16 %v348_v37, %v336_v39 }
  0xad   : > { %v386_v48 = vmax.bf16 %v1082_v47, %v976_v11  ;;  %v1086_v49 = vpop.permute.xlu0 %346 }
  0xae   : > { %v350_v42 = vrot.slane %v1086_v49, 4  ;;  %v1187_v49 = vmax.bf16 %v142_v41, %v133_v46 }
  0xaf   : > { %396 = vrot.lane.b32.xlu0 %v386_v48, %s891_s13  ;;  %389 = vst.msk [vmem:[%s1026_s23 + $0x10] sm:$0xf] %vm167_vm0, %v386_v48 }
  0xb0   : > { %v1091_v50 = vpop.permute.xlu1 %460 }
  0xb1   : > { %v1093_v51 = vpop.permute.xlu0 %376  ;;  %v466_v59 = vrot.slane %v1091_v50, 4 }
  0xb2   : > { %v385_v52 = vmax.bf16 %v1093_v51, %v986_v14  ;;  %v436_v38 = vrot.slane %v1093_v51, 4  ;;  %v437_v51 = vrot.slane %v1082_v47, 4 }
  0xb4   : > { %406 = vrot.lane.b32.xlu0 %v385_v52, %s892_s14  ;;  %394 = vrot.lane.b32.xlu1 %v385_v52, %s891_s13  ;;  %v1099_v53 = vpop.permute.xlu1 %464  ;;  %388 = vst.msk [vmem:[%s1026_s23 + $0x4] sm:$0xf] %vm167_vm0, %v385_v52  ;;  %v442_v45 = vmax.bf16 %v436_v38, %v430_v31 }
  0xb5   : > { %v1103_v54 = vpop.permute.xlu0 %380 }
  0xb6   : > { %v387_v55 = vmax.bf16 %v1103_v54, %v994_v17  ;;  %v438_v44 = vrot.slane %v1103_v54, 4  ;;  %v443_v54 = vmax.bf16 %v437_v51, %v431_v58  ;;  %v468_v51 = vrot.slane %v1099_v53, 4 }
  0xb8   : > { %410 = vrot.lane.b32.xlu0 %v387_v55, %s892_s14  ;;  %398 = vrot.lane.b32.xlu1 %v387_v55, %s891_s13  ;;  %v1109_v56 = vpop.permute.xlu1 %474  ;;  %390 = vst.msk [vmem:[%s1026_s23 + $0x1c] sm:$0xf] %vm167_vm0, %v387_v55 }
  0xb9   : > { %v1113_v57 = vpop.permute.xlu0 %462  ;;  %v479_v58 = vrot.slane %v1109_v56, 4 }
  0xbc   : > { %420 = vrot.lane.b32.xlu0 %v386_v48, %s893_s15  ;;  %408 = vrot.lane.b32.xlu1 %v386_v48, %s892_s14  ;;  %v1118_v60 = vpop.permute.xlu1 %591  ;;  %v338_v48 = vrot.slane %v1074_v43, 4 }
  0xbd   : > { %v1120_v61 = vpop.permute.xlu0 %472  ;;  %v1124_v62 = vmax.bf16 %v1118_v60, %v1004_v20 }
  0xbe   : > { %v478_v43 = vrot.slane %v1120_v61, 4 }
  0xbf   : > { %602 = vst.msk [vmem:[%s1026_s23 + $0x14] sm:$0xf] %vm167_vm0, %v1124_v62 }
  0xc0   : > { %418 = vrot.lane.b32.xlu1 %v385_v52, %s893_s15  ;;  %231 = vrot.lane.b32.xlu0 %v225_v0, %s894_s16  ;;  %v356_v52 = vmax.bf16 %v350_v42, %v338_v48  ;;  %v484_v63 = vmax.bf16 %v478_v43, %v466_v59  ;;  %v645_v48 = vrot.slane %v1187_v49, 4 }
  0xc1   : > { %v1135_v5 = vpop.permute.xlu0 %476 }
  0xc4   : > { %422 = vrot.lane.b32.xlu1 %v387_v55, %s893_s15  ;;  %235 = vrot.lane.b32.xlu0 %v227_v7, %s894_s16  ;;  %v444_v55 = vmax.bf16 %v438_v44, %v432_v35  ;;  %v643_v35 = vrot.slane %v1016_v23, 4 }
  0xc5   : > { %v1141_v12 = vpop.permute.xlu0 %589 }
  0xc6   : > { %v1147_v16 = vmax.bf16 %v1141_v12, %v1016_v23 }
  0xc8   : > { %233 = vrot.lane.b32.xlu1 %v226_v10, %s894_s16  ;;  %276 = vrot.lane.b32.xlu0 %v269_v13, %s893_s15  ;;  %601 = vst.msk [vmem:[%s1026_s23 + $0x8] sm:$0xf] %vm167_vm0, %v1147_v16 }
  0xcc   : > { %274 = vrot.lane.b32.xlu1 %v268_v19, %s893_s15  ;;  %317 = vrot.lane.b32.xlu0 %v311_v22, %s892_s14 }
  0xd0   : > { %278 = vrot.lane.b32.xlu1 %v270_v27, %s893_s15  ;;  %321 = vrot.lane.b32.xlu0 %v313_v28, %s892_s14 }
  0xd4   : > { %319 = vrot.lane.b32.xlu1 %v312_v34, %s892_s14  ;;  %362 = vrot.lane.b32.xlu0 %v355_v36, %s891_s13 }
  0xd8   : > { %360 = vrot.lane.b32.xlu1 %v354_v40, %s891_s13  ;;  %448 = vrot.lane.b32.xlu0 %v442_v45, %s894_s16  ;;  %v649_v40 = vrot.slane %v1141_v12, 4 }
  0xda   : > { %v655_v45 = vmax.bf16 %v649_v40, %v643_v35 }
  0xdc   : > { %364 = vrot.lane.b32.xlu1 %v356_v52, %s891_s13  ;;  %452 = vrot.lane.b32.xlu0 %v444_v55, %s894_s16  ;;  %v650_v52 = vrot.slane %v1118_v60, 4 }
  0xe0   : > { %450 = vrot.lane.b32.xlu1 %v443_v54, %s894_s16  ;;  %593 = vrot.lane.b32.xlu0 %v1187_v49, %s891_s13 }
  0xe4   : > { %490 = vrot.lane.b32.xlu1 %v484_v63, %s893_s15  ;;  %675 = vrot.lane.b32.xlu0 %v1004_v20, %s892_s14 }
  0xe8   : > { %673 = vrot.lane.b32.xlu1 %v1016_v23, %s892_s14  ;;  %685 = vrot.lane.b32.xlu0 %v1016_v23, %s893_s15 }
  0xec   : > { %677 = vrot.lane.b32.xlu1 %v1187_v49, %s892_s14  ;;  %689 = vrot.lane.b32.xlu0 %v1187_v49, %s893_s15 }
  0xf0   : > { %687 = vrot.lane.b32.xlu1 %v1004_v20, %s893_s15  ;;  %504 = vrot.lane.b32.xlu0 %v976_v11, %s894_s16 }
  0xf4   : > { %502 = vrot.lane.b32.xlu1 %v986_v14, %s894_s16  ;;  %514 = vrot.lane.b32.xlu0 %v986_v14, %s895_s17 }
  0xf8   : > { %506 = vrot.lane.b32.xlu1 %v994_v17, %s894_s16  ;;  %518 = vrot.lane.b32.xlu0 %v994_v17, %s895_s17 }
  0xfa   : > { %v175_v47 = vpop.permute.xlu1 %174 }
  0xfb   : > { %184 = vst.msk [vmem:[%s1026_s23] sm:$0xf] %vm183_vm1, %v175_v47 }
  0xfc   : > { %516 = vrot.lane.b32.xlu1 %v976_v11, %s895_s17  ;;  %717 = vrot.lane.b32.xlu0 %v1004_v20, %s894_s16 }
  0xfe   : > { %v179_v50 = vpop.permute.xlu1 %178  ;;  %v177_v61 = vpop.permute.xlu0 %176 }
  0xff   : > { %186 = vst.msk [vmem:[%s1026_s23 + $0x18] sm:$0xf] %vm183_vm1, %v179_v50  ;;  %185 = vst.msk [vmem:[%s1026_s23 + $0xc] sm:$0xf] %vm183_vm1, %v177_v61 }
 0x100   : > { %715 = vrot.lane.b32.xlu1 %v1016_v23, %s894_s16  ;;  %727 = vrot.lane.b32.xlu0 %v1016_v23, %s895_s17 }
 0x102   : > { %v190_v0 = vpop.permute.xlu1 %189  ;;  %v188_v1 = vpop.permute.xlu0 %187 }
 0x103   : > { %198 = vst.msk [vmem:[%s1026_s23 + $0xc] sm:$0xf] %vm196_vm2, %v190_v0  ;;  %197 = vst.msk [vmem:[%s1026_s23] sm:$0xf] %vm196_vm2, %v188_v1 }
 0x104   : > { %719 = vrot.lane.b32.xlu1 %v1187_v49, %s894_s16  ;;  %731 = vrot.lane.b32.xlu0 %v1187_v49, %s895_s17 }
 0x106   : > { %v201_v2 = vpop.permute.xlu1 %200  ;;  %v192_v4 = vpop.permute.xlu0 %191 }
 0x107   : > { %210 = vst.msk [vmem:[%s1026_s23] sm:$0xf] %vm209_vm3, %v201_v2 }
 0x108   : > { %199 = vst.msk [vmem:[%s1026_s23 + $0x18] sm:$0xf] %vm196_vm2, %v192_v4  ;;  %729 = vrot.lane.b32.xlu1 %v1004_v20, %s895_s17  ;;  %546 = vrot.lane.b32.xlu0 %v976_v11, %s896_s18 }
 0x10a   : > { %v205_v6 = vpop.permute.xlu1 %204  ;;  %v203_v7 = vpop.permute.xlu0 %202 }
 0x10b   : > { %212 = vst.msk [vmem:[%s1026_s23 + $0x18] sm:$0xf] %vm209_vm3, %v205_v6  ;;  %211 = vst.msk [vmem:[%s1026_s23 + $0xc] sm:$0xf] %vm209_vm3, %v203_v7 }
 0x10c   : > { %544 = vrot.lane.b32.xlu1 %v986_v14, %s896_s18  ;;  %556 = vrot.lane.b32.xlu0 %v986_v14, %s897_s19 }
 0x110   : > { %548 = vrot.lane.b32.xlu1 %v994_v17, %s896_s18  ;;  %560 = vrot.lane.b32.xlu0 %v994_v17, %s897_s19 }
 0x114   : > { %558 = vrot.lane.b32.xlu1 %v976_v11, %s897_s19  ;;  %759 = vrot.lane.b32.xlu0 %v1004_v20, %s896_s18 }
 0x118   : > { %757 = vrot.lane.b32.xlu1 %v1016_v23, %s896_s18  ;;  %769 = vrot.lane.b32.xlu0 %v1016_v23, %s897_s19  ;;  %v644_v23 = vrot.slane %v1004_v20, 4 }
 0x11c   : > { %761 = vrot.lane.b32.xlu1 %v1187_v49, %s896_s18  ;;  %773 = vrot.lane.b32.xlu0 %v1187_v49, %s897_s19 }
 0x120   : > { %771 = vrot.lane.b32.xlu1 %v1004_v20, %s897_s19  ;;  %609 = vrot.lane.b32.xlu0 %v1124_v62, %s891_s13  ;;  %v656_v20 = vmax.bf16 %v650_v52, %v644_v23 }
 0x121   : > { %v397_v11 = vpop.permute.xlu0 %396 }
 0x122   : > { %404 = vst.msk [vmem:[%s1026_s23 + $0x10] sm:$0xf] %vm183_vm1, %v397_v11 }
 0x124   : > { %607 = vrot.lane.b32.xlu1 %v1147_v16, %s891_s13  ;;  %619 = vrot.lane.b32.xlu0 %v1147_v16, %s892_s14 }
 0x126   : > { %v395_v14 = vpop.permute.xlu1 %394  ;;  %v407_v17 = vpop.permute.xlu0 %406 }
 0x127   : > { %403 = vst.msk [vmem:[%s1026_s23 + $0x4] sm:$0xf] %vm183_vm1, %v395_v14 }
 0x128   : > { %415 = vst.msk [vmem:[%s1026_s23 + $0x4] sm:$0xf] %vm196_vm2, %v407_v17 }
 0x12a   : > { %v399_v9 = vpop.permute.xlu1 %398  ;;  %v411_v3 = vpop.permute.xlu0 %410 }
 0x12b   : > { %405 = vst.msk [vmem:[%s1026_s23 + $0x1c] sm:$0xf] %vm183_vm1, %v399_v9 }
 0x12c   : > { %417 = vst.msk [vmem:[%s1026_s23 + $0x1c] sm:$0xf] %vm196_vm2, %v411_v3 }
 0x12e   : > { %v409_v10 = vpop.permute.xlu1 %408  ;;  %v421_v13 = vpop.permute.xlu0 %420 }
 0x12f   : > { %416 = vst.msk [vmem:[%s1026_s23 + $0x10] sm:$0xf] %vm196_vm2, %v409_v10 }
 0x130   : > { %428 = vst.msk [vmem:[%s1026_s23 + $0x10] sm:$0xf] %vm209_vm3, %v421_v13 }
 0x132   : > { %v419_v15 = vpop.permute.xlu1 %418  ;;  %v232_v8 = vpop.permute.xlu0 %231 }
 0x133   : > { %427 = vst.msk [vmem:[%s1026_s23 + $0x4] sm:$0xf] %vm209_vm3, %v419_v15 }
 0x134   : > { %241 = vst.msk [vmem:[%s1026_s23] sm:$0xf] %vm240_vm4, %v232_v8 }
 0x136   : > { %v423_v18 = vpop.permute.xlu1 %422  ;;  %v236_v19 = vpop.permute.xlu0 %235 }
 0x137   : > { %429 = vst.msk [vmem:[%s1026_s23 + $0x1c] sm:$0xf] %vm209_vm3, %v423_v18 }
 0x138   : > { %243 = vst.msk [vmem:[%s1026_s23 + $0x18] sm:$0xf] %vm240_vm4, %v236_v19 }
 0x13a   : > { %v234_v21 = vpop.permute.xlu1 %233  ;;  %v277_v22 = vpop.permute.xlu0 %276 }
 0x13b   : > { %242 = vst.msk [vmem:[%s1026_s23 + $0xc] sm:$0xf] %vm240_vm4, %v234_v21 }
 0x13c   : > { %285 = vst.msk [vmem:[%s1026_s23 + $0xc] sm:$0xf] %vm283_vm5, %v277_v22 }
 0x13e   : > { %v275_v24 = vpop.permute.xlu1 %274  ;;  %v318_v25 = vpop.permute.xlu0 %317 }
 0x13f   : > { %284 = vst.msk [vmem:[%s1026_s23] sm:$0xf] %vm283_vm5, %v275_v24 }
 0x140   : > { %327 = vst.msk [vmem:[%s1026_s23] sm:$0xf] %vm326_vm6, %v318_v25 }
 0x142   : > { %v279_v26 = vpop.permute.xlu1 %278  ;;  %v322_v27 = vpop.permute.xlu0 %321 }
 0x143   : > { %286 = vst.msk [vmem:[%s1026_s23 + $0x18] sm:$0xf] %vm283_vm5, %v279_v26 }
 0x144   : > { %329 = vst.msk [vmem:[%s1026_s23 + $0x18] sm:$0xf] %vm326_vm6, %v322_v27 }
 0x146   : > { %v320_v28 = vpop.permute.xlu1 %319  ;;  %v363_v29 = vpop.permute.xlu0 %362 }
 0x147   : > { %328 = vst.msk [vmem:[%s1026_s23 + $0xc] sm:$0xf] %vm326_vm6, %v320_v28 }
 0x148   : > { %371 = vst.msk [vmem:[%s1026_s23 + $0xc] sm:$0xf] %vm369_vm7, %v363_v29 }
 0x14a   : > { %v361_v30 = vpop.permute.xlu1 %360  ;;  %v449_v32 = vpop.permute.xlu0 %448 }
 0x14b   : > { %370 = vst.msk [vmem:[%s1026_s23] sm:$0xf] %vm369_vm7, %v361_v30 }
 0x14c   : > { %457 = vst.msk [vmem:[%s1026_s23 + $0x4] sm:$0xf] %vm240_vm4, %v449_v32 }
 0x14e   : > { %v365_v33 = vpop.permute.xlu1 %364  ;;  %v453_v31 = vpop.permute.xlu0 %452 }
 0x14f   : > { %372 = vst.msk [vmem:[%s1026_s23 + $0x18] sm:$0xf] %vm369_vm7, %v365_v33 }
 0x150   : > { %459 = vst.msk [vmem:[%s1026_s23 + $0x1c] sm:$0xf] %vm240_vm4, %v453_v31 }
 0x152   : > { %v451_v34 = vpop.permute.xlu1 %450  ;;  %v594_v36 = vpop.permute.xlu0 %593 }
 0x153   : > { %458 = vst.msk [vmem:[%s1026_s23 + $0x10] sm:$0xf] %vm240_vm4, %v451_v34  ;;  %v600_v37 = vmax.bf16 %v594_v36, %v1187_v49  ;;  %v651_v46 = vrot.slane %v594_v36, 4 }
 0x155   : > { %603 = vst.msk [vmem:[%s1026_s23 + $0x20] sm:$0xf] %vm167_vm0, %v600_v37  ;;  %623 = vrot.lane.b32.xlu0 %v600_v37, %s892_s14  ;;  %611 = vrot.lane.b32.xlu1 %v600_v37, %s891_s13  ;;  %v657_v55 = vmax.bf16 %v651_v46, %v645_v48 }
 0x156   : > { %v491_v38 = vpop.permute.xlu1 %490  ;;  %v676_v39 = vpop.permute.xlu0 %675 }
 0x157   : > { %499 = vst.msk [vmem:[%s1026_s23 + $0x4] sm:$0xf] %vm283_vm5, %v491_v38  ;;  %v680_v63 = vrot.slane %v676_v39, 4 }
 0x159   : > { %633 = vrot.lane.b32.xlu0 %v1124_v62, %s893_s15  ;;  %621 = vrot.lane.b32.xlu1 %v1124_v62, %s892_s14  ;;  %v480_v62 = vrot.slane %v1135_v5, 4 }
 0x15a   : > { %v674_v42 = vpop.permute.xlu1 %673  ;;  %v686_v44 = vpop.permute.xlu0 %685 }
 0x15b   : > { %v486_v49 = vmax.bf16 %v480_v62, %v468_v51  ;;  %v679_v53 = vrot.slane %v674_v42, 4  ;;  %v691_v60 = vrot.slane %v686_v44, 4 }
 0x15d   : > { %661 = vrot.lane.b32.xlu0 %v655_v45, %s894_s16  ;;  %631 = vrot.lane.b32.xlu1 %v1147_v16, %s893_s15  ;;  %v467_v16 = vrot.slane %v1113_v57, 4  ;;  %v697_v57 = vmax.bf16 %v691_v60, %v679_v53 }
 0x15e   : > { %v678_v12 = vpop.permute.xlu1 %677  ;;  %v690_v41 = vpop.permute.xlu0 %689 }
 0x15f   : > { %v485_v50 = vmax.bf16 %v479_v58, %v467_v16  ;;  %v681_v1 = vrot.slane %v678_v12, 4  ;;  %v693_v6 = vrot.slane %v690_v41, 4 }
 0x161   : > { %635 = vrot.lane.b32.xlu1 %v600_v37, %s893_s15  ;;  %665 = vrot.lane.b32.xlu0 %v657_v55, %s894_s16  ;;  %v699_v3 = vmax.bf16 %v693_v6, %v681_v1 }
 0x162   : > { %v688_v59 = vpop.permute.xlu1 %687  ;;  %v505_v43 = vpop.permute.xlu0 %504 }
 0x163   : > { %v692_v54 = vrot.slane %v688_v59, 4  ;;  %v509_v15 = vrot.slane %v505_v43, 4 }
 0x165   : > { %663 = vrot.lane.b32.xlu1 %v656_v20, %s894_s16  ;;  %494 = vrot.lane.b32.xlu0 %v486_v49, %s893_s15  ;;  %v698_v61 = vmax.bf16 %v692_v54, %v680_v63 }
 0x166   : > { %v503_v5 = vpop.permute.xlu1 %502  ;;  %v515_v47 = vpop.permute.xlu0 %514 }
 0x167   : > { %v508_v0 = vrot.slane %v503_v5, 4  ;;  %v520_v56 = vrot.slane %v515_v47, 4 }
 0x169   : > { %492 = vrot.lane.b32.xlu1 %v485_v50, %s893_s15  ;;  %705 = vrot.lane.b32.xlu0 %v698_v61, %s893_s15  ;;  %v526_v7 = vmax.bf16 %v520_v56, %v508_v0 }
 0x16a   : > { %v507_v2 = vpop.permute.xlu1 %506  ;;  %v519_v4 = vpop.permute.xlu0 %518 }
 0x16b   : > { %v510_v11 = vrot.slane %v507_v2, 4  ;;  %v522_v14 = vrot.slane %v519_v4, 4 }
 0x16d   : > { %703 = vrot.lane.b32.xlu1 %v697_v57, %s893_s15  ;;  %532 = vrot.lane.b32.xlu0 %v526_v7, %s892_s14  ;;  %v528_v10 = vmax.bf16 %v522_v14, %v510_v11 }
 0x16e   : > { %v517_v17 = vpop.permute.xlu1 %516  ;;  %v718_v9 = vpop.permute.xlu0 %717 }
 0x16f   : > { %v521_v13 = vrot.slane %v517_v17, 4  ;;  %v722_v32 = vrot.slane %v718_v9, 4 }
 0x171   : > { %707 = vrot.lane.b32.xlu1 %v699_v3, %s893_s15  ;;  %536 = vrot.lane.b32.xlu0 %v528_v10, %s892_s14  ;;  %v527_v19 = vmax.bf16 %v521_v13, %v509_v15 }
 0x172   : > { %v716_v8 = vpop.permute.xlu1 %715  ;;  %v728_v18 = vpop.permute.xlu0 %727 }
 0x173   : > { %v721_v21 = vrot.slane %v716_v8, 4  ;;  %v733_v22 = vrot.slane %v728_v18, 4 }
 0x175   : > { %534 = vrot.lane.b32.xlu1 %v527_v19, %s892_s14  ;;  %v739_v26 = vmax.bf16 %v733_v22, %v721_v21 }
 0x176   : > { %v720_v24 = vpop.permute.xlu1 %719  ;;  %v732_v25 = vpop.permute.xlu0 %731 }
 0x177   : > { %v723_v27 = vrot.slane %v720_v24, 4  ;;  %v735_v28 = vrot.slane %v732_v25, 4 }
 0x179   : > { %745 = vrot.lane.b32.xlu1 %v739_v26, %s892_s14  ;;  %v741_v33 = vmax.bf16 %v735_v28, %v723_v27 }
 0x17a   : > { %v730_v29 = vpop.permute.xlu1 %729  ;;  %v547_v30 = vpop.permute.xlu0 %546 }
 0x17b   : > { %v734_v31 = vrot.slane %v730_v29, 4  ;;  %v551_v12 = vrot.slane %v547_v30, 4 }
 0x17d   : > { %v740_v34 = vmax.bf16 %v734_v31, %v722_v32  ;;  %749 = vrot.lane.b32.xlu1 %v741_v33, %s892_s14 }
 0x17e   : > { %v545_v36 = vpop.permute.xlu1 %544  ;;  %v557_v37 = vpop.permute.xlu0 %556 }
 0x17f   : > { %v550_v38 = vrot.slane %v545_v36, 4  ;;  %v562_v39 = vrot.slane %v557_v37, 4  ;;  %747 = vrot.lane.b32.xlu0 %v740_v34, %s892_s14 }
 0x181   : > { %v568_v35 = vmax.bf16 %v562_v39, %v550_v38 }
 0x182   : > { %v549_v40 = vpop.permute.xlu1 %548  ;;  %v561_v42 = vpop.permute.xlu0 %560 }
 0x183   : > { %v552_v44 = vrot.slane %v549_v40, 4  ;;  %v564_v45 = vrot.slane %v561_v42, 4  ;;  %574 = vrot.lane.b32.xlu0 %v568_v35, %s891_s13 }
 0x185   : > { %v570_v48 = vmax.bf16 %v564_v45, %v552_v44 }
 0x186   : > { %v559_v46 = vpop.permute.xlu1 %558  ;;  %v760_v23 = vpop.permute.xlu0 %759 }
 0x187   : > { %v563_v41 = vrot.slane %v559_v46, 4  ;;  %578 = vrot.lane.b32.xlu0 %v570_v48, %s891_s13  ;;  %v764_v60 = vrot.slane %v760_v23, 4 }
 0x189   : > { %v569_v51 = vmax.bf16 %v563_v41, %v551_v12 }
 0x18a   : > { %v758_v52 = vpop.permute.xlu1 %757  ;;  %v770_v62 = vpop.permute.xlu0 %769 }
 0x18b   : > { %v763_v55 = vrot.slane %v758_v52, 4  ;;  %v775_v58 = vrot.slane %v770_v62, 4  ;;  %576 = vrot.lane.b32.xlu1 %v569_v51, %s891_s13 }
 0x18d   : > { %v781_v59 = vmax.bf16 %v775_v58, %v763_v55 }
 0x18e   : > { %v762_v43 = vpop.permute.xlu1 %761  ;;  %v774_v16 = vpop.permute.xlu0 %773 }
 0x18f   : > { %v765_v20 = vrot.slane %v762_v43, 4  ;;  %v777_v49 = vrot.slane %v774_v16, 4  ;;  %787 = vrot.lane.b32.xlu1 %v781_v59, %s891_s13 }
 0x191   : > { %v783_v54 = vmax.bf16 %v777_v49, %v765_v20 }
 0x192   : > { %v772_v63 = vpop.permute.xlu1 %771  ;;  %v610_v53 = vpop.permute.xlu0 %609 }
 0x193   : > { %v776_v5 = vrot.slane %v772_v63, 4  ;;  %617 = vst.msk [vmem:[%s1026_s23 + $0x14] sm:$0xf] %vm183_vm1, %v610_v53  ;;  %791 = vrot.lane.b32.xlu1 %v783_v54, %s891_s13 }
 0x195   : > { %v782_v47 = vmax.bf16 %v776_v5, %v764_v60 }
 0x196   : > { %v608_v50 = vpop.permute.xlu1 %607  ;;  %v620_v61 = vpop.permute.xlu0 %619 }
 0x197   : > { %616 = vst.msk [vmem:[%s1026_s23 + $0x8] sm:$0xf] %vm183_vm1, %v608_v50  ;;  %789 = vrot.lane.b32.xlu0 %v782_v47, %s891_s13 }
 0x198   : > { %628 = vst.msk [vmem:[%s1026_s23 + $0x8] sm:$0xf] %vm196_vm2, %v620_v61 }
 0x1c7   : > { %v612_v0 = vpop.permute.xlu1 %611  ;;  %v624_v56 = vpop.permute.xlu0 %623 }
 0x1c8   : > { %618 = vst.msk [vmem:[%s1026_s23 + $0x20] sm:$0xf] %vm183_vm1, %v612_v0 }
 0x1c9   : > { %630 = vst.msk [vmem:[%s1026_s23 + $0x20] sm:$0xf] %vm196_vm2, %v624_v56 }
 0x1cb   : > { %v622_v57 = vpop.permute.xlu1 %621  ;;  %v634_v1 = vpop.permute.xlu0 %633 }
 0x1cc   : > { %629 = vst.msk [vmem:[%s1026_s23 + $0x14] sm:$0xf] %vm196_vm2, %v622_v57 }
 0x1cd   : > { %641 = vst.msk [vmem:[%s1026_s23 + $0x14] sm:$0xf] %vm209_vm3, %v634_v1 }
 0x1cf   : > { %v632_v2 = vpop.permute.xlu1 %631  ;;  %v662_v4 = vpop.permute.xlu0 %661 }
 0x1d0   : > { %640 = vst.msk [vmem:[%s1026_s23 + $0x8] sm:$0xf] %vm209_vm3, %v632_v2 }
 0x1d1   : > { %670 = vst.msk [vmem:[%s1026_s23 + $0x8] sm:$0xf] %vm240_vm4, %v662_v4 }
 0x1d3   : > { %v636_v6 = vpop.permute.xlu1 %635  ;;  %v666_v7 = vpop.permute.xlu0 %665 }
 0x1d4   : > { %642 = vst.msk [vmem:[%s1026_s23 + $0x20] sm:$0xf] %vm209_vm3, %v636_v6 }
 0x1d5   : > { %672 = vst.msk [vmem:[%s1026_s23 + $0x20] sm:$0xf] %vm240_vm4, %v666_v7 }
 0x1d7   : > { %v664_v11 = vpop.permute.xlu1 %663  ;;  %v495_v14 = vpop.permute.xlu0 %494 }
 0x1d8   : > { %671 = vst.msk [vmem:[%s1026_s23 + $0x14] sm:$0xf] %vm240_vm4, %v664_v11 }
 0x1d9   : > { %501 = vst.msk [vmem:[%s1026_s23 + $0x1c] sm:$0xf] %vm283_vm5, %v495_v14 }
 0x1db   : > { %v493_v17 = vpop.permute.xlu1 %492  ;;  %v706_v9 = vpop.permute.xlu0 %705 }
 0x1dc   : > { %500 = vst.msk [vmem:[%s1026_s23 + $0x10] sm:$0xf] %vm283_vm5, %v493_v17  ;;  %713 = vst.msk [vmem:[%s1026_s23 + $0x14] sm:$0xf] %vm283_vm5, %v706_v9 }
 0x1df   : > { %v704_v3 = vpop.permute.xlu1 %703  ;;  %v533_v10 = vpop.permute.xlu0 %532 }
 0x1e0   : > { %712 = vst.msk [vmem:[%s1026_s23 + $0x8] sm:$0xf] %vm283_vm5, %v704_v3 }
 0x1e1   : > { %541 = vst.msk [vmem:[%s1026_s23 + $0x4] sm:$0xf] %vm326_vm6, %v533_v10 }
 0x1e3   : > { %v708_v13 = vpop.permute.xlu1 %707  ;;  %v537_v15 = vpop.permute.xlu0 %536 }
 0x1e4   : > { %714 = vst.msk [vmem:[%s1026_s23 + $0x20] sm:$0xf] %vm283_vm5, %v708_v13 }
 0x1e5   : > { %543 = vst.msk [vmem:[%s1026_s23 + $0x1c] sm:$0xf] %vm326_vm6, %v537_v15 }
 0x1e7   : > { %v535_v8 = vpop.permute.xlu1 %534 }
 0x1e8   : > { %542 = vst.msk [vmem:[%s1026_s23 + $0x10] sm:$0xf] %vm326_vm6, %v535_v8 }
 0x1eb   : > { %v746_v18 = vpop.permute.xlu1 %745 }
 0x1ec   : > { %754 = vst.msk [vmem:[%s1026_s23 + $0x8] sm:$0xf] %vm326_vm6, %v746_v18 }
 0x1ef   : > { %v750_v19 = vpop.permute.xlu1 %749 }
 0x1f0   : > { %756 = vst.msk [vmem:[%s1026_s23 + $0x20] sm:$0xf] %vm326_vm6, %v750_v19 }
 0x1f1   : > { %v748_v21 = vpop.permute.xlu0 %747 }
 0x1f2   : > { %755 = vst.msk [vmem:[%s1026_s23 + $0x14] sm:$0xf] %vm326_vm6, %v748_v21 }
 0x1f5   : > { %v575_v22 = vpop.permute.xlu0 %574 }
 0x1f6   : > { %583 = vst.msk [vmem:[%s1026_s23 + $0x4] sm:$0xf] %vm369_vm7, %v575_v22 }
 0x1f9   : > { %v579_v24 = vpop.permute.xlu0 %578 }
 0x1fa   : > { %585 = vst.msk [vmem:[%s1026_s23 + $0x1c] sm:$0xf] %vm369_vm7, %v579_v24 }
 0x1fd   : > { %v577_v25 = vpop.permute.xlu1 %576 }
 0x1fe   : > { %584 = vst.msk [vmem:[%s1026_s23 + $0x10] sm:$0xf] %vm369_vm7, %v577_v25 }
 0x201   : > { %v788_v26 = vpop.permute.xlu1 %787 }
 0x202   : > { %796 = vst.msk [vmem:[%s1026_s23 + $0x8] sm:$0xf] %vm369_vm7, %v788_v26 }
 0x205   : > { %v792_v27 = vpop.permute.xlu1 %791 }
 0x206   : > { %798 = vst.msk [vmem:[%s1026_s23 + $0x20] sm:$0xf] %vm369_vm7, %v792_v27 }
 0x209   : > { %v790_v28 = vpop.permute.xlu0 %789 }
 0x20a   : > { %797 = vst.msk [vmem:[%s1026_s23 + $0x14] sm:$0xf] %vm369_vm7, %v790_v28 }
 0x20b PF: > { %s11_s6 = sadd.s32 1, %s889_s6  }
 0x20c   : > { %p8_p4 = scmp.ge.s32.totalorder %s11_s6, 4  }
 0x20e   :  { %10 = sbr.rel (!%p8_p4) target bundleno = 1 (0x1), region = 54 }

// kernel: network_image_cnn_forward.9
= control target key start
LH: loop header
LB: loop body
LE: loop exit
PB: predicated region body
PF: predicated region fallthrough
CT: control target
= control target key end

     0   :  { %s962_s12 = smov 0   ;;  %s1127_s0 = inlined_call_operand.vmem [shape: bf16[1152,144], index: 0, kind: input, shape index: {}]   ;;  %s1128_s1 = inlined_call_operand.vmem [shape: bf16[144,32], index: 1, kind: input, shape index: {}]   ;;  %s1129_s2 = inlined_call_operand.vmem [shape: f32[1,32], index: 2, kind: input, shape index: {}]   ;;  %s1130_s3 = inlined_call_operand.vmem [shape: bf16[1152,32], index: 3, kind: output, shape index: {}]  }
   0x1 LB: > { %s756_s13 = sadd.s32 4294967295, %s939_s12   ;;  %p760_p0 = scmp.ge.s32.totalorder %s939_s12, 1  ;;  %s939_s12 = sphi %s962_s12, %s13_s12  }
   0x2   : > { %p139_p1 = scmp.lt.s32.totalorder %s939_s12, 7 }
   0x4   : > { %p140_p2 = pnand %p760_p0, %p139_p1 }
   0x5   : > { %s164_s16 = smul.u32 (!%p140_p2), 24, %s756_s13 }
   0x6   : > { %143 = sbr.rel (%p140_p2) target bundleno = 292 (0x124), region = 32 }
   0x7   : > { %p165_p3 = scmp.lt.s32.totalorder (!%p140_p2), %s164_s16, 143 }
   0xb   : > { %v888_v0 = vld [vmem:[%s1128_s1 + $0x38] sm:$0xff]   ;;  %v941_v1 = vmov 0   ;;  %v889_v2 = vld [vmem:[%s1128_s1 + $0x30] sm:$0xff]   ;;  %s1132_s16 = smov (!%p165_p3, %s164_s16), 143  ;;  %v890_v3 = vld [vmem:[%s1128_s1 + $0x28] sm:$0xff]   ;;  %vm389_vm0 = vcmask 130048  }
   0xc   : > { %426 = vmatprep.subr.bf16.mxu0 %v941_v1  ;;  %861 = vmatprep.subr.bf16.mxu1 %v941_v1  ;;  %s836_s21 = sshll.u32 %s1132_s16, 3  ;;  %v891_v4 = vld [vmem:[%s1128_s1 + $0x20] sm:$0xff]   ;;  %v892_v7 = vld [vmem:[%s1128_s1 + $0x18] sm:$0xff]   ;;  %v893_v8 = vld [vmem:[%s1128_s1 + $0x10] sm:$0xff]   ;;  %s763_s13 = sshll.u32 %s1132_s16, 2  ;;  %vm675_vm1 = vcmask 257024  }
   0xd   : > { %427 = vmatpush1.bf16.msra.mxu0 %v888_v0  ;;  %870 = vmatpush1.bf16.msra.mxu1 %v888_v0  ;;  %s985_s24 = scalar_lea.vmem %s1127_s0, %s836_s21  ;;  %v894_v9 = vld [vmem:[%s1128_s1 + $0x8] sm:$0xff]   ;;  %v895_v10 = vld [vmem:[%s1128_s1] sm:$0xff]   ;;  %s1052_s17 = scalar_lea.vmem %s1130_s3, %s763_s13 }
   0xe   : > { %428 = vmatprep.subr.bf16.mxu0 %v941_v1  ;;  %862 = vmatprep.subr.bf16.mxu1 %v941_v1  ;;  %v899_v5 = vld [vmem:[%s985_s24 + $0x4] ss:$8 sps:$4 sm:$0xff]   ;;  %v897_v12 = vld [vmem:[%s985_s24] ss:$8 sps:$4 sm:$0xff]   ;;  %v903_v14 = vld [vmem:[%s985_s24 + $0x14] ss:$8 sps:$4 sm:$0xff]  }
   0xf   : > { %v902_v6 = vld [vmem:[%s985_s24 + $0x64] ss:$8 sps:$4 sm:$0xff]   ;;  %798 = vmatprep.mubr.msk.bf16.mxu0 %vm389_vm0, %v899_v5  ;;  %v900_v13 = vld [vmem:[%s985_s24 + $0x60] ss:$8 sps:$4 sm:$0xff]   ;;  %v905_v15 = vld [vmem:[%s985_s24 + $0x74] ss:$8 sps:$4 sm:$0xff]  }
  0x10   : > { %804 = vmatprep.mubr.msk.bf16.mxu1 %vm389_vm0, %v902_v6  ;;  %v896_v11 = vld [vmem:[%s1128_s1 + $0x40] sm:$0xff]   ;;  %v907_v16 = vld [vmem:[%s985_s24 + $0x10] ss:$8 sps:$4 sm:$0xff]   ;;  %v915_v22 = vld [vmem:[%s985_s24 + $0x34] ss:$8 sps:$4 sm:$0xff]  }
  0x11   : > { %429 = vmatpush1.bf16.msra.mxu0 %v889_v2  ;;  %871 = vmatpush1.bf16.msra.mxu1 %v889_v2  ;;  %v908_v17 = vld [vmem:[%s985_s24 + $0x70] ss:$8 sps:$4 sm:$0xff]   ;;  %v909_v18 = vld [vmem:[%s985_s24 + $0x24] ss:$8 sps:$4 sm:$0xff]   ;;  %v913_v20 = vld [vmem:[%s985_s24 + $0x20] ss:$8 sps:$4 sm:$0xff]  }
  0x12   : > { %430 = vmatprep.subr.bf16.mxu0 %v941_v1  ;;  %863 = vmatprep.subr.bf16.mxu1 %v941_v1  ;;  %v911_v19 = vld [vmem:[%s985_s24 + $0x84] ss:$8 sps:$4 sm:$0xff]   ;;  %v914_v21 = vld [vmem:[%s985_s24 + $0x80] ss:$8 sps:$4 sm:$0xff]   ;;  %v917_v23 = vld [vmem:[%s985_s24 + $0x94] ss:$8 sps:$4 sm:$0xff]  }
  0x13   : > { %v919_v24 = vld [vmem:[%s985_s24 + $0x30] ss:$8 sps:$4 sm:$0xff]   ;;  %v921_v26 = vld [vmem:[%s985_s24 + $0x44] ss:$8 sps:$4 sm:$0xff]   ;;  %v925_v28 = vld [vmem:[%s985_s24 + $0x40] ss:$8 sps:$4 sm:$0xff]  }
  0x14   : > { %v920_v25 = vld [vmem:[%s985_s24 + $0x90] ss:$8 sps:$4 sm:$0xff]   ;;  %v923_v27 = vld [vmem:[%s985_s24 + $0xa4] ss:$8 sps:$4 sm:$0xff]   ;;  %v926_v29 = vld [vmem:[%s985_s24 + $0xa0] ss:$8 sps:$4 sm:$0xff]  }
  0x15   : > { %431 = vmatpush1.bf16.msra.mxu0 %v890_v3  ;;  %872 = vmatpush1.bf16.msra.mxu1 %v890_v3  ;;  %v927_v30 = vld [vmem:[%s985_s24 + $0x54] ss:$8 sps:$4 sm:$0xff]   ;;  %v931_v32 = vld [vmem:[%s985_s24 + $0x50] ss:$8 sps:$4 sm:$0xff]   ;;  %v1044_v34 = vld [vmem:[%s1129_s2] ss:$0 sm:$0xff] }
  0x16   : > { %432 = vmatprep.subr.bf16.mxu0 %v941_v1  ;;  %864 = vmatprep.subr.bf16.mxu1 %v941_v1  ;;  %v929_v31 = vld [vmem:[%s985_s24 + $0xb4] ss:$8 sps:$4 sm:$0xff]   ;;  %v932_v33 = vld [vmem:[%s985_s24 + $0xb0] ss:$8 sps:$4 sm:$0xff]  }
  0x19   : > { %433 = vmatpush1.bf16.msra.mxu0 %v891_v4  ;;  %873 = vmatpush1.bf16.msra.mxu1 %v891_v4 }
  0x1a   : > { %434 = vmatprep.subr.bf16.mxu0 %v941_v1  ;;  %865 = vmatprep.subr.bf16.mxu1 %v941_v1 }
  0x1d   : > { %435 = vmatpush1.bf16.msra.mxu0 %v892_v7  ;;  %874 = vmatpush1.bf16.msra.mxu1 %v892_v7 }
  0x1e   : > { %436 = vmatprep.subr.bf16.mxu0 %v941_v1  ;;  %866 = vmatprep.subr.bf16.mxu1 %v941_v1 }
  0x21   : > { %437 = vmatpush1.bf16.msra.mxu0 %v893_v8  ;;  %875 = vmatpush1.bf16.msra.mxu1 %v893_v8 }
  0x22   : > { %438 = vmatprep.subr.bf16.mxu0 %v941_v1  ;;  %867 = vmatprep.subr.bf16.mxu1 %v941_v1 }
  0x25   : > { %439 = vmatpush1.bf16.msra.mxu0 %v894_v9  ;;  %876 = vmatpush1.bf16.msra.mxu1 %v894_v9 }
  0x26   : > { %440 = vmatprep.subr.bf16.mxu0 %v941_v1  ;;  %868 = vmatprep.subr.bf16.mxu1 %v941_v1 }
  0x29   : > { %441 = vmatpush1.bf16.msra.mxu0 %v895_v10  ;;  %877 = vmatpush1.bf16.msra.mxu1 %v895_v10 }
  0x2a   : > { %456 = vmatprep.subr.bf16.mxu0 %v941_v1  ;;  %869 = vmatprep.subr.bf16.mxu1 %v941_v1 }
  0x2d   : > { %457 = vmatpush2.bf16.msra.mxu0 %v896_v11  ;;  %878 = vmatpush2.bf16.msra.mxu1 %v896_v11 }
  0x30   : > { %459 = vmatmul.mubr.bf16.vlgmr.msra.gmra.mxu0 %v897_v12  ;;  %507 = vmatmul.mubr.bf16.vlgmr.msra.gmra.mxu1 %v900_v13 }
  0x31   : > { %799 = vmatprep.mubr.msk.bf16.mxu0 %vm389_vm0, %v903_v14  ;;  %805 = vmatprep.mubr.msk.bf16.mxu1 %vm389_vm0, %v905_v15 }
  0x38   : > { %467 = vmatmul.mubr.bf16.gmra.mxu0 %v907_v16  ;;  %515 = vmatmul.mubr.bf16.gmra.mxu1 %v908_v17 }
  0x39   : > { %800 = vmatprep.mubr.msk.bf16.mxu0 %vm389_vm0, %v909_v18  ;;  %806 = vmatprep.mubr.msk.bf16.mxu1 %vm389_vm0, %v911_v19 }
  0x40   : > { %475 = vmatmul.mubr.bf16.gmra.mxu0 %v913_v20  ;;  %523 = vmatmul.mubr.bf16.gmra.mxu1 %v914_v21 }
  0x41   : > { %801 = vmatprep.mubr.msk.bf16.mxu0 %vm389_vm0, %v915_v22  ;;  %807 = vmatprep.mubr.msk.bf16.mxu1 %vm389_vm0, %v917_v23 }
  0x48   : > { %483 = vmatmul.mubr.bf16.gmra.mxu0 %v919_v24  ;;  %531 = vmatmul.mubr.bf16.gmra.mxu1 %v920_v25 }
  0x49   : > { %802 = vmatprep.mubr.msk.bf16.mxu0 %vm389_vm0, %v921_v26  ;;  %808 = vmatprep.mubr.msk.bf16.mxu1 %vm389_vm0, %v923_v27 }
  0x50   : > { %491 = vmatmul.mubr.bf16.gmra.mxu0 %v925_v28  ;;  %539 = vmatmul.mubr.bf16.gmra.mxu1 %v926_v29 }
  0x51   : > { %803 = vmatprep.mubr.msk.bf16.mxu0 %vm389_vm0, %v927_v30  ;;  %809 = vmatprep.mubr.msk.bf16.mxu1 %vm389_vm0, %v929_v31 }
  0x58   : > { %499 = vmatmul.mubr.bf16.gmra.mxu0 %v931_v32  ;;  %547 = vmatmul.mubr.bf16.gmra.mxu1 %v932_v33 }
  0xf0   : > { %v460_v35 = vpop.f32.mrf.mxu0  ;;  %v508_v36 = vpop.f32.mrf.mxu1 }
  0xf1   : > { %v461_v37 = vadd.f32 %v1044_v34, %v460_v35  ;;  %v509_v38 = vadd.f32 %v1044_v34, %v508_v36 }
  0xf2   : > { %v462_v39 = vpop.f32.mrf.mxu0  ;;  %v510_v40 = vpop.f32.mrf.mxu1 }
  0xf3   : > { %v555_v41 = vmax.f32 %v461_v37, 0.0  ;;  %v567_v42 = vmax.f32 %v509_v38, 0.0 }
  0xf4   : > { %v463_v43 = vpop.f32.mrf.mxu0  ;;  %v511_v44 = vpop.f32.mrf.mxu1 }
  0xf5   : > { %v837_v45 = vpack.c.bf16 %v555_v41, %v555_v41  ;;  %v849_v46 = vpack.c.bf16 %v567_v42, %v567_v42  ;;  %v464_v47 = vadd.f32 %v1044_v34, %v463_v43  ;;  %v512_v48 = vadd.f32 %v1044_v34, %v511_v44 }
  0xf6   : > { %v465_v49 = vpop.f32.mrf.mxu0  ;;  %v513_v50 = vpop.f32.mrf.mxu1 }
  0xf7   : > { %676 = vst.msk [vmem:[%s1052_s17] sm:$0xf] %vm675_vm1, %v837_v45  ;;  %688 = vst.msk [vmem:[%s1052_s17 + $0x30] sm:$0xf] %vm675_vm1, %v849_v46  ;;  %v556_v51 = vmax.f32 %v464_v47, 0.0  ;;  %v568_v52 = vmax.f32 %v512_v48, 0.0 }
  0xf8   : > { %v468_v53 = vpop.f32.mrf.mxu0  ;;  %v516_v54 = vpop.f32.mrf.mxu1 }
  0xf9   : > { %v838_v55 = vpack.c.bf16 %v556_v51, %v556_v51  ;;  %v850_v56 = vpack.c.bf16 %v568_v52, %v568_v52  ;;  %v469_v57 = vadd.f32 %v1044_v34, %v468_v53  ;;  %v517_v58 = vadd.f32 %v1044_v34, %v516_v54 }
  0xfa   : > { %v470_v59 = vpop.f32.mrf.mxu0  ;;  %v518_v60 = vpop.f32.mrf.mxu1 }
  0xfb   : > { %677 = vst.msk [vmem:[%s1052_s17 + $0x4] sm:$0xf] %vm675_vm1, %v838_v55  ;;  %689 = vst.msk [vmem:[%s1052_s17 + $0x34] sm:$0xf] %vm675_vm1, %v850_v56  ;;  %v557_v61 = vmax.f32 %v469_v57, 0.0  ;;  %v569_v62 = vmax.f32 %v517_v58, 0.0 }
  0xfc   : > { %v471_v63 = vpop.f32.mrf.mxu0  ;;  %v519_v0 = vpop.f32.mrf.mxu1 }
  0xfd   : > { %v839_v1 = vpack.c.bf16 %v557_v61, %v557_v61  ;;  %v851_v2 = vpack.c.bf16 %v569_v62, %v569_v62  ;;  %v472_v3 = vadd.f32 %v1044_v34, %v471_v63  ;;  %v520_v4 = vadd.f32 %v1044_v34, %v519_v0 }
  0xfe   : > { %v473_v5 = vpop.f32.mrf.mxu0  ;;  %v521_v6 = vpop.f32.mrf.mxu1 }
  0xff   : > { %678 = vst.msk [vmem:[%s1052_s17 + $0x8] sm:$0xf] %vm675_vm1, %v839_v1  ;;  %690 = vst.msk [vmem:[%s1052_s17 + $0x38] sm:$0xf] %vm675_vm1, %v851_v2  ;;  %v558_v7 = vmax.f32 %v472_v3, 0.0  ;;  %v570_v8 = vmax.f32 %v520_v4, 0.0 }
 0x100   : > { %v476_v9 = vpop.f32.mrf.mxu0  ;;  %v524_v10 = vpop.f32.mrf.mxu1 }
 0x101   : > { %v840_v11 = vpack.c.bf16 %v558_v7, %v558_v7  ;;  %v852_v12 = vpack.c.bf16 %v570_v8, %v570_v8  ;;  %v477_v13 = vadd.f32 %v1044_v34, %v476_v9  ;;  %v525_v14 = vadd.f32 %v1044_v34, %v524_v10 }
 0x102   : > { %v478_v15 = vpop.f32.mrf.mxu0  ;;  %v526_v16 = vpop.f32.mrf.mxu1 }
 0x103   : > { %679 = vst.msk [vmem:[%s1052_s17 + $0xc] sm:$0xf] %vm675_vm1, %v840_v11  ;;  %691 = vst.msk [vmem:[%s1052_s17 + $0x3c] sm:$0xf] %vm675_vm1, %v852_v12  ;;  %v559_v17 = vmax.f32 %v477_v13, 0.0  ;;  %v571_v18 = vmax.f32 %v525_v14, 0.0 }
 0x104   : > { %v479_v19 = vpop.f32.mrf.mxu0  ;;  %v527_v20 = vpop.f32.mrf.mxu1 }
 0x105   : > { %v841_v21 = vpack.c.bf16 %v559_v17, %v559_v17  ;;  %v853_v22 = vpack.c.bf16 %v571_v18, %v571_v18  ;;  %v480_v23 = vadd.f32 %v1044_v34, %v479_v19  ;;  %v528_v24 = vadd.f32 %v1044_v34, %v527_v20 }
 0x106   : > { %v481_v25 = vpop.f32.mrf.mxu0  ;;  %v529_v26 = vpop.f32.mrf.mxu1 }
 0x107   : > { %680 = vst.msk [vmem:[%s1052_s17 + $0x10] sm:$0xf] %vm675_vm1, %v841_v21  ;;  %692 = vst.msk [vmem:[%s1052_s17 + $0x40] sm:$0xf] %vm675_vm1, %v853_v22  ;;  %v560_v27 = vmax.f32 %v480_v23, 0.0  ;;  %v572_v28 = vmax.f32 %v528_v24, 0.0 }
 0x108   : > { %v484_v29 = vpop.f32.mrf.mxu0  ;;  %v532_v30 = vpop.f32.mrf.mxu1 }
 0x109   : > { %v842_v31 = vpack.c.bf16 %v560_v27, %v560_v27  ;;  %v854_v32 = vpack.c.bf16 %v572_v28, %v572_v28  ;;  %v485_v33 = vadd.f32 %v1044_v34, %v484_v29  ;;  %v533_v35 = vadd.f32 %v1044_v34, %v532_v30 }
 0x10a   : > { %v486_v36 = vpop.f32.mrf.mxu0  ;;  %v534_v37 = vpop.f32.mrf.mxu1 }
 0x10b   : > { %681 = vst.msk [vmem:[%s1052_s17 + $0x14] sm:$0xf] %vm675_vm1, %v842_v31  ;;  %693 = vst.msk [vmem:[%s1052_s17 + $0x44] sm:$0xf] %vm675_vm1, %v854_v32  ;;  %v561_v38 = vmax.f32 %v485_v33, 0.0  ;;  %v573_v39 = vmax.f32 %v533_v35, 0.0 }
 0x10c   : > { %v487_v40 = vpop.f32.mrf.mxu0  ;;  %v535_v41 = vpop.f32.mrf.mxu1 }
 0x10d   : > { %v843_v42 = vpack.c.bf16 %v561_v38, %v561_v38  ;;  %v855_v43 = vpack.c.bf16 %v573_v39, %v573_v39  ;;  %v488_v44 = vadd.f32 %v1044_v34, %v487_v40  ;;  %v536_v45 = vadd.f32 %v1044_v34, %v535_v41 }
 0x10e   : > { %v489_v46 = vpop.f32.mrf.mxu0  ;;  %v537_v47 = vpop.f32.mrf.mxu1 }
 0x10f   : > { %682 = vst.msk [vmem:[%s1052_s17 + $0x18] sm:$0xf] %vm675_vm1, %v843_v42  ;;  %694 = vst.msk [vmem:[%s1052_s17 + $0x48] sm:$0xf] %vm675_vm1, %v855_v43  ;;  %v562_v48 = vmax.f32 %v488_v44, 0.0  ;;  %v574_v49 = vmax.f32 %v536_v45, 0.0 }
 0x110   : > { %v492_v50 = vpop.f32.mrf.mxu0  ;;  %v540_v51 = vpop.f32.mrf.mxu1 }
 0x111   : > { %v844_v52 = vpack.c.bf16 %v562_v48, %v562_v48  ;;  %v856_v53 = vpack.c.bf16 %v574_v49, %v574_v49  ;;  %v493_v54 = vadd.f32 %v1044_v34, %v492_v50  ;;  %v541_v55 = vadd.f32 %v1044_v34, %v540_v51 }
 0x112   : > { %v494_v56 = vpop.f32.mrf.mxu0  ;;  %v542_v57 = vpop.f32.mrf.mxu1 }
 0x113   : > { %683 = vst.msk [vmem:[%s1052_s17 + $0x1c] sm:$0xf] %vm675_vm1, %v844_v52  ;;  %695 = vst.msk [vmem:[%s1052_s17 + $0x4c] sm:$0xf] %vm675_vm1, %v856_v53  ;;  %v563_v58 = vmax.f32 %v493_v54, 0.0  ;;  %v575_v59 = vmax.f32 %v541_v55, 0.0 }
 0x114   : > { %v495_v60 = vpop.f32.mrf.mxu0  ;;  %v543_v61 = vpop.f32.mrf.mxu1 }
 0x115   : > { %v845_v62 = vpack.c.bf16 %v563_v58, %v563_v58  ;;  %v857_v63 = vpack.c.bf16 %v575_v59, %v575_v59  ;;  %v496_v0 = vadd.f32 %v1044_v34, %v495_v60  ;;  %v544_v1 = vadd.f32 %v1044_v34, %v543_v61 }
 0x116   : > { %v497_v2 = vpop.f32.mrf.mxu0  ;;  %v545_v3 = vpop.f32.mrf.mxu1 }
 0x117   : > { %684 = vst.msk [vmem:[%s1052_s17 + $0x20] sm:$0xf] %vm675_vm1, %v845_v62  ;;  %696 = vst.msk [vmem:[%s1052_s17 + $0x50] sm:$0xf] %vm675_vm1, %v857_v63  ;;  %v564_v4 = vmax.f32 %v496_v0, 0.0  ;;  %v576_v5 = vmax.f32 %v544_v1, 0.0 }
 0x118   : > { %v500_v6 = vpop.f32.mrf.mxu0  ;;  %v548_v7 = vpop.f32.mrf.mxu1 }
 0x119   : > { %v846_v8 = vpack.c.bf16 %v564_v4, %v564_v4  ;;  %v858_v9 = vpack.c.bf16 %v576_v5, %v576_v5  ;;  %v501_v10 = vadd.f32 %v1044_v34, %v500_v6  ;;  %v549_v11 = vadd.f32 %v1044_v34, %v548_v7 }
 0x11a   : > { %v502_v12 = vpop.f32.mrf.mxu0  ;;  %v550_v13 = vpop.f32.mrf.mxu1 }
 0x11b   : > { %685 = vst.msk [vmem:[%s1052_s17 + $0x24] sm:$0xf] %vm675_vm1, %v846_v8  ;;  %697 = vst.msk [vmem:[%s1052_s17 + $0x54] sm:$0xf] %vm675_vm1, %v858_v9  ;;  %v565_v14 = vmax.f32 %v501_v10, 0.0  ;;  %v577_v15 = vmax.f32 %v549_v11, 0.0 }
 0x11c   : > { %v503_v16 = vpop.f32.mrf.mxu0  ;;  %v551_v17 = vpop.f32.mrf.mxu1 }
 0x11d   : > { %v847_v18 = vpack.c.bf16 %v565_v14, %v565_v14  ;;  %v859_v19 = vpack.c.bf16 %v577_v15, %v577_v15  ;;  %v504_v20 = vadd.f32 %v1044_v34, %v503_v16  ;;  %v552_v21 = vadd.f32 %v1044_v34, %v551_v17 }
 0x11e   : > { %v505_v22 = vpop.f32.mrf.mxu0  ;;  %v553_v23 = vpop.f32.mrf.mxu1 }
 0x11f   : > { %686 = vst.msk [vmem:[%s1052_s17 + $0x28] sm:$0xf] %vm675_vm1, %v847_v18  ;;  %698 = vst.msk [vmem:[%s1052_s17 + $0x58] sm:$0xf] %vm675_vm1, %v859_v19  ;;  %v566_v24 = vmax.f32 %v504_v20, 0.0  ;;  %v578_v25 = vmax.f32 %v552_v21, 0.0 }
 0x121   : > { %v848_v26 = vpack.c.bf16 %v566_v24, %v566_v24  ;;  %v860_v27 = vpack.c.bf16 %v578_v25, %v578_v25 }
 0x123   : > { %687 = vst.msk [vmem:[%s1052_s17 + $0x2c] sm:$0xf] %vm675_vm1, %v848_v26  ;;  %699 = vst.msk [vmem:[%s1052_s17 + $0x5c] sm:$0xf] %vm675_vm1, %v860_v27 }
 0x124 PF: > { %s13_s12 = sadd.s32 1, %s939_s12  }
 0x125   : > { %p10_p4 = scmp.ge.s32.totalorder %s13_s12, 8  }
 0x127   :  { %12 = sbr.rel (!%p10_p4) target bundleno = 1 (0x1), region = 62 }

// kernel: network_image_cnn_forward.10
= control target key start
LH: loop header
LB: loop body
LE: loop exit
PB: predicated region body
PF: predicated region fallthrough
CT: control target
= control target key end

     0   :  { %s333_s6 = smov 0   ;;  %s379_s0 = inlined_call_operand.vmem [shape: bf16[24,1536], index: 0, kind: input, shape index: {}]   ;;  %s380_s1 = inlined_call_operand.vmem [shape: bf16[24,384], index: 1, kind: output, shape index: {}]  }
   0x1 LB: > { %s290_s7 = sadd.s32 4294967295, %s318_s6   ;;  %p294_p0 = scmp.ge.s32.totalorder %s318_s6, 1  ;;  %s318_s6 = sphi %s333_s6, %s11_s6  }
   0x2   : > { %p87_p1 = scmp.lt.s32.totalorder %s318_s6, 4 }
   0x4   : > { %p88_p2 = pnand %p294_p0, %p87_p1 }
   0x5   : > { %p107_p3 = scmp.lt.s32.totalorder (!%p88_p2), %s290_s7, 2  ;;  %s320_s12 = smov (!%p88_p2), 96  }
   0x6   : > { %91 = sbr.rel (%p88_p2) target bundleno = 269 (0x10d), region = 24  ;;  %s321_s13 = smov (!%p88_p2), 64  }
   0x7   : > { %s322_s14 = smov (!%p88_p2), 32  }
   0xb   : > { %s382_s7 = smov (!%p107_p3, %s290_s7), 2  ;;  %vm131_vm0 = vcmask 257024   ;;  %vm137_vm1 = vcmask 519424   ;;  %vm148_vm2 = vcmask 781824   ;;  %vm163_vm3 = vcmask 1044224  }
   0xc   : > { %s299_s8 = smul.u32 48, %s382_s7 }
   0xd   : > { %s300_s15 = smul.u32 12, %s382_s7 }
   0xe   : > { %s111_s11 = scalar_lea.vmem %s379_s0, %s299_s8 }
   0xf   : > { %v117_v0 = vld [vmem:[%s111_s11] sm:$0xff]  ;;  %v120_v1 = vld [vmem:[%s111_s11 + $0x18] sm:$0xff]  ;;  %v119_v2 = vld [vmem:[%s111_s11 + $0x10] sm:$0xff]  ;;  %s353_s18 = scalar_lea.vmem %s380_s1, %s300_s15 }
  0x10   : > { %v123_v3 = vmax.bf16 %v120_v1, %v117_v0  ;;  %v122_v4 = vld [vmem:[%s111_s11 + $0x28] sm:$0xff]  ;;  %v121_v6 = vld [vmem:[%s111_s11 + $0x20] sm:$0xff] }
  0x11   : > { %v118_v5 = vld [vmem:[%s111_s11 + $0x8] sm:$0xff]  ;;  %v125_v7 = vmax.bf16 %v122_v4, %v119_v2 }
  0x12   : > { %127 = vrot.lane.b32.xlu0 %v123_v3, %s320_s12  ;;  %v124_v8 = vmax.bf16 %v121_v6, %v118_v5  ;;  %v139_v13 = vrot.slane %v123_v3, 4 }
  0x13   : > { %201 = vrot.lane.b32.xlu1 %v125_v7, %s320_s12  ;;  %v211_v20 = vrot.slane %v125_v7, 4 }
  0x14   : > { %v176_v16 = vrot.slane %v124_v8, 4 }
  0x16   : > { %166 = vrot.lane.b32.xlu0 %v124_v8, %s320_s12 }
  0x17   : > { %150 = vrot.lane.b32.xlu1 %v123_v3, %s321_s13 }
  0x1a   : > { %154 = vrot.lane.b32.xlu0 %v123_v3, %s322_s14 }
  0x1b   : > { %186 = vrot.lane.b32.xlu1 %v124_v8, %s321_s13 }
  0x1e   : > { %190 = vrot.lane.b32.xlu0 %v124_v8, %s322_s14 }
  0x1f   : > { %221 = vrot.lane.b32.xlu1 %v125_v7, %s321_s13 }
  0x22   : > { %225 = vrot.lane.b32.xlu0 %v125_v7, %s322_s14 }
  0x84   : > { %v128_v9 = vpop.permute.xlu0 %127 }
  0x85   : > { %v130_v10 = vmax.bf16 %v128_v9, %v123_v3  ;;  %v202_v11 = vpop.permute.xlu1 %201  ;;  %v141_v15 = vrot.slane %v128_v9, 4 }
  0x86   : > { %v204_v12 = vmax.bf16 %v202_v11, %v125_v7  ;;  %v213_v21 = vrot.slane %v202_v11, 4 }
  0x87   : > { %132 = vst.msk [vmem:[%s353_s18] sm:$0xf] %vm131_vm0, %v130_v10  ;;  %134 = vrot.lane.b32.xlu1 %v130_v10, %s320_s12  ;;  %v143_v23 = vmax.bf16 %v141_v15, %v139_v13 }
  0x88   : > { %205 = vst.msk [vmem:[%s353_s18 + $0x8] sm:$0xf] %vm131_vm0, %v204_v12  ;;  %v167_v14 = vpop.permute.xlu0 %166  ;;  %v215_v29 = vmax.bf16 %v213_v21, %v211_v20 }
  0x89   : > { %v169_v17 = vmax.bf16 %v167_v14, %v124_v8  ;;  %v178_v18 = vrot.slane %v167_v14, 4  ;;  %v151_v19 = vpop.permute.xlu1 %150 }
  0x8a   : > { %v152_v25 = vrot.slane %v151_v19, 4 }
  0x8b   : > { %170 = vst.msk [vmem:[%s353_s18 + $0x4] sm:$0xf] %vm131_vm0, %v169_v17  ;;  %207 = vrot.lane.b32.xlu1 %v204_v12, %s320_s12  ;;  %172 = vrot.lane.b32.xlu0 %v169_v17, %s320_s12  ;;  %v180_v24 = vmax.bf16 %v178_v18, %v176_v16 }
  0x8c   : > { %v155_v22 = vpop.permute.xlu0 %154 }
  0x8d   : > { %v156_v26 = vrot.slane %v155_v22, 4  ;;  %v187_v27 = vpop.permute.xlu1 %186 }
  0x8e   : > { %v188_v31 = vrot.slane %v187_v27, 4 }
  0x8f   : > { %182 = vrot.lane.b32.xlu1 %v180_v24, %s321_s13  ;;  %145 = vrot.lane.b32.xlu0 %v143_v23, %s321_s13  ;;  %v158_v30 = vmax.bf16 %v156_v26, %v152_v25 }
  0x90   : > { %v191_v28 = vpop.permute.xlu0 %190 }
  0x91   : > { %v192_v32 = vrot.slane %v191_v28, 4  ;;  %v222_v33 = vpop.permute.xlu1 %221 }
  0x92   : > { %v223_v34 = vrot.slane %v222_v33, 4 }
  0x93   : > { %160 = vrot.lane.b32.xlu1 %v158_v30, %s320_s12  ;;  %217 = vrot.lane.b32.xlu0 %v215_v29, %s321_s13  ;;  %v194_v36 = vmax.bf16 %v192_v32, %v188_v31 }
  0x94   : > { %v226_v35 = vpop.permute.xlu0 %225 }
  0x95   : > { %v227_v37 = vrot.slane %v226_v35, 4 }
  0x97   : > { %v229_v38 = vmax.bf16 %v227_v37, %v223_v34  ;;  %196 = vrot.lane.b32.xlu0 %v194_v36, %s320_s12 }
  0x99   : > { %231 = vrot.lane.b32.xlu1 %v229_v38, %s320_s12 }
  0xf9   : > { %v135_v39 = vpop.permute.xlu1 %134 }
  0xfa   : > { %138 = vst.msk [vmem:[%s353_s18] sm:$0xf] %vm137_vm1, %v135_v39 }
  0xfd   : > { %v208_v40 = vpop.permute.xlu1 %207  ;;  %v173_v41 = vpop.permute.xlu0 %172 }
  0xfe   : > { %210 = vst.msk [vmem:[%s353_s18 + $0x8] sm:$0xf] %vm137_vm1, %v208_v40  ;;  %175 = vst.msk [vmem:[%s353_s18 + $0x4] sm:$0xf] %vm137_vm1, %v173_v41 }
 0x101   : > { %v183_v42 = vpop.permute.xlu1 %182  ;;  %v146_v43 = vpop.permute.xlu0 %145 }
 0x102   : > { %185 = vst.msk [vmem:[%s353_s18 + $0x4] sm:$0xf] %vm148_vm2, %v183_v42  ;;  %149 = vst.msk [vmem:[%s353_s18] sm:$0xf] %vm148_vm2, %v146_v43 }
 0x105   : > { %v161_v44 = vpop.permute.xlu1 %160  ;;  %v218_v45 = vpop.permute.xlu0 %217 }
 0x106   : > { %164 = vst.msk [vmem:[%s353_s18] sm:$0xf] %vm163_vm3, %v161_v44 }
 0x107   : > { %220 = vst.msk [vmem:[%s353_s18 + $0x8] sm:$0xf] %vm148_vm2, %v218_v45 }
 0x109   : > { %v197_v46 = vpop.permute.xlu0 %196 }
 0x10a   : > { %199 = vst.msk [vmem:[%s353_s18 + $0x4] sm:$0xf] %vm163_vm3, %v197_v46 }
 0x10b   : > { %v232_v47 = vpop.permute.xlu1 %231 }
 0x10c   : > { %234 = vst.msk [vmem:[%s353_s18 + $0x8] sm:$0xf] %vm163_vm3, %v232_v47 }
 0x10d PF: > { %s11_s6 = sadd.s32 1, %s318_s6  }
 0x10e   : > { %p8_p4 = scmp.ge.s32.totalorder %s11_s6, 5  }
 0x110   :  { %10 = sbr.rel (!%p8_p4) target bundleno = 1 (0x1), region = 54 }

// kernel: network_image_cnn_forward.11
= control target key start
LH: loop header
LB: loop body
LE: loop exit
PB: predicated region body
PF: predicated region fallthrough
CT: control target
= control target key end

     0   :  { %s1219_s12 = smov 0   ;;  %s1413_s0 = inlined_call_operand.vmem [shape: bf16[288,288], index: 0, kind: input, shape index: {}]   ;;  %s1414_s1 = inlined_call_operand.vmem [shape: bf16[288,64], index: 1, kind: input, shape index: {}]   ;;  %s1415_s2 = inlined_call_operand.vmem [shape: f32[1,64], index: 2, kind: input, shape index: {}]   ;;  %s1416_s3 = inlined_call_operand.vmem [shape: bf16[288,64], index: 3, kind: output, shape index: {}]  }
   0x1 LB: > { %s903_s13 = sadd.s32 4294967295, %s1195_s12   ;;  %p907_p0 = scmp.ge.s32.totalorder %s1195_s12, 1  ;;  %s1195_s12 = sphi %s1219_s12, %s13_s12  }
   0x2   : > { %p139_p1 = scmp.lt.s32.totalorder %s1195_s12, 3 }
   0x4   : > { %p140_p2 = pnand %p907_p0, %p139_p1 }
   0x5   : > { %s164_s18 = smul.u32 (!%p140_p2), 18, %s903_s13 }
   0x6   : > { %143 = sbr.rel (%p140_p2) target bundleno = 318 (0x13e), region = 32 }
   0x7   : > { %p165_p3 = scmp.lt.s32.totalorder (!%p140_p2), %s164_s18, 35 }
   0xb   : > { %v1135_v0 = vld [vmem:[%s1414_s1 + $0x78] sm:$0xff]   ;;  %v1197_v2 = vmov 0.0   ;;  %v1137_v3 = vld [vmem:[%s1414_s1 + $0x70] sm:$0xff]   ;;  %vm1198_vm0 = vmmov 0   ;;  %v1139_v5 = vld [vmem:[%s1414_s1 + $0x68] sm:$0xff]   ;;  %s1418_s18 = smov (!%p165_p3, %s164_s18), 35 }
   0xc   : > { %v1136_v1 = vld [vmem:[%s1414_s1 + $0x38] sm:$0xff]   ;;  %1084 = vmatprep.subr.bf16.mxu1 %v1197_v2  ;;  %1003 = vmatprep.subr.bf16.mxu0 %v1135_v0  ;;  %v1138_v4 = vld [vmem:[%s1414_s1 + $0x30] sm:$0xff]   ;;  %v1140_v6 = vld [vmem:[%s1414_s1 + $0x28] sm:$0xff]   ;;  %s1124_s6 = smul.u32 12, %s1418_s18  ;;  %vm500_vm1 = vcmask 261120   ;;  %s909_s5 = sshll.u32 %s1418_s18, 2 }
   0xd   : > { %1004 = vmatpush3.bf16.msra.mxu0 %v1136_v1  ;;  %1088 = vmatprep.mubr.msk.bf16.mxu1 %vm1198_vm0, %v1197_v2  ;;  %v1141_v7 = vld [vmem:[%s1414_s1 + $0x60] sm:$0xff]   ;;  %v1143_v9 = vld [vmem:[%s1414_s1 + $0x58] sm:$0xff]   ;;  %v1149_v10 = vld [vmem:[%s1414_s1 + $0x88] sm:$0xff]   ;;  %s1356_s8 = scalar_lea.vmem %s1416_s3, %s909_s5  ;;  %vm828_vm2 = vcmask 519168  }
   0xe   : > { %1005 = vmatprep.subr.bf16.mxu0 %v1137_v3  ;;  %v1142_v8 = vld [vmem:[%s1414_s1 + $0x20] sm:$0xff]   ;;  %v1144_v11 = vld [vmem:[%s1414_s1 + $0x18] sm:$0xff]   ;;  %v1145_v12 = vld [vmem:[%s1414_s1 + $0x50] sm:$0xff]   ;;  %1085 = vmatpush3.bf16.msra.mxu1 %v1149_v10  ;;  %s1272_s16 = scalar_lea.vmem %s1413_s0, %s1124_s6 }
   0xf   : > { %v1146_v13 = vld [vmem:[%s1414_s1 + $0x10] sm:$0xff]   ;;  %1086 = vmatprep.subr.bf16.mxu1 %v1197_v2  ;;  %v1152_v14 = vld [vmem:[%s1414_s1 + $0x80] sm:$0xff]   ;;  %v1147_v15 = vld [vmem:[%s1414_s1 + $0x48] sm:$0xff]  }
  0x10   : > { %v1155_v16 = vld [vmem:[%s1272_s16 + $0x4] ss:$12 sps:$4 sm:$0xff]   ;;  %v1156_v17 = vld [vmem:[%s1272_s16 + $0x8] ss:$12 sps:$4 sm:$0xff]   ;;  %v1160_v21 = vld [vmem:[%s1272_s16 + $0x20] ss:$12 sps:$4 sm:$0xff]  }
  0x11   : > { %1006 = vmatpush3.bf16.msra.mxu0 %v1138_v4  ;;  %560 = vmatprep.mubr.bf16.mxu0 %v1155_v16  ;;  %v1148_v18 = vld [vmem:[%s1414_s1 + $0x8] sm:$0xff]   ;;  %v1150_v19 = vld [vmem:[%s1414_s1 + $0x40] sm:$0xff]   ;;  %v1168_v27 = vld [vmem:[%s1272_s16 + $0x50] ss:$12 sps:$4 sm:$0xff]  }
  0x12   : > { %1007 = vmatprep.subr.bf16.mxu0 %v1139_v5  ;;  %1087 = vmatpush3.bf16.msra.mxu1 %v1152_v14  ;;  %v1151_v20 = vld [vmem:[%s1414_s1] sm:$0xff]   ;;  %v1157_v23 = vld [vmem:[%s1272_s16 + $0x1c] ss:$12 sps:$4 sm:$0xff]   ;;  %v1165_v29 = vld [vmem:[%s1272_s16 + $0x4c] ss:$12 sps:$4 sm:$0xff]  }
  0x13   : > { %v1153_v22 = vld [vmem:[%s1272_s16] ss:$12 sps:$4 sm:$0xff]   ;;  %v1164_v24 = vld [vmem:[%s1272_s16 + $0x38] ss:$12 sps:$4 sm:$0xff]   ;;  %v1163_v28 = vld [vmem:[%s1272_s16 + $0x30] ss:$12 sps:$4 sm:$0xff]  }
  0x14   : > { %v1159_v25 = vld [vmem:[%s1272_s16 + $0x18] ss:$12 sps:$4 sm:$0xff]   ;;  %v1161_v26 = vld [vmem:[%s1272_s16 + $0x34] ss:$12 sps:$4 sm:$0xff]   ;;  %v1173_v35 = vld [vmem:[%s1272_s16 + $0x7c] ss:$12 sps:$4 sm:$0xff]  }
  0x15   : > { %1008 = vmatpush3.bf16.msra.mxu0 %v1140_v6  ;;  %1089 = vmatmul.mubr.msk.bf16.vlgmr.msra.gmra.mxu1 %vm500_vm1, %v1156_v17  ;;  %v1172_v30 = vld [vmem:[%s1272_s16 + $0x68] ss:$12 sps:$4 sm:$0xff]   ;;  %v1169_v32 = vld [vmem:[%s1272_s16 + $0x64] ss:$12 sps:$4 sm:$0xff]   ;;  %v1176_v33 = vld [vmem:[%s1272_s16 + $0x80] ss:$12 sps:$4 sm:$0xff]  }
  0x16   : > { %1009 = vmatprep.subr.bf16.mxu0 %v1141_v7  ;;  %1092 = vmatprep.mubr.msk.bf16.mxu1 %vm1198_vm0, %v1197_v2  ;;  %v1167_v31 = vld [vmem:[%s1272_s16 + $0x48] ss:$12 sps:$4 sm:$0xff]   ;;  %v1171_v34 = vld [vmem:[%s1272_s16 + $0x60] ss:$12 sps:$4 sm:$0xff]   ;;  %v1180_v36 = vld [vmem:[%s1272_s16 + $0x98] ss:$12 sps:$4 sm:$0xff]  }
  0x17   : > { %v1175_v37 = vld [vmem:[%s1272_s16 + $0x78] ss:$12 sps:$4 sm:$0xff]   ;;  %v1177_v38 = vld [vmem:[%s1272_s16 + $0x94] ss:$12 sps:$4 sm:$0xff]   ;;  %v1184_v39 = vld [vmem:[%s1272_s16 + $0xb0] ss:$12 sps:$4 sm:$0xff]  }
  0x18   : > { %v1179_v40 = vld [vmem:[%s1272_s16 + $0x90] ss:$12 sps:$4 sm:$0xff]   ;;  %v1181_v41 = vld [vmem:[%s1272_s16 + $0xac] ss:$12 sps:$4 sm:$0xff]   ;;  %v1188_v42 = vld [vmem:[%s1272_s16 + $0xc8] ss:$12 sps:$4 sm:$0xff]  }
  0x19   : > { %1010 = vmatpush3.bf16.msra.mxu0 %v1142_v8  ;;  %v1183_v43 = vld [vmem:[%s1272_s16 + $0xa8] ss:$12 sps:$4 sm:$0xff]   ;;  %v1185_v44 = vld [vmem:[%s1272_s16 + $0xc4] ss:$12 sps:$4 sm:$0xff]   ;;  %v1187_v45 = vld [vmem:[%s1272_s16 + $0xc0] ss:$12 sps:$4 sm:$0xff]  }
  0x1a   : > { %1011 = vmatprep.subr.bf16.mxu0 %v1143_v9  ;;  %v1348_v54 = vld [vmem:[%s1415_s2] ss:$0 sm:$0xff] }
  0x1d   : > { %1012 = vmatpush3.bf16.msra.mxu0 %v1144_v11  ;;  %1093 = vmatmul.mubr.msk.bf16.gmra.mxu1 %vm500_vm1, %v1160_v21 }
  0x1e   : > { %1013 = vmatprep.subr.bf16.mxu0 %v1145_v12  ;;  %1096 = vmatprep.mubr.msk.bf16.mxu1 %vm1198_vm0, %v1197_v2 }
  0x21   : > { %1014 = vmatpush3.bf16.msra.mxu0 %v1146_v13 }
  0x22   : > { %1015 = vmatprep.subr.bf16.mxu0 %v1147_v15 }
  0x25   : > { %1016 = vmatpush3.bf16.msra.mxu0 %v1148_v18  ;;  %1097 = vmatmul.mubr.msk.bf16.gmra.mxu1 %vm500_vm1, %v1164_v24 }
  0x26   : > { %1017 = vmatprep.subr.bf16.mxu0 %v1150_v19  ;;  %1100 = vmatprep.mubr.msk.bf16.mxu1 %vm1198_vm0, %v1197_v2 }
  0x29   : > { %1018 = vmatpush3.bf16.msra.mxu0 %v1151_v20 }
  0x2c   : > { %561 = vmatmul.mubr.bf16.vlgmr.msra.gmra.mxu0 %v1153_v22 }
  0x2d   : > { %568 = vmatprep.mubr.bf16.mxu0 %v1157_v23  ;;  %1101 = vmatmul.mubr.msk.bf16.gmra.mxu1 %vm500_vm1, %v1168_v27 }
  0x2e   : > { %1104 = vmatprep.mubr.msk.bf16.mxu1 %vm1198_vm0, %v1197_v2 }
  0x34   : > { %569 = vmatmul.mubr.bf16.gmra.mxu0 %v1159_v25 }
  0x35   : > { %576 = vmatprep.mubr.bf16.mxu0 %v1161_v26  ;;  %1105 = vmatmul.mubr.msk.bf16.gmra.mxu1 %vm500_vm1, %v1172_v30 }
  0x36   : > { %1108 = vmatprep.mubr.msk.bf16.mxu1 %vm1198_vm0, %v1197_v2 }
  0x3c   : > { %577 = vmatmul.mubr.bf16.gmra.mxu0 %v1163_v28 }
  0x3d   : > { %584 = vmatprep.mubr.bf16.mxu0 %v1165_v29  ;;  %1109 = vmatmul.mubr.msk.bf16.gmra.mxu1 %vm500_vm1, %v1176_v33 }
  0x3e   : > { %1112 = vmatprep.mubr.msk.bf16.mxu1 %vm1198_vm0, %v1197_v2 }
  0x44   : > { %585 = vmatmul.mubr.bf16.gmra.mxu0 %v1167_v31 }
  0x45   : > { %592 = vmatprep.mubr.bf16.mxu0 %v1169_v32  ;;  %1113 = vmatmul.mubr.msk.bf16.gmra.mxu1 %vm500_vm1, %v1180_v36 }
  0x46   : > { %1116 = vmatprep.mubr.msk.bf16.mxu1 %vm1198_vm0, %v1197_v2 }
  0x4c   : > { %593 = vmatmul.mubr.bf16.gmra.mxu0 %v1171_v34 }
  0x4d   : > { %600 = vmatprep.mubr.bf16.mxu0 %v1173_v35  ;;  %1117 = vmatmul.mubr.msk.bf16.gmra.mxu1 %vm500_vm1, %v1184_v39 }
  0x4e   : > { %1120 = vmatprep.mubr.msk.bf16.mxu1 %vm1198_vm0, %v1197_v2 }
  0x54   : > { %601 = vmatmul.mubr.bf16.gmra.mxu0 %v1175_v37 }
  0x55   : > { %608 = vmatprep.mubr.bf16.mxu0 %v1177_v38  ;;  %1121 = vmatmul.mubr.msk.bf16.gmra.mxu1 %vm500_vm1, %v1188_v42 }
  0x5c   : > { %609 = vmatmul.mubr.bf16.gmra.mxu0 %v1179_v40 }
  0x5d   : > { %616 = vmatprep.mubr.bf16.mxu0 %v1181_v41 }
  0x64   : > { %617 = vmatmul.mubr.bf16.gmra.mxu0 %v1183_v43 }
  0x65   : > { %624 = vmatprep.mubr.bf16.mxu0 %v1185_v44 }
  0x6c   : > { %625 = vmatmul.mubr.bf16.gmra.mxu0 %v1187_v45 }
  0xd5   : > { %v667_v46 = vpop.f32.mrf.mxu1 }
  0xd7   : > { %v1090_v47 = vpop.f32.mrf.mxu1 }
  0xd9   : > { %v670_v48 = vpop.f32.mrf.mxu1 }
  0xdb   : > { %v1091_v49 = vpop.f32.mrf.mxu1 }
  0xdd   : > { %v675_v50 = vpop.f32.mrf.mxu1 }
  0xdf   : > { %v1094_v51 = vpop.f32.mrf.mxu1 }
  0xe1   : > { %v678_v53 = vpop.f32.mrf.mxu1 }
  0xe3   : > { %v1095_v57 = vpop.f32.mrf.mxu1 }
  0xe5   : > { %v683_v60 = vpop.f32.mrf.mxu1 }
  0xe7   : > { %v1098_v0 = vpop.f32.mrf.mxu1 }
  0xe9   : > { %v686_v4 = vpop.f32.mrf.mxu1 }
  0xeb   : > { %v1099_v9 = vpop.f32.mrf.mxu1 }
  0xec   : > { %v1019_v52 = vpop.f32.mrf.mxu0 }
  0xed   : > { %v691_v13 = vpop.f32.mrf.mxu1 }
  0xee   : > { %v1020_v55 = vpop.f32.mrf.mxu0 }
  0xef   : > { %v1021_v56 = vadd.f32 %v1020_v55, %v1019_v52  ;;  %v1102_v18 = vpop.f32.mrf.mxu1 }
  0xf0   : > { %v1022_v58 = vpop.f32.mrf.mxu0 }
  0xf1   : > { %v563_v59 = vadd.f32 %v1021_v56, %v1348_v54  ;;  %v694_v22 = vpop.f32.mrf.mxu1 }
  0xf2   : > { %v1023_v61 = vpop.f32.mrf.mxu0 }
  0xf3   : > { %v668_v62 = vadd.f32 %v667_v46, %v563_v59  ;;  %v1024_v63 = vadd.f32 %v1023_v61, %v1022_v58  ;;  %v1103_v27 = vpop.f32.mrf.mxu1 }
  0xf4   : > { %v1025_v1 = vpop.f32.mrf.mxu0 }
  0xf5   : > { %v738_v2 = vmax.f32 %v668_v62, 0.0  ;;  %v566_v3 = vadd.f32 %v1024_v63, %v1348_v54  ;;  %v699_v31 = vpop.f32.mrf.mxu1 }
  0xf6   : > { %v1026_v5 = vpop.f32.mrf.mxu0 }
  0xf7   : > { %v985_v6 = vpack.c.bf16 %v738_v2, %v738_v2  ;;  %v671_v7 = vadd.f32 %v670_v48, %v566_v3  ;;  %v1027_v8 = vadd.f32 %v1026_v5, %v1025_v1  ;;  %v1106_v36 = vpop.f32.mrf.mxu1 }
  0xf8   : > { %v1028_v10 = vpop.f32.mrf.mxu0 }
  0xf9   : > { %829 = vst.msk [vmem:[%s1356_s8] sm:$0xf] %vm828_vm2, %v985_v6  ;;  %v739_v11 = vmax.f32 %v671_v7, 0.0  ;;  %v571_v12 = vadd.f32 %v1027_v8, %v1348_v54  ;;  %v702_v40 = vpop.f32.mrf.mxu1 }
  0xfa   : > { %v1029_v14 = vpop.f32.mrf.mxu0 }
  0xfb   : > { %v986_v15 = vpack.c.bf16 %v739_v11, %v739_v11  ;;  %v676_v16 = vadd.f32 %v675_v50, %v571_v12  ;;  %v1030_v17 = vadd.f32 %v1029_v14, %v1028_v10  ;;  %v1107_v45 = vpop.f32.mrf.mxu1 }
  0xfc   : > { %v1031_v19 = vpop.f32.mrf.mxu0 }
  0xfd   : > { %830 = vst.msk [vmem:[%s1356_s8 + $0x4] sm:$0xf] %vm828_vm2, %v986_v15  ;;  %v740_v20 = vmax.f32 %v676_v16, 0.0  ;;  %v574_v21 = vadd.f32 %v1030_v17, %v1348_v54  ;;  %v707_v49 = vpop.f32.mrf.mxu1 }
  0xfe   : > { %v1032_v23 = vpop.f32.mrf.mxu0 }
  0xff   : > { %v987_v24 = vpack.c.bf16 %v740_v20, %v740_v20  ;;  %v679_v25 = vadd.f32 %v678_v53, %v574_v21  ;;  %v1033_v26 = vadd.f32 %v1032_v23, %v1031_v19  ;;  %v1110_v55 = vpop.f32.mrf.mxu1 }
 0x100   : > { %v1034_v28 = vpop.f32.mrf.mxu0 }
 0x101   : > { %831 = vst.msk [vmem:[%s1356_s8 + $0x8] sm:$0xf] %vm828_vm2, %v987_v24  ;;  %v741_v29 = vmax.f32 %v679_v25, 0.0  ;;  %v579_v30 = vadd.f32 %v1033_v26, %v1348_v54  ;;  %v710_v59 = vpop.f32.mrf.mxu1 }
 0x102   : > { %v1035_v32 = vpop.f32.mrf.mxu0 }
 0x103   : > { %v988_v33 = vpack.c.bf16 %v741_v29, %v741_v29  ;;  %v684_v34 = vadd.f32 %v683_v60, %v579_v30  ;;  %v1036_v35 = vadd.f32 %v1035_v32, %v1034_v28  ;;  %v1111_v0 = vpop.f32.mrf.mxu1 }
 0x104   : > { %v1037_v37 = vpop.f32.mrf.mxu0 }
 0x105   : > { %832 = vst.msk [vmem:[%s1356_s8 + $0xc] sm:$0xf] %vm828_vm2, %v988_v33  ;;  %v742_v38 = vmax.f32 %v684_v34, 0.0  ;;  %v582_v39 = vadd.f32 %v1036_v35, %v1348_v54 }
 0x106   : > { %v1038_v41 = vpop.f32.mrf.mxu0 }
 0x107   : > { %v989_v42 = vpack.c.bf16 %v742_v38, %v742_v38  ;;  %v687_v43 = vadd.f32 %v686_v4, %v582_v39  ;;  %v1039_v44 = vadd.f32 %v1038_v41, %v1037_v37  ;;  %v715_v4 = vpop.f32.mrf.mxu1 }
 0x108   : > { %v1040_v46 = vpop.f32.mrf.mxu0 }
 0x109   : > { %833 = vst.msk [vmem:[%s1356_s8 + $0x10] sm:$0xf] %vm828_vm2, %v989_v42  ;;  %v743_v47 = vmax.f32 %v687_v43, 0.0  ;;  %v587_v48 = vadd.f32 %v1039_v44, %v1348_v54  ;;  %v1114_v9 = vpop.f32.mrf.mxu1 }
 0x10a   : > { %v1041_v50 = vpop.f32.mrf.mxu0 }
 0x10b   : > { %v990_v51 = vpack.c.bf16 %v743_v47, %v743_v47  ;;  %v692_v52 = vadd.f32 %v691_v13, %v587_v48  ;;  %v1042_v53 = vadd.f32 %v1041_v50, %v1040_v46  ;;  %v718_v13 = vpop.f32.mrf.mxu1 }
 0x10c   : > { %v1043_v56 = vpop.f32.mrf.mxu0 }
 0x10d   : > { %834 = vst.msk [vmem:[%s1356_s8 + $0x14] sm:$0xf] %vm828_vm2, %v990_v51  ;;  %v744_v57 = vmax.f32 %v692_v52, 0.0  ;;  %v590_v58 = vadd.f32 %v1042_v53, %v1348_v54  ;;  %v1115_v18 = vpop.f32.mrf.mxu1 }
 0x10e   : > { %v1044_v60 = vpop.f32.mrf.mxu0 }
 0x10f   : > { %v991_v61 = vpack.c.bf16 %v744_v57, %v744_v57  ;;  %v695_v62 = vadd.f32 %v694_v22, %v590_v58  ;;  %v1045_v63 = vadd.f32 %v1044_v60, %v1043_v56  ;;  %v723_v22 = vpop.f32.mrf.mxu1 }
 0x110   : > { %v1046_v1 = vpop.f32.mrf.mxu0 }
 0x111   : > { %835 = vst.msk [vmem:[%s1356_s8 + $0x18] sm:$0xf] %vm828_vm2, %v991_v61  ;;  %v745_v2 = vmax.f32 %v695_v62, 0.0  ;;  %v595_v3 = vadd.f32 %v1045_v63, %v1348_v54  ;;  %v1118_v27 = vpop.f32.mrf.mxu1 }
 0x112   : > { %v1047_v5 = vpop.f32.mrf.mxu0 }
 0x113   : > { %v992_v6 = vpack.c.bf16 %v745_v2, %v745_v2  ;;  %v700_v7 = vadd.f32 %v699_v31, %v595_v3  ;;  %v1048_v8 = vadd.f32 %v1047_v5, %v1046_v1  ;;  %v726_v31 = vpop.f32.mrf.mxu1 }
 0x114   : > { %v1049_v10 = vpop.f32.mrf.mxu0 }
 0x115   : > { %836 = vst.msk [vmem:[%s1356_s8 + $0x1c] sm:$0xf] %vm828_vm2, %v992_v6  ;;  %v746_v11 = vmax.f32 %v700_v7, 0.0  ;;  %v598_v12 = vadd.f32 %v1048_v8, %v1348_v54  ;;  %v1119_v36 = vpop.f32.mrf.mxu1 }
 0x116   : > { %v1050_v14 = vpop.f32.mrf.mxu0 }
 0x117   : > { %v993_v15 = vpack.c.bf16 %v746_v11, %v746_v11  ;;  %v703_v16 = vadd.f32 %v702_v40, %v598_v12  ;;  %v1051_v17 = vadd.f32 %v1050_v14, %v1049_v10  ;;  %v731_v40 = vpop.f32.mrf.mxu1 }
 0x118   : > { %v1052_v19 = vpop.f32.mrf.mxu0 }
 0x119   : > { %837 = vst.msk [vmem:[%s1356_s8 + $0x20] sm:$0xf] %vm828_vm2, %v993_v15  ;;  %v747_v20 = vmax.f32 %v703_v16, 0.0  ;;  %v603_v21 = vadd.f32 %v1051_v17, %v1348_v54  ;;  %v1122_v45 = vpop.f32.mrf.mxu1 }
 0x11a   : > { %v1053_v23 = vpop.f32.mrf.mxu0 }
 0x11b   : > { %v994_v24 = vpack.c.bf16 %v747_v20, %v747_v20  ;;  %v708_v25 = vadd.f32 %v707_v49, %v603_v21  ;;  %v1054_v26 = vadd.f32 %v1053_v23, %v1052_v19  ;;  %v734_v49 = vpop.f32.mrf.mxu1 }
 0x11c   : > { %v1055_v28 = vpop.f32.mrf.mxu0 }
 0x11d   : > { %838 = vst.msk [vmem:[%s1356_s8 + $0x24] sm:$0xf] %vm828_vm2, %v994_v24  ;;  %v748_v29 = vmax.f32 %v708_v25, 0.0  ;;  %v606_v30 = vadd.f32 %v1054_v26, %v1348_v54  ;;  %v1123_v55 = vpop.f32.mrf.mxu1 }
 0x11e   : > { %v1056_v32 = vpop.f32.mrf.mxu0 }
 0x11f   : > { %v995_v33 = vpack.c.bf16 %v748_v29, %v748_v29  ;;  %v711_v34 = vadd.f32 %v710_v59, %v606_v30  ;;  %v1057_v35 = vadd.f32 %v1056_v32, %v1055_v28 }
 0x120   : > { %v1058_v37 = vpop.f32.mrf.mxu0 }
 0x121   : > { %839 = vst.msk [vmem:[%s1356_s8 + $0x28] sm:$0xf] %vm828_vm2, %v995_v33  ;;  %v749_v38 = vmax.f32 %v711_v34, 0.0  ;;  %v611_v39 = vadd.f32 %v1057_v35, %v1348_v54 }
 0x122   : > { %v1059_v41 = vpop.f32.mrf.mxu0 }
 0x123   : > { %v996_v42 = vpack.c.bf16 %v749_v38, %v749_v38  ;;  %v716_v43 = vadd.f32 %v715_v4, %v611_v39  ;;  %v1060_v44 = vadd.f32 %v1059_v41, %v1058_v37 }
 0x124   : > { %v1061_v46 = vpop.f32.mrf.mxu0 }
 0x125   : > { %840 = vst.msk [vmem:[%s1356_s8 + $0x2c] sm:$0xf] %vm828_vm2, %v996_v42  ;;  %v750_v47 = vmax.f32 %v716_v43, 0.0  ;;  %v614_v48 = vadd.f32 %v1060_v44, %v1348_v54 }
 0x126   : > { %v1062_v50 = vpop.f32.mrf.mxu0 }
 0x127   : > { %v997_v51 = vpack.c.bf16 %v750_v47, %v750_v47  ;;  %v719_v52 = vadd.f32 %v718_v13, %v614_v48  ;;  %v1063_v53 = vadd.f32 %v1062_v50, %v1061_v46 }
 0x128   : > { %v1064_v56 = vpop.f32.mrf.mxu0 }
 0x129   : > { %841 = vst.msk [vmem:[%s1356_s8 + $0x30] sm:$0xf] %vm828_vm2, %v997_v51  ;;  %v751_v57 = vmax.f32 %v719_v52, 0.0  ;;  %v619_v58 = vadd.f32 %v1063_v53, %v1348_v54 }
 0x12a   : > { %v1065_v59 = vpop.f32.mrf.mxu0 }
 0x12b   : > { %v998_v60 = vpack.c.bf16 %v751_v57, %v751_v57  ;;  %v724_v61 = vadd.f32 %v723_v22, %v619_v58  ;;  %v1066_v62 = vadd.f32 %v1065_v59, %v1064_v56 }
 0x12c   : > { %v1067_v63 = vpop.f32.mrf.mxu0 }
 0x12d   : > { %842 = vst.msk [vmem:[%s1356_s8 + $0x34] sm:$0xf] %vm828_vm2, %v998_v60  ;;  %v752_v0 = vmax.f32 %v724_v61, 0.0  ;;  %v622_v1 = vadd.f32 %v1066_v62, %v1348_v54 }
 0x12e   : > { %v1068_v2 = vpop.f32.mrf.mxu0 }
 0x12f   : > { %v999_v3 = vpack.c.bf16 %v752_v0, %v752_v0  ;;  %v727_v4 = vadd.f32 %v726_v31, %v622_v1  ;;  %v1069_v5 = vadd.f32 %v1068_v2, %v1067_v63 }
 0x130   : > { %v1070_v6 = vpop.f32.mrf.mxu0 }
 0x131   : > { %843 = vst.msk [vmem:[%s1356_s8 + $0x38] sm:$0xf] %vm828_vm2, %v999_v3  ;;  %v753_v7 = vmax.f32 %v727_v4, 0.0  ;;  %v627_v8 = vadd.f32 %v1069_v5, %v1348_v54 }
 0x132   : > { %v1071_v9 = vpop.f32.mrf.mxu0 }
 0x133   : > { %v1000_v10 = vpack.c.bf16 %v753_v7, %v753_v7  ;;  %v732_v11 = vadd.f32 %v731_v40, %v627_v8  ;;  %v1072_v12 = vadd.f32 %v1071_v9, %v1070_v6 }
 0x135   : > { %844 = vst.msk [vmem:[%s1356_s8 + $0x3c] sm:$0xf] %vm828_vm2, %v1000_v10  ;;  %v754_v13 = vmax.f32 %v732_v11, 0.0  ;;  %v630_v14 = vadd.f32 %v1072_v12, %v1348_v54 }
 0x137   : > { %v1001_v15 = vpack.c.bf16 %v754_v13, %v754_v13  ;;  %v735_v16 = vadd.f32 %v734_v49, %v630_v14 }
 0x139   : > { %845 = vst.msk [vmem:[%s1356_s8 + $0x40] sm:$0xf] %vm828_vm2, %v1001_v15  ;;  %v755_v17 = vmax.f32 %v735_v16, 0.0 }
 0x13b   : > { %v1002_v18 = vpack.c.bf16 %v755_v17, %v755_v17 }
 0x13d   : > { %846 = vst.msk [vmem:[%s1356_s8 + $0x44] sm:$0xf] %vm828_vm2, %v1002_v18 }
 0x13e PF: > { %s13_s12 = sadd.s32 1, %s1195_s12  }
 0x13f   : > { %p10_p4 = scmp.ge.s32.totalorder %s13_s12, 4  }
 0x141   :  { %12 = sbr.rel (!%p10_p4) target bundleno = 1 (0x1), region = 62 }

// kernel: network_image_cnn_forward.12
= control target key start
LH: loop header
LB: loop body
LE: loop exit
PB: predicated region body
PF: predicated region fallthrough
CT: control target
= control target key end

     0   :  { %s131_s22 = smov 64   ;;  %vm36_vm0 = vcmask 519168   ;;  %vm38_vm1 = vcmask 517120   ;;  %vm58_vm2 = vcmask 1043968   ;;  %vm60_vm3 = vcmask 1041920   ;;  %s232_s0 = inlined_call_operand.vmem [shape: bf16[12,1536], index: 0, kind: input, shape index: {}]   ;;  %s233_s1 = inlined_call_operand.vmem [shape: bf16[12,384], index: 1, kind: output, shape index: {}]  }
   0x1   :  { %v8_v0 = vld [vmem:[%s232_s0] sm:$0xff]  ;;  %v14_v1 = vld [vmem:[%s232_s0 + $0x18] sm:$0xff]  ;;  %v9_v2 = vld [vmem:[%s232_s0 + $0x8] sm:$0xff] }
   0x2   :  { %v20_v3 = vmax.bf16 %v14_v1, %v8_v0  ;;  %v15_v4 = vld [vmem:[%s232_s0 + $0x20] sm:$0xff]  ;;  %v11_v5 = vld [vmem:[%s232_s0 + $0x30] sm:$0x33]  ;;  %v17_v6 = vld [vmem:[%s232_s0 + $0x48] sm:$0x33] }
   0x3   :  { %v21_v7 = vmax.bf16 %v15_v4, %v9_v2  ;;  %v12_v8 = vld [vmem:[%s232_s0 + $0x38] sm:$0x33]  ;;  %v18_v9 = vld [vmem:[%s232_s0 + $0x50] sm:$0x33]  ;;  %v23_v10 = vmax.bf16 %v17_v6, %v11_v5  ;;  %v16_v13 = vld [vmem:[%s232_s0 + $0x28] sm:$0xff] }
   0x4   :  { %28 = vrot.lane.b32.xlu0 %v20_v3, %s131_s22  ;;  %v24_v11 = vmax.bf16 %v18_v9, %v12_v8  ;;  %v10_v12 = vld [vmem:[%s232_s0 + $0x10] sm:$0xff]  ;;  %v13_v14 = vld [vmem:[%s232_s0 + $0x40] sm:$0x33]  ;;  %v19_v15 = vld [vmem:[%s232_s0 + $0x58] sm:$0x33]  ;;  %v40_v18 = vrot.slane %v20_v3, 4 }
   0x5   :  { %64 = vrot.lane.b32.xlu1 %v21_v7, %s131_s22  ;;  %v22_v16 = vmax.bf16 %v16_v13, %v10_v12  ;;  %v25_v17 = vmax.bf16 %v19_v15, %v13_v14  ;;  %v74_v23 = vrot.slane %v21_v7, 4  ;;  %v41_v27 = vrot.slane %v23_v10, 4 }
   0x6   :  { %v75_v32 = vrot.slane %v24_v11, 4 }
   0x7   :  { %v106_v37 = vrot.slane %v22_v16, 4  ;;  %v107_v40 = vrot.slane %v25_v17, 4 }
   0x8   :  { %30 = vrot.lane.b32.xlu0 %v23_v10, %s131_s22 }
   0x9   :  { %66 = vrot.lane.b32.xlu1 %v24_v11, %s131_s22 }
   0xc   :  { %96 = vrot.lane.b32.xlu0 %v22_v16, %s131_s22 }
   0xd   :  { %98 = vrot.lane.b32.xlu1 %v25_v17, %s131_s22 }
  0x76   :  { %v29_v19 = vpop.permute.xlu0 %28 }
  0x77   :  { %v34_v20 = vmax.bf16 %v29_v19, %v20_v3  ;;  %v44_v21 = vrot.slane %v29_v19, 4  ;;  %v65_v22 = vpop.permute.xlu1 %64 }
  0x78   :  { %v70_v24 = vmax.bf16 %v65_v22, %v21_v7  ;;  %v78_v25 = vrot.slane %v65_v22, 4 }
  0x79   :  { %37 = vst.msk [vmem:[%s233_s1] sm:$0xf] %vm36_vm0, %v34_v20  ;;  %v48_v26 = vmax.bf16 %v44_v21, %v40_v18 }
  0x7a   :  { %72 = vst.msk [vmem:[%s233_s1 + $0x4] sm:$0xf] %vm36_vm0, %v70_v24  ;;  %v31_v28 = vpop.permute.xlu0 %30  ;;  %v82_v29 = vmax.bf16 %v78_v25, %v74_v23 }
  0x7b   :  { %v35_v30 = vmax.bf16 %v31_v28, %v23_v10  ;;  %v45_v31 = vrot.slane %v31_v28, 4  ;;  %52 = vrot.lane.b32.xlu0 %v48_v26, %s131_s22  ;;  %v67_v33 = vpop.permute.xlu1 %66 }
  0x7c   :  { %v71_v34 = vmax.bf16 %v67_v33, %v24_v11  ;;  %v79_v35 = vrot.slane %v67_v33, 4 }
  0x7d   :  { %39 = vst.msk [vmem:[%s233_s1 + $0xc] sm:$0x3] %vm38_vm1, %v35_v30  ;;  %v49_v36 = vmax.bf16 %v45_v31, %v41_v27 }
  0x7e   :  { %73 = vst.msk [vmem:[%s233_s1 + $0x10] sm:$0x3] %vm38_vm1, %v71_v34  ;;  %v97_v38 = vpop.permute.xlu0 %96  ;;  %v83_v39 = vmax.bf16 %v79_v35, %v75_v32 }
  0x7f   :  { %54 = vrot.lane.b32.xlu1 %v49_v36, %s131_s22  ;;  %86 = vrot.lane.b32.xlu0 %v82_v29, %s131_s22  ;;  %v99_v41 = vpop.permute.xlu1 %98  ;;  %v102_v42 = vmax.bf16 %v97_v38, %v22_v16  ;;  %v110_v43 = vrot.slane %v97_v38, 4 }
  0x80   :  { %v103_v44 = vmax.bf16 %v99_v41, %v25_v17  ;;  %v111_v45 = vrot.slane %v99_v41, 4 }
  0x81   :  { %104 = vst.msk [vmem:[%s233_s1 + $0x8] sm:$0xf] %vm36_vm0, %v102_v42  ;;  %v114_v46 = vmax.bf16 %v110_v43, %v106_v37 }
  0x82   :  { %105 = vst.msk [vmem:[%s233_s1 + $0x14] sm:$0x3] %vm38_vm1, %v103_v44  ;;  %v115_v47 = vmax.bf16 %v111_v45, %v107_v40 }
  0x83   :  { %88 = vrot.lane.b32.xlu1 %v83_v39, %s131_s22  ;;  %118 = vrot.lane.b32.xlu0 %v114_v46, %s131_s22 }
  0x87   :  { %120 = vrot.lane.b32.xlu1 %v115_v47, %s131_s22 }
  0xed   :  { %v53_v48 = vpop.permute.xlu0 %52 }
  0xee   :  { %59 = vst.msk [vmem:[%s233_s1] sm:$0xf] %vm58_vm2, %v53_v48 }
  0xf1   :  { %v55_v49 = vpop.permute.xlu1 %54  ;;  %v87_v50 = vpop.permute.xlu0 %86 }
  0xf2   :  { %61 = vst.msk [vmem:[%s233_s1 + $0xc] sm:$0x3] %vm60_vm3, %v55_v49 }
  0xf3   :  { %92 = vst.msk [vmem:[%s233_s1 + $0x4] sm:$0xf] %vm58_vm2, %v87_v50 }
  0xf5   :  { %v89_v51 = vpop.permute.xlu1 %88  ;;  %v119_v52 = vpop.permute.xlu0 %118 }
  0xf6   :  { %93 = vst.msk [vmem:[%s233_s1 + $0x10] sm:$0x3] %vm60_vm3, %v89_v51 }
  0xf7   :  { %124 = vst.msk [vmem:[%s233_s1 + $0x8] sm:$0xf] %vm58_vm2, %v119_v52 }
  0xf9   :  { %v121_v53 = vpop.permute.xlu1 %120 }
  0xfa   :  { %125 = vst.msk [vmem:[%s233_s1 + $0x14] sm:$0x3] %vm60_vm3, %v121_v53 }

// kernel: network_image_cnn_forward.13
= control target key start
LH: loop header
LB: loop body
LE: loop exit
PB: predicated region body
PF: predicated region fallthrough
CT: control target
= control target key end

     0   :  { %vm4990_vm0 = vcmask 80896   ;;  %s8912_s1 = inlined_call_operand.vmem [shape: bf16[2304,512], index: 1, kind: input, shape index: {}]   ;;  %s8913_s0 = inlined_call_operand.vmem [shape: bf16[8,2304], index: 0, kind: input, shape index: {}]   ;;  %s8914_s2 = inlined_call_operand.vmem [shape: f32[1,512], index: 2, kind: input, shape index: {}]   ;;  %s8915_s3 = inlined_call_operand.vmem [shape: bf16[512,256], index: 3, kind: input, shape index: {}]   ;;  %s8916_s5 = inlined_call_operand.vmem [shape: bf16[256,10], index: 5, kind: input, shape index: {}]   ;;  %s8917_s4 = inlined_call_operand.vmem [shape: f32[1,256], index: 4, kind: input, shape index: {}]   ;;  %s8918_s6 = inlined_call_operand.vmem [shape: f32[1,10], index: 6, kind: input, shape index: {}]   ;;  %s8919_s7 = inlined_call_operand.vmem [shape: f32[8,10], index: 7, kind: output, shape index: {}]  }
   0x1   :  { %v5693_v0 = vld [vmem:[%s8912_s1 + $0xe4] ss:$16 sps:$4 sm:$0xff]   ;;  %v5697_v2 = vld [vmem:[%s8912_s1 + $0xe0] ss:$16 sps:$4 sm:$0xff]   ;;  %v28_v48 = vld [vmem:[%s8913_s0 + $0x8] sm:$0xff] }
   0x2   :  { %v5695_v1 = vld [vmem:[%s8912_s1 + $0x2e4] ss:$16 sps:$4 sm:$0xff]   ;;  %3577 = vmatprep.subr.bf16.mxu0 %v5693_v0  ;;  %v5698_v3 = vld [vmem:[%s8912_s1 + $0x2e0] ss:$16 sps:$4 sm:$0xff]   ;;  %v6884_v51 = vcombine.high %v28_v48, %v28_v48 }
   0x3   :  { %3618 = vmatprep.subr.bf16.mxu1 %v5695_v1  ;;  %v5699_v4 = vld [vmem:[%s8912_s1 + $0xc4] ss:$16 sps:$4 sm:$0xff]   ;;  %3578 = vmatpush1.bf16.msra.mxu0 %v5697_v2  ;;  %v5703_v6 = vld [vmem:[%s8912_s1 + $0xc0] ss:$16 sps:$4 sm:$0xff]  }
   0x4   :  { %3619 = vmatpush1.bf16.msra.mxu1 %v5698_v3  ;;  %v5701_v5 = vld [vmem:[%s8912_s1 + $0x2c4] ss:$16 sps:$4 sm:$0xff]   ;;  %3579 = vmatprep.subr.bf16.mxu0 %v5699_v4  ;;  %v5704_v7 = vld [vmem:[%s8912_s1 + $0x2c0] ss:$16 sps:$4 sm:$0xff]  }
   0x5   :  { %3620 = vmatprep.subr.bf16.mxu1 %v5701_v5  ;;  %v5705_v8 = vld [vmem:[%s8912_s1 + $0xa4] ss:$16 sps:$4 sm:$0xff]   ;;  %v5709_v10 = vld [vmem:[%s8912_s1 + $0xa0] ss:$16 sps:$4 sm:$0xff]   ;;  %3650 = vmatprep.mubr.bf16.mxu1 %v6884_v51 }
   0x6   :  { %v5707_v9 = vld [vmem:[%s8912_s1 + $0x2a4] ss:$16 sps:$4 sm:$0xff]   ;;  %v5710_v11 = vld [vmem:[%s8912_s1 + $0x2a0] ss:$16 sps:$4 sm:$0xff]  }
   0x7   :  { %3580 = vmatpush1.bf16.msra.mxu0 %v5703_v6  ;;  %v5711_v12 = vld [vmem:[%s8912_s1 + $0x84] ss:$16 sps:$4 sm:$0xff]   ;;  %v5715_v14 = vld [vmem:[%s8912_s1 + $0x80] ss:$16 sps:$4 sm:$0xff]  }
   0x8   :  { %3621 = vmatpush1.bf16.msra.mxu1 %v5704_v7  ;;  %3581 = vmatprep.subr.bf16.mxu0 %v5705_v8  ;;  %v5713_v13 = vld [vmem:[%s8912_s1 + $0x284] ss:$16 sps:$4 sm:$0xff]   ;;  %v5716_v15 = vld [vmem:[%s8912_s1 + $0x280] ss:$16 sps:$4 sm:$0xff]   ;;  %v6944_v7 = vcombine.low %v28_v48, %v28_v48 }
   0x9   :  { %3622 = vmatprep.subr.bf16.mxu1 %v5707_v9  ;;  %v5717_v16 = vld [vmem:[%s8912_s1 + $0x64] ss:$16 sps:$4 sm:$0xff]   ;;  %v5721_v18 = vld [vmem:[%s8912_s1 + $0x60] ss:$16 sps:$4 sm:$0xff]  }
   0xa   :  { %v5719_v17 = vld [vmem:[%s8912_s1 + $0x264] ss:$16 sps:$4 sm:$0xff]   ;;  %v5722_v19 = vld [vmem:[%s8912_s1 + $0x260] ss:$16 sps:$4 sm:$0xff]  }
   0xb   :  { %3582 = vmatpush1.bf16.msra.mxu0 %v5709_v10  ;;  %v5723_v20 = vld [vmem:[%s8912_s1 + $0x44] ss:$16 sps:$4 sm:$0xff]   ;;  %v5727_v22 = vld [vmem:[%s8912_s1 + $0x40] ss:$16 sps:$4 sm:$0xff]  }
   0xc   :  { %3623 = vmatpush1.bf16.msra.mxu1 %v5710_v11  ;;  %3583 = vmatprep.subr.bf16.mxu0 %v5711_v12  ;;  %v5725_v21 = vld [vmem:[%s8912_s1 + $0x244] ss:$16 sps:$4 sm:$0xff]   ;;  %v5728_v23 = vld [vmem:[%s8912_s1 + $0x240] ss:$16 sps:$4 sm:$0xff]  }
   0xd   :  { %3624 = vmatprep.subr.bf16.mxu1 %v5713_v13  ;;  %v5729_v24 = vld [vmem:[%s8912_s1 + $0x24] ss:$16 sps:$4 sm:$0xff]   ;;  %v5733_v26 = vld [vmem:[%s8912_s1 + $0x20] ss:$16 sps:$4 sm:$0xff]  }
   0xe   :  { %v5731_v25 = vld [vmem:[%s8912_s1 + $0x224] ss:$16 sps:$4 sm:$0xff]   ;;  %v5734_v27 = vld [vmem:[%s8912_s1 + $0x220] ss:$16 sps:$4 sm:$0xff]  }
   0xf   :  { %3584 = vmatpush1.bf16.msra.mxu0 %v5715_v14  ;;  %v5735_v28 = vld [vmem:[%s8912_s1 + $0x4] ss:$16 sps:$4 sm:$0xff]   ;;  %v5739_v30 = vld [vmem:[%s8912_s1] ss:$16 sps:$4 sm:$0xff]  }
  0x10   :  { %3625 = vmatpush1.bf16.msra.mxu1 %v5716_v15  ;;  %3585 = vmatprep.subr.bf16.mxu0 %v5717_v16  ;;  %v5737_v29 = vld [vmem:[%s8912_s1 + $0x204] ss:$16 sps:$4 sm:$0xff]   ;;  %v5740_v31 = vld [vmem:[%s8912_s1 + $0x200] ss:$16 sps:$4 sm:$0xff]  }
  0x11   :  { %3626 = vmatprep.subr.bf16.mxu1 %v5719_v17  ;;  %v5741_v32 = vld [vmem:[%s8912_s1 + $0x1e4] ss:$16 sps:$4 sm:$0xff]   ;;  %v5745_v34 = vld [vmem:[%s8912_s1 + $0x1e0] ss:$16 sps:$4 sm:$0xff]  }
  0x12   :  { %v5743_v33 = vld [vmem:[%s8912_s1 + $0x3e4] ss:$16 sps:$4 sm:$0xff]   ;;  %v5746_v35 = vld [vmem:[%s8912_s1 + $0x3e0] ss:$16 sps:$4 sm:$0xff]  }
  0x13   :  { %3586 = vmatpush1.bf16.msra.mxu0 %v5721_v18  ;;  %v5747_v36 = vld [vmem:[%s8912_s1 + $0x1c4] ss:$16 sps:$4 sm:$0xff]   ;;  %v5751_v38 = vld [vmem:[%s8912_s1 + $0x1c0] ss:$16 sps:$4 sm:$0xff]  }
  0x14   :  { %3627 = vmatpush1.bf16.msra.mxu1 %v5722_v19  ;;  %3587 = vmatprep.subr.bf16.mxu0 %v5723_v20  ;;  %v5749_v37 = vld [vmem:[%s8912_s1 + $0x3c4] ss:$16 sps:$4 sm:$0xff]   ;;  %v5752_v39 = vld [vmem:[%s8912_s1 + $0x3c0] ss:$16 sps:$4 sm:$0xff]  }
  0x15   :  { %3628 = vmatprep.subr.bf16.mxu1 %v5725_v21  ;;  %v5753_v40 = vld [vmem:[%s8912_s1 + $0x1a4] ss:$16 sps:$4 sm:$0xff]   ;;  %v5757_v42 = vld [vmem:[%s8912_s1 + $0x1a0] ss:$16 sps:$4 sm:$0xff]  }
  0x16   :  { %v5755_v41 = vld [vmem:[%s8912_s1 + $0x3a4] ss:$16 sps:$4 sm:$0xff]   ;;  %v5758_v43 = vld [vmem:[%s8912_s1 + $0x3a0] ss:$16 sps:$4 sm:$0xff]  }
  0x17   :  { %3588 = vmatpush1.bf16.msra.mxu0 %v5727_v22  ;;  %v5759_v44 = vld [vmem:[%s8912_s1 + $0x184] ss:$16 sps:$4 sm:$0xff]   ;;  %v5763_v49 = vld [vmem:[%s8912_s1 + $0x180] ss:$16 sps:$4 sm:$0xff]  }
  0x18   :  { %3629 = vmatpush1.bf16.msra.mxu1 %v5728_v23  ;;  %3589 = vmatprep.subr.bf16.mxu0 %v5729_v24  ;;  %v5761_v45 = vld [vmem:[%s8912_s1 + $0x384] ss:$16 sps:$4 sm:$0xff]   ;;  %v5764_v50 = vld [vmem:[%s8912_s1 + $0x380] ss:$16 sps:$4 sm:$0xff]  }
  0x19   :  { %3630 = vmatprep.subr.bf16.mxu1 %v5731_v25  ;;  %v27_v46 = vld [vmem:[%s8913_s0] sm:$0xff] }
  0x1a   :  { %v6873_v47 = vcombine.high %v27_v46, %v27_v46  ;;  %v5765_v52 = vld [vmem:[%s8912_s1 + $0x164] ss:$16 sps:$4 sm:$0xff]   ;;  %v5769_v54 = vld [vmem:[%s8912_s1 + $0x160] ss:$16 sps:$4 sm:$0xff]   ;;  %v6942_v6 = vcombine.low %v27_v46, %v27_v46 }
  0x1b   :  { %3590 = vmatpush1.bf16.msra.mxu0 %v5733_v26  ;;  %v5767_v53 = vld [vmem:[%s8912_s1 + $0x364] ss:$16 sps:$4 sm:$0xff]   ;;  %v5770_v55 = vld [vmem:[%s8912_s1 + $0x360] ss:$16 sps:$4 sm:$0xff]  }
  0x1c   :  { %3631 = vmatpush1.bf16.msra.mxu1 %v5734_v27  ;;  %3591 = vmatprep.subr.bf16.mxu0 %v5735_v28  ;;  %v5771_v56 = vld [vmem:[%s8912_s1 + $0x144] ss:$16 sps:$4 sm:$0xff]   ;;  %v5775_v58 = vld [vmem:[%s8912_s1 + $0x140] ss:$16 sps:$4 sm:$0xff]  }
  0x1d   :  { %3632 = vmatprep.subr.bf16.mxu1 %v5737_v29  ;;  %3609 = vmatprep.mubr.bf16.mxu0 %v6873_v47  ;;  %v5773_v57 = vld [vmem:[%s8912_s1 + $0x344] ss:$16 sps:$4 sm:$0xff]   ;;  %v5776_v59 = vld [vmem:[%s8912_s1 + $0x340] ss:$16 sps:$4 sm:$0xff]  }
  0x1e   :  { %v5777_v60 = vld [vmem:[%s8912_s1 + $0x124] ss:$16 sps:$4 sm:$0xff]   ;;  %v5781_v62 = vld [vmem:[%s8912_s1 + $0x120] ss:$16 sps:$4 sm:$0xff]  }
  0x1f   :  { %3592 = vmatpush1.bf16.msra.mxu0 %v5739_v30  ;;  %v5779_v61 = vld [vmem:[%s8912_s1 + $0x324] ss:$16 sps:$4 sm:$0xff]   ;;  %v5782_v63 = vld [vmem:[%s8912_s1 + $0x320] ss:$16 sps:$4 sm:$0xff]  }
  0x20   :  { %3633 = vmatpush1.bf16.msra.mxu1 %v5740_v31  ;;  %3593 = vmatprep.subr.bf16.mxu0 %v5741_v32  ;;  %v5783_v0 = vld [vmem:[%s8912_s1 + $0x104] ss:$16 sps:$4 sm:$0xff]   ;;  %v5787_v2 = vld [vmem:[%s8912_s1 + $0x100] ss:$16 sps:$4 sm:$0xff]  }
  0x21   :  { %3634 = vmatprep.subr.bf16.mxu1 %v5743_v33  ;;  %v5785_v1 = vld [vmem:[%s8912_s1 + $0x304] ss:$16 sps:$4 sm:$0xff]   ;;  %v5788_v3 = vld [vmem:[%s8912_s1 + $0x300] ss:$16 sps:$4 sm:$0xff]   ;;  %v7028_v33 = vld [vmem:[%s8913_s0 + $0x18] sm:$0xff] }
  0x22   :  { %v5795_v4 = vld [vmem:[%s8912_s1 + $0x4e4] ss:$16 sps:$4 sm:$0xff]   ;;  %v5793_v8 = vld [vmem:[%s8912_s1 + $0x4e0] ss:$16 sps:$4 sm:$0xff]  }
  0x23   :  { %3594 = vmatpush2.bf16.msra.mxu0 %v5745_v34  ;;  %v5798_v5 = vld [vmem:[%s8912_s1 + $0x6e4] ss:$16 sps:$4 sm:$0xff]   ;;  %v5796_v9 = vld [vmem:[%s8912_s1 + $0x6e0] ss:$16 sps:$4 sm:$0xff]  }
  0x24   :  { %3635 = vmatpush2.bf16.msra.mxu1 %v5746_v35  ;;  %3595 = vmatprep.subr.bf16.mxu0 %v5747_v36  ;;  %v5801_v10 = vld [vmem:[%s8912_s1 + $0x4c4] ss:$16 sps:$4 sm:$0xff]   ;;  %v5799_v12 = vld [vmem:[%s8912_s1 + $0x4c0] ss:$16 sps:$4 sm:$0xff]  }
  0x25   :  { %3636 = vmatprep.subr.bf16.mxu1 %v5749_v37  ;;  %v5804_v11 = vld [vmem:[%s8912_s1 + $0x6c4] ss:$16 sps:$4 sm:$0xff]   ;;  %v5802_v13 = vld [vmem:[%s8912_s1 + $0x6c0] ss:$16 sps:$4 sm:$0xff]   ;;  %v7042_v37 = vcombine.high %v7028_v33, %v7028_v33 }
  0x26   :  { %v5807_v14 = vld [vmem:[%s8912_s1 + $0x4a4] ss:$16 sps:$4 sm:$0xff]   ;;  %v5805_v16 = vld [vmem:[%s8912_s1 + $0x4a0] ss:$16 sps:$4 sm:$0xff]  }
  0x27   :  { %3596 = vmatpush2.bf16.msra.mxu0 %v5751_v38  ;;  %v5810_v15 = vld [vmem:[%s8912_s1 + $0x6a4] ss:$16 sps:$4 sm:$0xff]   ;;  %v5808_v17 = vld [vmem:[%s8912_s1 + $0x6a0] ss:$16 sps:$4 sm:$0xff]  }
  0x28   :  { %3637 = vmatpush2.bf16.msra.mxu1 %v5752_v39  ;;  %3597 = vmatprep.subr.bf16.mxu0 %v5753_v40  ;;  %v5813_v18 = vld [vmem:[%s8912_s1 + $0x484] ss:$16 sps:$4 sm:$0xff]   ;;  %v5811_v20 = vld [vmem:[%s8912_s1 + $0x480] ss:$16 sps:$4 sm:$0xff]  }
  0x29   :  { %3638 = vmatprep.subr.bf16.mxu1 %v5755_v41  ;;  %v5816_v19 = vld [vmem:[%s8912_s1 + $0x684] ss:$16 sps:$4 sm:$0xff]   ;;  %v5814_v21 = vld [vmem:[%s8912_s1 + $0x680] ss:$16 sps:$4 sm:$0xff]  }
  0x2a   :  { %v5819_v22 = vld [vmem:[%s8912_s1 + $0x464] ss:$16 sps:$4 sm:$0xff]   ;;  %v5817_v24 = vld [vmem:[%s8912_s1 + $0x460] ss:$16 sps:$4 sm:$0xff]  }
  0x2b   :  { %3598 = vmatpush2.bf16.msra.mxu0 %v5757_v42  ;;  %v5822_v23 = vld [vmem:[%s8912_s1 + $0x664] ss:$16 sps:$4 sm:$0xff]   ;;  %v5820_v25 = vld [vmem:[%s8912_s1 + $0x660] ss:$16 sps:$4 sm:$0xff]  }
  0x2c   :  { %3639 = vmatpush2.bf16.msra.mxu1 %v5758_v43  ;;  %3599 = vmatprep.subr.bf16.mxu0 %v5759_v44  ;;  %v5825_v26 = vld [vmem:[%s8912_s1 + $0x444] ss:$16 sps:$4 sm:$0xff]   ;;  %v5823_v28 = vld [vmem:[%s8912_s1 + $0x440] ss:$16 sps:$4 sm:$0xff]  }
  0x2d   :  { %3640 = vmatprep.subr.bf16.mxu1 %v5761_v45  ;;  %v5828_v27 = vld [vmem:[%s8912_s1 + $0x644] ss:$16 sps:$4 sm:$0xff]   ;;  %v5826_v29 = vld [vmem:[%s8912_s1 + $0x640] ss:$16 sps:$4 sm:$0xff]  }
  0x2e   :  { %v5831_v30 = vld [vmem:[%s8912_s1 + $0x424] ss:$16 sps:$4 sm:$0xff]   ;;  %v5829_v34 = vld [vmem:[%s8912_s1 + $0x420] ss:$16 sps:$4 sm:$0xff]  }
  0x2f   :  { %3600 = vmatpush2.bf16.msra.mxu0 %v5763_v49  ;;  %v5834_v31 = vld [vmem:[%s8912_s1 + $0x624] ss:$16 sps:$4 sm:$0xff]   ;;  %v5832_v35 = vld [vmem:[%s8912_s1 + $0x620] ss:$16 sps:$4 sm:$0xff]  }
  0x30   :  { %3641 = vmatpush2.bf16.msra.mxu1 %v5764_v50  ;;  %3601 = vmatprep.subr.bf16.mxu0 %v5765_v52  ;;  %v7023_v32 = vld [vmem:[%s8913_s0 + $0x10] sm:$0xff] }
  0x31   :  { %3642 = vmatprep.subr.bf16.mxu1 %v5767_v53  ;;  %v7038_v36 = vcombine.high %v7023_v32, %v7023_v32  ;;  %v5837_v38 = vld [vmem:[%s8912_s1 + $0x404] ss:$16 sps:$4 sm:$0xff]   ;;  %v5835_v40 = vld [vmem:[%s8912_s1 + $0x400] ss:$16 sps:$4 sm:$0xff]  }
  0x32   :  { %v5840_v39 = vld [vmem:[%s8912_s1 + $0x604] ss:$16 sps:$4 sm:$0xff]   ;;  %v5838_v41 = vld [vmem:[%s8912_s1 + $0x600] ss:$16 sps:$4 sm:$0xff]  }
  0x33   :  { %3602 = vmatpush2.bf16.msra.mxu0 %v5769_v54  ;;  %v5843_v42 = vld [vmem:[%s8912_s1 + $0x5e4] ss:$16 sps:$4 sm:$0xff]   ;;  %v5841_v44 = vld [vmem:[%s8912_s1 + $0x5e0] ss:$16 sps:$4 sm:$0xff]  }
  0x34   :  { %3643 = vmatpush2.bf16.msra.mxu1 %v5770_v55  ;;  %3603 = vmatprep.subr.bf16.mxu0 %v5771_v56  ;;  %v5846_v43 = vld [vmem:[%s8912_s1 + $0x7e4] ss:$16 sps:$4 sm:$0xff]   ;;  %v5844_v45 = vld [vmem:[%s8912_s1 + $0x7e0] ss:$16 sps:$4 sm:$0xff]  }
  0x35   :  { %3644 = vmatprep.subr.bf16.mxu1 %v5773_v57  ;;  %v5849_v46 = vld [vmem:[%s8912_s1 + $0x5c4] ss:$16 sps:$4 sm:$0xff]   ;;  %v5847_v49 = vld [vmem:[%s8912_s1 + $0x5c0] ss:$16 sps:$4 sm:$0xff]  }
  0x36   :  { %v5852_v48 = vld [vmem:[%s8912_s1 + $0x7c4] ss:$16 sps:$4 sm:$0xff]   ;;  %v5850_v50 = vld [vmem:[%s8912_s1 + $0x7c0] ss:$16 sps:$4 sm:$0xff]  }
  0x37   :  { %3604 = vmatpush2.bf16.msra.mxu0 %v5775_v58  ;;  %v5855_v52 = vld [vmem:[%s8912_s1 + $0x5a4] ss:$16 sps:$4 sm:$0xff]   ;;  %v5853_v54 = vld [vmem:[%s8912_s1 + $0x5a0] ss:$16 sps:$4 sm:$0xff]  }
  0x38   :  { %3645 = vmatpush2.bf16.msra.mxu1 %v5776_v59  ;;  %3605 = vmatprep.subr.bf16.mxu0 %v5777_v60  ;;  %v5858_v53 = vld [vmem:[%s8912_s1 + $0x7a4] ss:$16 sps:$4 sm:$0xff]   ;;  %v5856_v55 = vld [vmem:[%s8912_s1 + $0x7a0] ss:$16 sps:$4 sm:$0xff]  }
  0x39   :  { %3646 = vmatprep.subr.bf16.mxu1 %v5779_v61  ;;  %v5861_v56 = vld [vmem:[%s8912_s1 + $0x584] ss:$16 sps:$4 sm:$0xff]   ;;  %v5859_v58 = vld [vmem:[%s8912_s1 + $0x580] ss:$16 sps:$4 sm:$0xff]  }
  0x3a   :  { %v5864_v57 = vld [vmem:[%s8912_s1 + $0x784] ss:$16 sps:$4 sm:$0xff]   ;;  %v5862_v59 = vld [vmem:[%s8912_s1 + $0x780] ss:$16 sps:$4 sm:$0xff]  }
  0x3b   :  { %3606 = vmatpush2.bf16.msra.mxu0 %v5781_v62  ;;  %v5867_v60 = vld [vmem:[%s8912_s1 + $0x564] ss:$16 sps:$4 sm:$0xff]   ;;  %v5865_v62 = vld [vmem:[%s8912_s1 + $0x560] ss:$16 sps:$4 sm:$0xff]  }
  0x3c   :  { %3647 = vmatpush2.bf16.msra.mxu1 %v5782_v63  ;;  %3607 = vmatprep.subr.bf16.mxu0 %v5783_v0  ;;  %v5870_v61 = vld [vmem:[%s8912_s1 + $0x764] ss:$16 sps:$4 sm:$0xff]   ;;  %v5868_v63 = vld [vmem:[%s8912_s1 + $0x760] ss:$16 sps:$4 sm:$0xff]  }
  0x3d   :  { %3648 = vmatprep.subr.bf16.mxu1 %v5785_v1  ;;  %v5873_v0 = vld [vmem:[%s8912_s1 + $0x544] ss:$16 sps:$4 sm:$0xff]  }
  0x3e   :  { %v5876_v1 = vld [vmem:[%s8912_s1 + $0x744] ss:$16 sps:$4 sm:$0xff]  }
  0x3f   :  { %3608 = vmatpush2.bf16.msra.mxu0 %v5787_v2  ;;  %v5871_v2 = vld [vmem:[%s8912_s1 + $0x540] ss:$16 sps:$4 sm:$0xff]  }
  0x40   :  { %3649 = vmatpush2.bf16.msra.mxu1 %v5788_v3  ;;  %3659 = vmatprep.subr.bf16.mxu0 %v5795_v4  ;;  %v5874_v3 = vld [vmem:[%s8912_s1 + $0x740] ss:$16 sps:$4 sm:$0xff]   ;;  %v5879_v4 = vld [vmem:[%s8912_s1 + $0x524] ss:$16 sps:$4 sm:$0xff]  }
  0x41   :  { %3700 = vmatprep.subr.bf16.mxu1 %v5798_v5  ;;  %v5882_v5 = vld [vmem:[%s8912_s1 + $0x724] ss:$16 sps:$4 sm:$0xff]  }
  0x42   :  { %3610 = vmatmul.mubr.bf16.vlgmr.msra.gmra.mxu0 %v6942_v6 }
  0x43   :  { %3651 = vmatmul.mubr.bf16.vlgmr.msra.gmra.mxu1 %v6944_v7  ;;  %3660 = vmatpush1.bf16.msra.mxu0 %v5793_v8  ;;  %v5877_v8 = vld [vmem:[%s8912_s1 + $0x520] ss:$16 sps:$4 sm:$0xff]  }
  0x44   :  { %3701 = vmatpush1.bf16.msra.mxu1 %v5796_v9  ;;  %3661 = vmatprep.subr.bf16.mxu0 %v5801_v10  ;;  %v5880_v9 = vld [vmem:[%s8912_s1 + $0x720] ss:$16 sps:$4 sm:$0xff]   ;;  %v5885_v10 = vld [vmem:[%s8912_s1 + $0x504] ss:$16 sps:$4 sm:$0xff]  }
  0x45   :  { %3702 = vmatprep.subr.bf16.mxu1 %v5804_v11  ;;  %3691 = vmatprep.mubr.bf16.mxu0 %v7038_v36  ;;  %v5888_v11 = vld [vmem:[%s8912_s1 + $0x704] ss:$16 sps:$4 sm:$0xff]  }
  0x46   :  { %3732 = vmatprep.mubr.bf16.mxu1 %v7042_v37 }
  0x47   :  { %3662 = vmatpush1.bf16.msra.mxu0 %v5799_v12  ;;  %v5883_v12 = vld [vmem:[%s8912_s1 + $0x500] ss:$16 sps:$4 sm:$0xff]  }
  0x48   :  { %3703 = vmatpush1.bf16.msra.mxu1 %v5802_v13  ;;  %3663 = vmatprep.subr.bf16.mxu0 %v5807_v14  ;;  %v5886_v13 = vld [vmem:[%s8912_s1 + $0x700] ss:$16 sps:$4 sm:$0xff]   ;;  %v5895_v14 = vld [vmem:[%s8912_s1 + $0x8e4] ss:$16 sps:$4 sm:$0xff]  }
  0x49   :  { %3704 = vmatprep.subr.bf16.mxu1 %v5810_v15  ;;  %v5898_v15 = vld [vmem:[%s8912_s1 + $0xae4] ss:$16 sps:$4 sm:$0xff]  }
  0x4b   :  { %3664 = vmatpush1.bf16.msra.mxu0 %v5805_v16  ;;  %v7162_v16 = vcombine.low %v7023_v32, %v7023_v32  ;;  %v5913_v32 = vld [vmem:[%s8912_s1 + $0x884] ss:$16 sps:$4 sm:$0xff]  }
  0x4c   :  { %3705 = vmatpush1.bf16.msra.mxu1 %v5808_v17  ;;  %3665 = vmatprep.subr.bf16.mxu0 %v5813_v18  ;;  %v7166_v17 = vcombine.low %v7028_v33, %v7028_v33  ;;  %v5893_v18 = vld [vmem:[%s8912_s1 + $0x8e0] ss:$16 sps:$4 sm:$0xff]   ;;  %v5916_v33 = vld [vmem:[%s8912_s1 + $0xa84] ss:$16 sps:$4 sm:$0xff]  }
  0x4d   :  { %3706 = vmatprep.subr.bf16.mxu1 %v5816_v19  ;;  %v5896_v19 = vld [vmem:[%s8912_s1 + $0xae0] ss:$16 sps:$4 sm:$0xff]  }
  0x4f   :  { %3666 = vmatpush1.bf16.msra.mxu0 %v5811_v20  ;;  %v5901_v20 = vld [vmem:[%s8912_s1 + $0x8c4] ss:$16 sps:$4 sm:$0xff]  }
  0x50   :  { %3707 = vmatpush1.bf16.msra.mxu1 %v5814_v21  ;;  %3667 = vmatprep.subr.bf16.mxu0 %v5819_v22  ;;  %v5904_v21 = vld [vmem:[%s8912_s1 + $0xac4] ss:$16 sps:$4 sm:$0xff]  }
  0x51   :  { %3708 = vmatprep.subr.bf16.mxu1 %v5822_v23  ;;  %v7183_v22 = vld [vmem:[%s8913_s0 + $0x20] sm:$0xff]  ;;  %v7188_v23 = vld [vmem:[%s8913_s0 + $0x28] sm:$0xff] }
  0x53   :  { %3668 = vmatpush1.bf16.msra.mxu0 %v5817_v24  ;;  %v7192_v24 = vcombine.high %v7183_v22, %v7183_v22 }
  0x54   :  { %3709 = vmatpush1.bf16.msra.mxu1 %v5820_v25  ;;  %3669 = vmatprep.subr.bf16.mxu0 %v5825_v26  ;;  %v7196_v25 = vcombine.high %v7188_v23, %v7188_v23  ;;  %v5899_v26 = vld [vmem:[%s8912_s1 + $0x8c0] ss:$16 sps:$4 sm:$0xff]  }
  0x55   :  { %3710 = vmatprep.subr.bf16.mxu1 %v5828_v27  ;;  %v5902_v27 = vld [vmem:[%s8912_s1 + $0xac0] ss:$16 sps:$4 sm:$0xff]  }
  0x57   :  { %3670 = vmatpush1.bf16.msra.mxu0 %v5823_v28  ;;  %v5907_v28 = vld [vmem:[%s8912_s1 + $0x8a4] ss:$16 sps:$4 sm:$0xff]  }
  0x58   :  { %3711 = vmatpush1.bf16.msra.mxu1 %v5826_v29  ;;  %3671 = vmatprep.subr.bf16.mxu0 %v5831_v30  ;;  %v5910_v29 = vld [vmem:[%s8912_s1 + $0xaa4] ss:$16 sps:$4 sm:$0xff]   ;;  %v5905_v30 = vld [vmem:[%s8912_s1 + $0x8a0] ss:$16 sps:$4 sm:$0xff]  }
  0x59   :  { %3712 = vmatprep.subr.bf16.mxu1 %v5834_v31  ;;  %v5908_v31 = vld [vmem:[%s8912_s1 + $0xaa0] ss:$16 sps:$4 sm:$0xff]  }
  0x5b   :  { %3672 = vmatpush1.bf16.msra.mxu0 %v5829_v34  ;;  %v5911_v34 = vld [vmem:[%s8912_s1 + $0x880] ss:$16 sps:$4 sm:$0xff]  }
  0x5c   :  { %3713 = vmatpush1.bf16.msra.mxu1 %v5832_v35  ;;  %3673 = vmatprep.subr.bf16.mxu0 %v5837_v38  ;;  %v5914_v35 = vld [vmem:[%s8912_s1 + $0xa80] ss:$16 sps:$4 sm:$0xff]   ;;  %v5919_v38 = vld [vmem:[%s8912_s1 + $0x864] ss:$16 sps:$4 sm:$0xff]  }
  0x5d   :  { %3714 = vmatprep.subr.bf16.mxu1 %v5840_v39  ;;  %v5922_v39 = vld [vmem:[%s8912_s1 + $0xa64] ss:$16 sps:$4 sm:$0xff]  }
  0x5f   :  { %3674 = vmatpush1.bf16.msra.mxu0 %v5835_v40  ;;  %v5917_v40 = vld [vmem:[%s8912_s1 + $0x860] ss:$16 sps:$4 sm:$0xff]  }
  0x60   :  { %3715 = vmatpush1.bf16.msra.mxu1 %v5838_v41  ;;  %3675 = vmatprep.subr.bf16.mxu0 %v5843_v42  ;;  %v5920_v41 = vld [vmem:[%s8912_s1 + $0xa60] ss:$16 sps:$4 sm:$0xff]   ;;  %v5925_v42 = vld [vmem:[%s8912_s1 + $0x844] ss:$16 sps:$4 sm:$0xff]  }
  0x61   :  { %3716 = vmatprep.subr.bf16.mxu1 %v5846_v43  ;;  %v5928_v43 = vld [vmem:[%s8912_s1 + $0xa44] ss:$16 sps:$4 sm:$0xff]  }
  0x63   :  { %3676 = vmatpush2.bf16.msra.mxu0 %v5841_v44  ;;  %v5923_v44 = vld [vmem:[%s8912_s1 + $0x840] ss:$16 sps:$4 sm:$0xff]  }
  0x64   :  { %3717 = vmatpush2.bf16.msra.mxu1 %v5844_v45  ;;  %3677 = vmatprep.subr.bf16.mxu0 %v5849_v46  ;;  %v5926_v45 = vld [vmem:[%s8912_s1 + $0xa40] ss:$16 sps:$4 sm:$0xff]   ;;  %v5931_v46 = vld [vmem:[%s8912_s1 + $0x824] ss:$16 sps:$4 sm:$0xff]  }
  0x65   :  { %3718 = vmatprep.subr.bf16.mxu1 %v5852_v48  ;;  %v5934_v48 = vld [vmem:[%s8912_s1 + $0xa24] ss:$16 sps:$4 sm:$0xff]  }
  0x67   :  { %3678 = vmatpush2.bf16.msra.mxu0 %v5847_v49  ;;  %v5929_v49 = vld [vmem:[%s8912_s1 + $0x820] ss:$16 sps:$4 sm:$0xff]  }
  0x68   :  { %3719 = vmatpush2.bf16.msra.mxu1 %v5850_v50  ;;  %3679 = vmatprep.subr.bf16.mxu0 %v5855_v52  ;;  %v5932_v50 = vld [vmem:[%s8912_s1 + $0xa20] ss:$16 sps:$4 sm:$0xff]   ;;  %v5937_v52 = vld [vmem:[%s8912_s1 + $0x804] ss:$16 sps:$4 sm:$0xff]  }
  0x69   :  { %3720 = vmatprep.subr.bf16.mxu1 %v5858_v53  ;;  %v5940_v53 = vld [vmem:[%s8912_s1 + $0xa04] ss:$16 sps:$4 sm:$0xff]  }
  0x6b   :  { %3680 = vmatpush2.bf16.msra.mxu0 %v5853_v54  ;;  %v5935_v54 = vld [vmem:[%s8912_s1 + $0x800] ss:$16 sps:$4 sm:$0xff]  }
  0x6c   :  { %3721 = vmatpush2.bf16.msra.mxu1 %v5856_v55  ;;  %3681 = vmatprep.subr.bf16.mxu0 %v5861_v56  ;;  %v5938_v55 = vld [vmem:[%s8912_s1 + $0xa00] ss:$16 sps:$4 sm:$0xff]   ;;  %v5943_v56 = vld [vmem:[%s8912_s1 + $0x9e4] ss:$16 sps:$4 sm:$0xff]  }
  0x6d   :  { %3722 = vmatprep.subr.bf16.mxu1 %v5864_v57  ;;  %v5946_v57 = vld [vmem:[%s8912_s1 + $0xbe4] ss:$16 sps:$4 sm:$0xff]  }
  0x6f   :  { %3682 = vmatpush2.bf16.msra.mxu0 %v5859_v58  ;;  %v5941_v58 = vld [vmem:[%s8912_s1 + $0x9e0] ss:$16 sps:$4 sm:$0xff]  }
  0x70   :  { %3723 = vmatpush2.bf16.msra.mxu1 %v5862_v59  ;;  %3683 = vmatprep.subr.bf16.mxu0 %v5867_v60  ;;  %v5944_v59 = vld [vmem:[%s8912_s1 + $0xbe0] ss:$16 sps:$4 sm:$0xff]   ;;  %v5949_v60 = vld [vmem:[%s8912_s1 + $0x9c4] ss:$16 sps:$4 sm:$0xff]  }
  0x71   :  { %3724 = vmatprep.subr.bf16.mxu1 %v5870_v61  ;;  %v5952_v61 = vld [vmem:[%s8912_s1 + $0xbc4] ss:$16 sps:$4 sm:$0xff]  }
  0x73   :  { %3684 = vmatpush2.bf16.msra.mxu0 %v5865_v62  ;;  %v5947_v62 = vld [vmem:[%s8912_s1 + $0x9c0] ss:$16 sps:$4 sm:$0xff]  }
  0x74   :  { %3725 = vmatpush2.bf16.msra.mxu1 %v5868_v63  ;;  %3685 = vmatprep.subr.bf16.mxu0 %v5873_v0  ;;  %v5950_v63 = vld [vmem:[%s8912_s1 + $0xbc0] ss:$16 sps:$4 sm:$0xff]   ;;  %v5955_v0 = vld [vmem:[%s8912_s1 + $0x9a4] ss:$16 sps:$4 sm:$0xff]  }
  0x75   :  { %3726 = vmatprep.subr.bf16.mxu1 %v5876_v1  ;;  %v5958_v1 = vld [vmem:[%s8912_s1 + $0xba4] ss:$16 sps:$4 sm:$0xff]  }
  0x77   :  { %3686 = vmatpush2.bf16.msra.mxu0 %v5871_v2  ;;  %v5953_v2 = vld [vmem:[%s8912_s1 + $0x9a0] ss:$16 sps:$4 sm:$0xff]  }
  0x78   :  { %3727 = vmatpush2.bf16.msra.mxu1 %v5874_v3  ;;  %3687 = vmatprep.subr.bf16.mxu0 %v5879_v4  ;;  %v5956_v3 = vld [vmem:[%s8912_s1 + $0xba0] ss:$16 sps:$4 sm:$0xff]   ;;  %v5961_v4 = vld [vmem:[%s8912_s1 + $0x984] ss:$16 sps:$4 sm:$0xff]  }
  0x79   :  { %3728 = vmatprep.subr.bf16.mxu1 %v5882_v5  ;;  %v5964_v5 = vld [vmem:[%s8912_s1 + $0xb84] ss:$16 sps:$4 sm:$0xff]  }
  0x7b   :  { %3688 = vmatpush2.bf16.msra.mxu0 %v5877_v8  ;;  %v5959_v8 = vld [vmem:[%s8912_s1 + $0x980] ss:$16 sps:$4 sm:$0xff]  }
  0x7c   :  { %3729 = vmatpush2.bf16.msra.mxu1 %v5880_v9  ;;  %3689 = vmatprep.subr.bf16.mxu0 %v5885_v10  ;;  %v5962_v9 = vld [vmem:[%s8912_s1 + $0xb80] ss:$16 sps:$4 sm:$0xff]   ;;  %v5967_v10 = vld [vmem:[%s8912_s1 + $0x964] ss:$16 sps:$4 sm:$0xff]  }
  0x7d   :  { %3730 = vmatprep.subr.bf16.mxu1 %v5888_v11  ;;  %v5970_v11 = vld [vmem:[%s8912_s1 + $0xb64] ss:$16 sps:$4 sm:$0xff]  }
  0x7f   :  { %3690 = vmatpush2.bf16.msra.mxu0 %v5883_v12  ;;  %v5965_v12 = vld [vmem:[%s8912_s1 + $0x960] ss:$16 sps:$4 sm:$0xff]  }
  0x80   :  { %3731 = vmatpush2.bf16.msra.mxu1 %v5886_v13  ;;  %3741 = vmatprep.subr.bf16.mxu0 %v5895_v14  ;;  %v5968_v13 = vld [vmem:[%s8912_s1 + $0xb60] ss:$16 sps:$4 sm:$0xff]   ;;  %v5973_v14 = vld [vmem:[%s8912_s1 + $0x944] ss:$16 sps:$4 sm:$0xff]  }
  0x81   :  { %3782 = vmatprep.subr.bf16.mxu1 %v5898_v15  ;;  %v5976_v15 = vld [vmem:[%s8912_s1 + $0xb44] ss:$16 sps:$4 sm:$0xff]  }
  0x82   :  { %3692 = vmatmul.mubr.bf16.vlgmr.msra.gmra.mxu0 %v7162_v16 }
  0x83   :  { %3733 = vmatmul.mubr.bf16.vlgmr.msra.gmra.mxu1 %v7166_v17  ;;  %3742 = vmatpush1.bf16.msra.mxu0 %v5893_v18  ;;  %v5971_v18 = vld [vmem:[%s8912_s1 + $0x940] ss:$16 sps:$4 sm:$0xff]  }
  0x84   :  { %3783 = vmatpush1.bf16.msra.mxu1 %v5896_v19  ;;  %3743 = vmatprep.subr.bf16.mxu0 %v5901_v20  ;;  %v5974_v19 = vld [vmem:[%s8912_s1 + $0xb40] ss:$16 sps:$4 sm:$0xff]   ;;  %v5979_v20 = vld [vmem:[%s8912_s1 + $0x924] ss:$16 sps:$4 sm:$0xff]  }
  0x85   :  { %3784 = vmatprep.subr.bf16.mxu1 %v5904_v21  ;;  %3773 = vmatprep.mubr.bf16.mxu0 %v7192_v24  ;;  %v5982_v21 = vld [vmem:[%s8912_s1 + $0xb24] ss:$16 sps:$4 sm:$0xff]  }
  0x86   :  { %3814 = vmatprep.mubr.bf16.mxu1 %v7196_v25 }
  0x87   :  { %3744 = vmatpush1.bf16.msra.mxu0 %v5899_v26  ;;  %v5977_v26 = vld [vmem:[%s8912_s1 + $0x920] ss:$16 sps:$4 sm:$0xff]  }
  0x88   :  { %3785 = vmatpush1.bf16.msra.mxu1 %v5902_v27  ;;  %3745 = vmatprep.subr.bf16.mxu0 %v5907_v28  ;;  %v5980_v27 = vld [vmem:[%s8912_s1 + $0xb20] ss:$16 sps:$4 sm:$0xff]   ;;  %v5985_v28 = vld [vmem:[%s8912_s1 + $0x904] ss:$16 sps:$4 sm:$0xff]  }
  0x89   :  { %3786 = vmatprep.subr.bf16.mxu1 %v5910_v29  ;;  %v5988_v29 = vld [vmem:[%s8912_s1 + $0xb04] ss:$16 sps:$4 sm:$0xff]  }
  0x8b   :  { %3746 = vmatpush1.bf16.msra.mxu0 %v5905_v30  ;;  %v5983_v30 = vld [vmem:[%s8912_s1 + $0x900] ss:$16 sps:$4 sm:$0xff]  }
  0x8c   :  { %3787 = vmatpush1.bf16.msra.mxu1 %v5908_v31  ;;  %3747 = vmatprep.subr.bf16.mxu0 %v5913_v32  ;;  %v5986_v31 = vld [vmem:[%s8912_s1 + $0xb00] ss:$16 sps:$4 sm:$0xff]   ;;  %v5995_v32 = vld [vmem:[%s8912_s1 + $0xce4] ss:$16 sps:$4 sm:$0xff]  }
  0x8d   :  { %3788 = vmatprep.subr.bf16.mxu1 %v5916_v33  ;;  %v5998_v33 = vld [vmem:[%s8912_s1 + $0xee4] ss:$16 sps:$4 sm:$0xff]  }
  0x8f   :  { %3748 = vmatpush1.bf16.msra.mxu0 %v5911_v34  ;;  %v5993_v34 = vld [vmem:[%s8912_s1 + $0xce0] ss:$16 sps:$4 sm:$0xff]  }
  0x90   :  { %3789 = vmatpush1.bf16.msra.mxu1 %v5914_v35  ;;  %3749 = vmatprep.subr.bf16.mxu0 %v5919_v38  ;;  %v7388_v35 = vld [vmem:[%s8913_s0 + $0x30] sm:$0xff]  ;;  %v7392_v38 = vcombine.low %v7183_v22, %v7183_v22 }
  0x91   :  { %3790 = vmatprep.subr.bf16.mxu1 %v5922_v39  ;;  %v7396_v39 = vcombine.low %v7188_v23, %v7188_v23  ;;  %v6001_v22 = vld [vmem:[%s8912_s1 + $0xcc4] ss:$16 sps:$4 sm:$0xff]  }
  0x92   :  { %v6004_v23 = vld [vmem:[%s8912_s1 + $0xec4] ss:$16 sps:$4 sm:$0xff]  }
  0x93   :  { %3750 = vmatpush1.bf16.msra.mxu0 %v5917_v40  ;;  %v7401_v40 = vld [vmem:[%s8913_s0 + $0x38] sm:$0xff] }
  0x94   :  { %3791 = vmatpush1.bf16.msra.mxu1 %v5920_v41  ;;  %3751 = vmatprep.subr.bf16.mxu0 %v5925_v42  ;;  %v5996_v41 = vld [vmem:[%s8912_s1 + $0xee0] ss:$16 sps:$4 sm:$0xff]   ;;  %v7414_v42 = vcombine.high %v7388_v35, %v7388_v35 }
  0x95   :  { %3792 = vmatprep.subr.bf16.mxu1 %v5928_v43  ;;  %v7418_v43 = vcombine.high %v7401_v40, %v7401_v40 }
  0x97   :  { %3752 = vmatpush1.bf16.msra.mxu0 %v5923_v44  ;;  %v5999_v44 = vld [vmem:[%s8912_s1 + $0xcc0] ss:$16 sps:$4 sm:$0xff]  }
  0x98   :  { %3793 = vmatpush1.bf16.msra.mxu1 %v5926_v45  ;;  %3753 = vmatprep.subr.bf16.mxu0 %v5931_v46  ;;  %v6002_v45 = vld [vmem:[%s8912_s1 + $0xec0] ss:$16 sps:$4 sm:$0xff]   ;;  %v6007_v46 = vld [vmem:[%s8912_s1 + $0xca4] ss:$16 sps:$4 sm:$0xff]  }
  0x99   :  { %3794 = vmatprep.subr.bf16.mxu1 %v5934_v48  ;;  %v6010_v48 = vld [vmem:[%s8912_s1 + $0xea4] ss:$16 sps:$4 sm:$0xff]  }
  0x9b   :  { %3754 = vmatpush1.bf16.msra.mxu0 %v5929_v49  ;;  %v6005_v49 = vld [vmem:[%s8912_s1 + $0xca0] ss:$16 sps:$4 sm:$0xff]  }
  0x9c   :  { %3795 = vmatpush1.bf16.msra.mxu1 %v5932_v50  ;;  %3755 = vmatprep.subr.bf16.mxu0 %v5937_v52  ;;  %v6008_v50 = vld [vmem:[%s8912_s1 + $0xea0] ss:$16 sps:$4 sm:$0xff]   ;;  %v6013_v52 = vld [vmem:[%s8912_s1 + $0xc84] ss:$16 sps:$4 sm:$0xff]  }
  0x9d   :  { %3796 = vmatprep.subr.bf16.mxu1 %v5940_v53  ;;  %v6016_v53 = vld [vmem:[%s8912_s1 + $0xe84] ss:$16 sps:$4 sm:$0xff]  }
  0x9f   :  { %3756 = vmatpush1.bf16.msra.mxu0 %v5935_v54  ;;  %v6011_v54 = vld [vmem:[%s8912_s1 + $0xc80] ss:$16 sps:$4 sm:$0xff]  }
  0xa0   :  { %3797 = vmatpush1.bf16.msra.mxu1 %v5938_v55  ;;  %3757 = vmatprep.subr.bf16.mxu0 %v5943_v56  ;;  %v6014_v55 = vld [vmem:[%s8912_s1 + $0xe80] ss:$16 sps:$4 sm:$0xff]   ;;  %v6019_v56 = vld [vmem:[%s8912_s1 + $0xc64] ss:$16 sps:$4 sm:$0xff]  }
  0xa1   :  { %3798 = vmatprep.subr.bf16.mxu1 %v5946_v57  ;;  %v6022_v57 = vld [vmem:[%s8912_s1 + $0xe64] ss:$16 sps:$4 sm:$0xff]  }
  0xa3   :  { %3758 = vmatpush2.bf16.msra.mxu0 %v5941_v58  ;;  %v6017_v58 = vld [vmem:[%s8912_s1 + $0xc60] ss:$16 sps:$4 sm:$0xff]  }
  0xa4   :  { %3799 = vmatpush2.bf16.msra.mxu1 %v5944_v59  ;;  %3759 = vmatprep.subr.bf16.mxu0 %v5949_v60  ;;  %v6020_v59 = vld [vmem:[%s8912_s1 + $0xe60] ss:$16 sps:$4 sm:$0xff]   ;;  %v6025_v60 = vld [vmem:[%s8912_s1 + $0xc44] ss:$16 sps:$4 sm:$0xff]  }
  0xa5   :  { %3800 = vmatprep.subr.bf16.mxu1 %v5952_v61  ;;  %v6028_v61 = vld [vmem:[%s8912_s1 + $0xe44] ss:$16 sps:$4 sm:$0xff]  }
  0xa7   :  { %3760 = vmatpush2.bf16.msra.mxu0 %v5947_v62  ;;  %v6023_v62 = vld [vmem:[%s8912_s1 + $0xc40] ss:$16 sps:$4 sm:$0xff]  }
  0xa8   :  { %3801 = vmatpush2.bf16.msra.mxu1 %v5950_v63  ;;  %3761 = vmatprep.subr.bf16.mxu0 %v5955_v0  ;;  %v6026_v63 = vld [vmem:[%s8912_s1 + $0xe40] ss:$16 sps:$4 sm:$0xff]   ;;  %v6031_v0 = vld [vmem:[%s8912_s1 + $0xc24] ss:$16 sps:$4 sm:$0xff]  }
  0xa9   :  { %3802 = vmatprep.subr.bf16.mxu1 %v5958_v1  ;;  %v6034_v1 = vld [vmem:[%s8912_s1 + $0xe24] ss:$16 sps:$4 sm:$0xff]  }
  0xab   :  { %3762 = vmatpush2.bf16.msra.mxu0 %v5953_v2  ;;  %v6029_v2 = vld [vmem:[%s8912_s1 + $0xc20] ss:$16 sps:$4 sm:$0xff]  }
  0xac   :  { %3803 = vmatpush2.bf16.msra.mxu1 %v5956_v3  ;;  %3763 = vmatprep.subr.bf16.mxu0 %v5961_v4  ;;  %v6032_v3 = vld [vmem:[%s8912_s1 + $0xe20] ss:$16 sps:$4 sm:$0xff]   ;;  %v6037_v4 = vld [vmem:[%s8912_s1 + $0xc04] ss:$16 sps:$4 sm:$0xff]  }
  0xad   :  { %3804 = vmatprep.subr.bf16.mxu1 %v5964_v5  ;;  %v6040_v5 = vld [vmem:[%s8912_s1 + $0xe04] ss:$16 sps:$4 sm:$0xff]  }
  0xaf   :  { %3764 = vmatpush2.bf16.msra.mxu0 %v5959_v8  ;;  %v6035_v8 = vld [vmem:[%s8912_s1 + $0xc00] ss:$16 sps:$4 sm:$0xff]  }
  0xb0   :  { %3805 = vmatpush2.bf16.msra.mxu1 %v5962_v9  ;;  %3765 = vmatprep.subr.bf16.mxu0 %v5967_v10  ;;  %v6038_v9 = vld [vmem:[%s8912_s1 + $0xe00] ss:$16 sps:$4 sm:$0xff]   ;;  %v6043_v10 = vld [vmem:[%s8912_s1 + $0xde4] ss:$16 sps:$4 sm:$0xff]  }
  0xb1   :  { %3806 = vmatprep.subr.bf16.mxu1 %v5970_v11  ;;  %v6046_v11 = vld [vmem:[%s8912_s1 + $0xfe4] ss:$16 sps:$4 sm:$0xff]  }
  0xb3   :  { %3766 = vmatpush2.bf16.msra.mxu0 %v5965_v12  ;;  %v6041_v12 = vld [vmem:[%s8912_s1 + $0xde0] ss:$16 sps:$4 sm:$0xff]  }
  0xb4   :  { %3807 = vmatpush2.bf16.msra.mxu1 %v5968_v13  ;;  %3767 = vmatprep.subr.bf16.mxu0 %v5973_v14  ;;  %v6044_v13 = vld [vmem:[%s8912_s1 + $0xfe0] ss:$16 sps:$4 sm:$0xff]   ;;  %v6049_v14 = vld [vmem:[%s8912_s1 + $0xdc4] ss:$16 sps:$4 sm:$0xff]  }
  0xb5   :  { %3808 = vmatprep.subr.bf16.mxu1 %v5976_v15  ;;  %v6052_v15 = vld [vmem:[%s8912_s1 + $0xfc4] ss:$16 sps:$4 sm:$0xff]  }
  0xb7   :  { %3768 = vmatpush2.bf16.msra.mxu0 %v5971_v18  ;;  %v6047_v18 = vld [vmem:[%s8912_s1 + $0xdc0] ss:$16 sps:$4 sm:$0xff]  }
  0xb8   :  { %3809 = vmatpush2.bf16.msra.mxu1 %v5974_v19  ;;  %3769 = vmatprep.subr.bf16.mxu0 %v5979_v20  ;;  %v6050_v19 = vld [vmem:[%s8912_s1 + $0xfc0] ss:$16 sps:$4 sm:$0xff]   ;;  %v6055_v20 = vld [vmem:[%s8912_s1 + $0xda4] ss:$16 sps:$4 sm:$0xff]  }
  0xb9   :  { %3810 = vmatprep.subr.bf16.mxu1 %v5982_v21  ;;  %v6058_v21 = vld [vmem:[%s8912_s1 + $0xfa4] ss:$16 sps:$4 sm:$0xff]  }
  0xbb   :  { %3770 = vmatpush2.bf16.msra.mxu0 %v5977_v26  ;;  %v6053_v26 = vld [vmem:[%s8912_s1 + $0xda0] ss:$16 sps:$4 sm:$0xff]  }
  0xbc   :  { %3811 = vmatpush2.bf16.msra.mxu1 %v5980_v27  ;;  %3771 = vmatprep.subr.bf16.mxu0 %v5985_v28  ;;  %v6056_v27 = vld [vmem:[%s8912_s1 + $0xfa0] ss:$16 sps:$4 sm:$0xff]   ;;  %v6061_v28 = vld [vmem:[%s8912_s1 + $0xd84] ss:$16 sps:$4 sm:$0xff]  }
  0xbd   :  { %3812 = vmatprep.subr.bf16.mxu1 %v5988_v29  ;;  %v6064_v29 = vld [vmem:[%s8912_s1 + $0xf84] ss:$16 sps:$4 sm:$0xff]  }
  0xbf   :  { %3772 = vmatpush2.bf16.msra.mxu0 %v5983_v30  ;;  %v6059_v30 = vld [vmem:[%s8912_s1 + $0xd80] ss:$16 sps:$4 sm:$0xff]  }
  0xc0   :  { %3813 = vmatpush2.bf16.msra.mxu1 %v5986_v31  ;;  %3823 = vmatprep.subr.bf16.mxu0 %v5995_v32  ;;  %v6062_v31 = vld [vmem:[%s8912_s1 + $0xf80] ss:$16 sps:$4 sm:$0xff]   ;;  %v6067_v32 = vld [vmem:[%s8912_s1 + $0xd64] ss:$16 sps:$4 sm:$0xff]  }
  0xc1   :  { %3864 = vmatprep.subr.bf16.mxu1 %v5998_v33  ;;  %v6070_v33 = vld [vmem:[%s8912_s1 + $0xf64] ss:$16 sps:$4 sm:$0xff]  }
  0xc2   :  { %3774 = vmatmul.mubr.bf16.vlgmr.msra.gmra.mxu0 %v7392_v38 }
  0xc3   :  { %3815 = vmatmul.mubr.bf16.vlgmr.msra.gmra.mxu1 %v7396_v39  ;;  %3824 = vmatpush1.bf16.msra.mxu0 %v5993_v34  ;;  %v6065_v34 = vld [vmem:[%s8912_s1 + $0xd60] ss:$16 sps:$4 sm:$0xff]  }
  0xc4   :  { %3865 = vmatpush1.bf16.msra.mxu1 %v5996_v41  ;;  %3825 = vmatprep.subr.bf16.mxu0 %v6001_v22  ;;  %v6068_v41 = vld [vmem:[%s8912_s1 + $0xf60] ss:$16 sps:$4 sm:$0xff]   ;;  %v6073_v22 = vld [vmem:[%s8912_s1 + $0xd44] ss:$16 sps:$4 sm:$0xff]  }
  0xc5   :  { %3866 = vmatprep.subr.bf16.mxu1 %v6004_v23  ;;  %3855 = vmatprep.mubr.bf16.mxu0 %v7414_v42  ;;  %v6076_v23 = vld [vmem:[%s8912_s1 + $0xf44] ss:$16 sps:$4 sm:$0xff]  }
  0xc6   :  { %3896 = vmatprep.mubr.bf16.mxu1 %v7418_v43 }
  0xc7   :  { %3826 = vmatpush1.bf16.msra.mxu0 %v5999_v44  ;;  %v6071_v44 = vld [vmem:[%s8912_s1 + $0xd40] ss:$16 sps:$4 sm:$0xff]  }
  0xc8   :  { %3867 = vmatpush1.bf16.msra.mxu1 %v6002_v45  ;;  %3827 = vmatprep.subr.bf16.mxu0 %v6007_v46  ;;  %v6074_v45 = vld [vmem:[%s8912_s1 + $0xf40] ss:$16 sps:$4 sm:$0xff]   ;;  %v614_v46 = vlaneseq }
  0xc9   :  { %3868 = vmatprep.subr.bf16.mxu1 %v6010_v48  ;;  %v6079_v48 = vld [vmem:[%s8912_s1 + $0xd24] ss:$16 sps:$4 sm:$0xff]  }
  0xcb   :  { %3828 = vmatpush1.bf16.msra.mxu0 %v6005_v49  ;;  %v6082_v49 = vld [vmem:[%s8912_s1 + $0xf24] ss:$16 sps:$4 sm:$0xff]  }
  0xcc   :  { %3869 = vmatpush1.bf16.msra.mxu1 %v6008_v50  ;;  %3829 = vmatprep.subr.bf16.mxu0 %v6013_v52  ;;  %v6077_v50 = vld [vmem:[%s8912_s1 + $0xd20] ss:$16 sps:$4 sm:$0xff]  }
  0xcd   :  { %3870 = vmatprep.subr.bf16.mxu1 %v6016_v53  ;;  %v6080_v52 = vld [vmem:[%s8912_s1 + $0xf20] ss:$16 sps:$4 sm:$0xff]   ;;  %v7586_v53 = vshrl.u32 %v614_v46, 7  ;;  %v6125_v46 = vld [vmem:[%s8912_s1 + $0x1044] ss:$16 sps:$4 sm:$0xff]  }
  0xcf   :  { %3830 = vmatpush1.bf16.msra.mxu0 %v6011_v54  ;;  %v6085_v54 = vld [vmem:[%s8912_s1 + $0xd04] ss:$16 sps:$4 sm:$0xff]  }
  0xd0   :  { %3871 = vmatpush1.bf16.msra.mxu1 %v6014_v55  ;;  %3831 = vmatprep.subr.bf16.mxu0 %v6019_v56  ;;  %v6088_v55 = vld [vmem:[%s8912_s1 + $0xf04] ss:$16 sps:$4 sm:$0xff]   ;;  %v6083_v56 = vld [vmem:[%s8912_s1 + $0xd00] ss:$16 sps:$4 sm:$0xff]  }
  0xd1   :  { %3872 = vmatprep.subr.bf16.mxu1 %v6022_v57  ;;  %v6086_v57 = vld [vmem:[%s8912_s1 + $0xf00] ss:$16 sps:$4 sm:$0xff]  }
  0xd3   :  { %3832 = vmatpush1.bf16.msra.mxu0 %v6017_v58  ;;  %v612_v58 = vld [vmem:[%s8914_s2] sm:$0xf] }
  0xd4   :  { %3873 = vmatpush1.bf16.msra.mxu1 %v6020_v59  ;;  %3833 = vmatprep.subr.bf16.mxu0 %v6025_v60  ;;  %v616_v59 = vsub.s32 0, %v7586_v53  ;;  %v6095_v60 = vld [vmem:[%s8912_s1 + $0x10e4] ss:$16 sps:$4 sm:$0xff]  }
  0xd5   :  { %3874 = vmatprep.subr.bf16.mxu1 %v6028_v61  ;;  %v6098_v61 = vld [vmem:[%s8912_s1 + $0xec] ss:$16 sps:$4 sm:$0xff]  }
  0xd7   :  { %3834 = vmatpush1.bf16.msra.mxu0 %v6023_v62  ;;  %v620_v62 = vsub.s32 1, %v7586_v53 }
  0xd8   :  { %3875 = vmatpush1.bf16.msra.mxu1 %v6026_v63  ;;  %3835 = vmatprep.subr.bf16.mxu0 %v6031_v0  ;;  %v7613_v63 = vcombine.low %v7388_v35, %v7388_v35  ;;  %v7617_v0 = vcombine.low %v7401_v40, %v7401_v40  ;;  %v6096_v35 = vld [vmem:[%s8912_s1 + $0xe8] ss:$16 sps:$4 sm:$0xff]   ;;  %v6101_v40 = vld [vmem:[%s8912_s1 + $0x10c4] ss:$16 sps:$4 sm:$0xff]  }
  0xd9   :  { %3876 = vmatprep.subr.bf16.mxu1 %v6034_v1  ;;  %v7622_v1 = vld [vmem:[%s8913_s0 + $0x40] sm:$0xff] }
  0xdb   :  { %3836 = vmatpush1.bf16.msra.mxu0 %v6029_v2  ;;  %v617_v2 = vrot.slane %v612_v58, %v616_v59 }
  0xdc   :  { %3877 = vmatpush1.bf16.msra.mxu1 %v6032_v3  ;;  %3837 = vmatprep.subr.bf16.mxu0 %v6037_v4  ;;  %v6093_v3 = vld [vmem:[%s8912_s1 + $0x10e0] ss:$16 sps:$4 sm:$0xff]   ;;  %v6104_v4 = vld [vmem:[%s8912_s1 + $0xcc] ss:$16 sps:$4 sm:$0xff]  }
  0xdd   :  { %3878 = vmatprep.subr.bf16.mxu1 %v6040_v5  ;;  %v621_v5 = vrot.slane %v612_v58, %v620_v62  ;;  %v6140_v58 = vld [vmem:[%s8912_s1 + $0xc] ss:$16 sps:$4 sm:$0xff]  }
  0xdf   :  { %3838 = vmatpush1.bf16.msra.mxu0 %v6035_v8  ;;  %v7642_v8 = vcombine.high %v7622_v1, %v7622_v1 }
  0xe0   :  { %3879 = vmatpush1.bf16.msra.mxu1 %v6038_v9  ;;  %3839 = vmatprep.subr.bf16.mxu0 %v6043_v10 }
  0xe1   :  { %3880 = vmatprep.subr.bf16.mxu1 %v6046_v11 }
  0xe3   :  { %3840 = vmatpush2.bf16.msra.mxu0 %v6041_v12  ;;  %v6099_v12 = vld [vmem:[%s8912_s1 + $0x10c0] ss:$16 sps:$4 sm:$0xff]  }
  0xe4   :  { %3881 = vmatpush2.bf16.msra.mxu1 %v6044_v13  ;;  %3841 = vmatprep.subr.bf16.mxu0 %v6049_v14  ;;  %v6102_v13 = vld [vmem:[%s8912_s1 + $0xc8] ss:$16 sps:$4 sm:$0xff]  }
  0xe5   :  { %3882 = vmatprep.subr.bf16.mxu1 %v6052_v15 }
  0xe7   :  { %3842 = vmatpush2.bf16.msra.mxu0 %v6047_v18  ;;  %v6107_v18 = vld [vmem:[%s8912_s1 + $0x10a4] ss:$16 sps:$4 sm:$0xff]  }
  0xe8   :  { %3883 = vmatpush2.bf16.msra.mxu1 %v6050_v19  ;;  %3843 = vmatprep.subr.bf16.mxu0 %v6055_v20  ;;  %v6110_v19 = vld [vmem:[%s8912_s1 + $0xac] ss:$16 sps:$4 sm:$0xff]  }
  0xe9   :  { %3884 = vmatprep.subr.bf16.mxu1 %v6058_v21 }
  0xeb   :  { %3844 = vmatpush2.bf16.msra.mxu0 %v6053_v26 }
  0xec   :  { %3885 = vmatpush2.bf16.msra.mxu1 %v6056_v27  ;;  %3845 = vmatprep.subr.bf16.mxu0 %v6061_v28 }
  0xed   :  { %3886 = vmatprep.subr.bf16.mxu1 %v6064_v29  ;;  %v6105_v29 = vld [vmem:[%s8912_s1 + $0x10a0] ss:$16 sps:$4 sm:$0xff]  }
  0xef   :  { %3846 = vmatpush2.bf16.msra.mxu0 %v6059_v30  ;;  %v6108_v30 = vld [vmem:[%s8912_s1 + $0xa8] ss:$16 sps:$4 sm:$0xff]  }
  0xf0   :  { %3887 = vmatpush2.bf16.msra.mxu1 %v6062_v31  ;;  %3847 = vmatprep.subr.bf16.mxu0 %v6067_v32 }
  0xf1   :  { %3888 = vmatprep.subr.bf16.mxu1 %v6070_v33  ;;  %v6116_v33 = vld [vmem:[%s8912_s1 + $0x8c] ss:$16 sps:$4 sm:$0xff]  }
  0xf3   :  { %3848 = vmatpush2.bf16.msra.mxu0 %v6065_v34  ;;  %v6111_v34 = vld [vmem:[%s8912_s1 + $0x1080] ss:$16 sps:$4 sm:$0xff]  }
  0xf4   :  { %3889 = vmatpush2.bf16.msra.mxu1 %v6068_v41  ;;  %3849 = vmatprep.subr.bf16.mxu0 %v6073_v22  ;;  %v6114_v41 = vld [vmem:[%s8912_s1 + $0x88] ss:$16 sps:$4 sm:$0xff]   ;;  %v6119_v22 = vld [vmem:[%s8912_s1 + $0x1064] ss:$16 sps:$4 sm:$0xff]  }
  0xf5   :  { %3890 = vmatprep.subr.bf16.mxu1 %v6076_v23  ;;  %v6122_v23 = vld [vmem:[%s8912_s1 + $0x6c] ss:$16 sps:$4 sm:$0xff]  }
  0xf7   :  { %3850 = vmatpush2.bf16.msra.mxu0 %v6071_v44  ;;  %v6117_v44 = vld [vmem:[%s8912_s1 + $0x1060] ss:$16 sps:$4 sm:$0xff]  }
  0xf8   :  { %3891 = vmatpush2.bf16.msra.mxu1 %v6074_v45  ;;  %3851 = vmatprep.subr.bf16.mxu0 %v6079_v48  ;;  %v6120_v45 = vld [vmem:[%s8912_s1 + $0x68] ss:$16 sps:$4 sm:$0xff]   ;;  %v6128_v48 = vld [vmem:[%s8912_s1 + $0x4c] ss:$16 sps:$4 sm:$0xff]  }
  0xf9   :  { %3892 = vmatprep.subr.bf16.mxu1 %v6082_v49  ;;  %v6123_v49 = vld [vmem:[%s8912_s1 + $0x1040] ss:$16 sps:$4 sm:$0xff]  }
  0xfb   :  { %3852 = vmatpush2.bf16.msra.mxu0 %v6077_v50  ;;  %v6126_v50 = vld [vmem:[%s8912_s1 + $0x48] ss:$16 sps:$4 sm:$0xff]  }
  0xfc   :  { %3893 = vmatpush2.bf16.msra.mxu1 %v6080_v52  ;;  %3853 = vmatprep.subr.bf16.mxu0 %v6085_v54  ;;  %v6131_v52 = vld [vmem:[%s8912_s1 + $0x1024] ss:$16 sps:$4 sm:$0xff]   ;;  %v6134_v54 = vld [vmem:[%s8912_s1 + $0x2c] ss:$16 sps:$4 sm:$0xff]  }
  0xfd   :  { %3894 = vmatprep.subr.bf16.mxu1 %v6088_v55  ;;  %v6129_v55 = vld [vmem:[%s8912_s1 + $0x1020] ss:$16 sps:$4 sm:$0xff]  }
  0xff   :  { %3854 = vmatpush2.bf16.msra.mxu0 %v6083_v56  ;;  %v6132_v56 = vld [vmem:[%s8912_s1 + $0x28] ss:$16 sps:$4 sm:$0xff]  }
 0x100   :  { %3895 = vmatpush2.bf16.msra.mxu1 %v6086_v57  ;;  %3905 = vmatprep.subr.bf16.mxu0 %v6095_v60  ;;  %v6137_v57 = vld [vmem:[%s8912_s1 + $0x1004] ss:$16 sps:$4 sm:$0xff]   ;;  %v6135_v60 = vld [vmem:[%s8912_s1 + $0x1000] ss:$16 sps:$4 sm:$0xff]  }
 0x101   :  { %3946 = vmatprep.subr.bf16.mxu1 %v6098_v61  ;;  %v6138_v61 = vld [vmem:[%s8912_s1 + $0x8] ss:$16 sps:$4 sm:$0xff]  }
 0x102   :  { %v3611_v9 = vpop.f32.mrf.mxu0  ;;  %3856 = vmatmul.mubr.bf16.vlgmr.msra.gmra.mxu0 %v7613_v63 }
 0x103   :  { %v3652_v10 = vpop.f32.mrf.mxu1  ;;  %3897 = vmatmul.mubr.bf16.vlgmr.msra.gmra.mxu1 %v7617_v0  ;;  %v3612_v11 = vadd.f32 %v3611_v9, %v617_v2  ;;  %3906 = vmatpush1.bf16.msra.mxu0 %v6093_v3  ;;  %v6143_v2 = vld [vmem:[%s8912_s1 + $0x11e4] ss:$16 sps:$4 sm:$0xff]   ;;  %v6146_v3 = vld [vmem:[%s8912_s1 + $0x1ec] ss:$16 sps:$4 sm:$0xff]   ;;  %v6147_v9 = vld [vmem:[%s8912_s1 + $0x11c0] ss:$16 sps:$4 sm:$0xff]  }
 0x104   :  { %3947 = vmatpush1.bf16.msra.mxu1 %v6096_v35  ;;  %v3613_v14 = vpop.f32.mrf.mxu0  ;;  %3907 = vmatprep.subr.bf16.mxu0 %v6101_v40  ;;  %v6141_v35 = vld [vmem:[%s8912_s1 + $0x11e0] ss:$16 sps:$4 sm:$0xff]   ;;  %v6144_v40 = vld [vmem:[%s8912_s1 + $0x1e8] ss:$16 sps:$4 sm:$0xff]  }
 0x105   :  { %v3654_v15 = vpop.f32.mrf.mxu1  ;;  %3948 = vmatprep.subr.bf16.mxu1 %v6104_v4  ;;  %v7658_v20 = vadd.f32 %v3652_v10, %v3612_v11  ;;  %v3614_v21 = vadd.f32 %v3613_v14, %v621_v5  ;;  %3937 = vmatprep.mubr.bf16.mxu0 %v7642_v8  ;;  %v6149_v4 = vld [vmem:[%s8912_s1 + $0x11c4] ss:$16 sps:$4 sm:$0xff]   ;;  %v6152_v5 = vld [vmem:[%s8912_s1 + $0x1cc] ss:$16 sps:$4 sm:$0xff]   ;;  %v6150_v10 = vld [vmem:[%s8912_s1 + $0x1c8] ss:$16 sps:$4 sm:$0xff]  }
 0x106   :  { %3978 = vmatprep.mubr.bf16.mxu1 %v6873_v47  ;;  %v3615_v26 = vpop.f32.mrf.mxu0  ;;  %v6113_v47 = vld [vmem:[%s8912_s1 + $0x1084] ss:$16 sps:$4 sm:$0xff]   ;;  %v6156_v14 = vld [vmem:[%s8912_s1 + $0x1a8] ss:$16 sps:$4 sm:$0xff]  }
 0x107   :  { %v3656_v27 = vpop.f32.mrf.mxu1  ;;  %v7662_v28 = vadd.f32 %v3654_v15, %v3614_v21  ;;  %3908 = vmatpush1.bf16.msra.mxu0 %v6099_v12  ;;  %v6155_v11 = vld [vmem:[%s8912_s1 + $0x11a4] ss:$16 sps:$4 sm:$0xff]   ;;  %v6158_v12 = vld [vmem:[%s8912_s1 + $0x1ac] ss:$16 sps:$4 sm:$0xff]   ;;  %v6162_v21 = vld [vmem:[%s8912_s1 + $0x188] ss:$16 sps:$4 sm:$0xff]  }
 0x108   :  { %3949 = vmatpush1.bf16.msra.mxu1 %v6102_v13  ;;  %v3616_v31 = vpop.f32.mrf.mxu0  ;;  %3909 = vmatprep.subr.bf16.mxu0 %v6107_v18  ;;  %v6153_v13 = vld [vmem:[%s8912_s1 + $0x11a0] ss:$16 sps:$4 sm:$0xff]   ;;  %v6161_v15 = vld [vmem:[%s8912_s1 + $0x1184] ss:$16 sps:$4 sm:$0xff]   ;;  %v6164_v18 = vld [vmem:[%s8912_s1 + $0x18c] ss:$16 sps:$4 sm:$0xff]  }
 0x109   :  { %v3657_v32 = vpop.f32.mrf.mxu1  ;;  %3950 = vmatprep.subr.bf16.mxu1 %v6110_v19  ;;  %v6159_v19 = vld [vmem:[%s8912_s1 + $0x1180] ss:$16 sps:$4 sm:$0xff]   ;;  %v6167_v26 = vld [vmem:[%s8912_s1 + $0x1164] ss:$16 sps:$4 sm:$0xff]   ;;  %v6170_v27 = vld [vmem:[%s8912_s1 + $0x16c] ss:$16 sps:$4 sm:$0xff]  }
 0x10a   :  { %v6173_v31 = vld [vmem:[%s8912_s1 + $0x1144] ss:$16 sps:$4 sm:$0xff]   ;;  %v6176_v32 = vld [vmem:[%s8912_s1 + $0x14c] ss:$16 sps:$4 sm:$0xff]  }
 0x10b   :  { %3910 = vmatpush1.bf16.msra.mxu0 %v6105_v29  ;;  %v6165_v29 = vld [vmem:[%s8912_s1 + $0x1160] ss:$16 sps:$4 sm:$0xff]  }
 0x10c   :  { %3951 = vmatpush1.bf16.msra.mxu1 %v6108_v30  ;;  %3911 = vmatprep.subr.bf16.mxu0 %v6113_v47  ;;  %v6168_v30 = vld [vmem:[%s8912_s1 + $0x168] ss:$16 sps:$4 sm:$0xff]   ;;  %v6171_v47 = vld [vmem:[%s8912_s1 + $0x1140] ss:$16 sps:$4 sm:$0xff]  }
 0x10d   :  { %3952 = vmatprep.subr.bf16.mxu1 %v6116_v33  ;;  %v6174_v33 = vld [vmem:[%s8912_s1 + $0x148] ss:$16 sps:$4 sm:$0xff]  }
 0x10f   :  { %3912 = vmatpush1.bf16.msra.mxu0 %v6111_v34  ;;  %v6179_v34 = vld [vmem:[%s8912_s1 + $0x1124] ss:$16 sps:$4 sm:$0xff]  }
 0x110   :  { %3953 = vmatpush1.bf16.msra.mxu1 %v6114_v41  ;;  %3913 = vmatprep.subr.bf16.mxu0 %v6119_v22  ;;  %v6182_v41 = vld [vmem:[%s8912_s1 + $0x12c] ss:$16 sps:$4 sm:$0xff]   ;;  %v6177_v22 = vld [vmem:[%s8912_s1 + $0x1120] ss:$16 sps:$4 sm:$0xff]  }
 0x111   :  { %3954 = vmatprep.subr.bf16.mxu1 %v6122_v23  ;;  %v6180_v23 = vld [vmem:[%s8912_s1 + $0x128] ss:$16 sps:$4 sm:$0xff]  }
 0x113   :  { %3914 = vmatpush1.bf16.msra.mxu0 %v6117_v44  ;;  %v6185_v44 = vld [vmem:[%s8912_s1 + $0x1104] ss:$16 sps:$4 sm:$0xff]  }
 0x114   :  { %3955 = vmatpush1.bf16.msra.mxu1 %v6120_v45  ;;  %3915 = vmatprep.subr.bf16.mxu0 %v6125_v46  ;;  %v6188_v45 = vld [vmem:[%s8912_s1 + $0x10c] ss:$16 sps:$4 sm:$0xff]   ;;  %v6183_v46 = vld [vmem:[%s8912_s1 + $0x1100] ss:$16 sps:$4 sm:$0xff]  }
 0x115   :  { %3956 = vmatprep.subr.bf16.mxu1 %v6128_v48  ;;  %v6186_v48 = vld [vmem:[%s8912_s1 + $0x108] ss:$16 sps:$4 sm:$0xff]  }
 0x117   :  { %3916 = vmatpush1.bf16.msra.mxu0 %v6123_v49  ;;  %v6193_v49 = vld [vmem:[%s8912_s1 + $0x2ec] ss:$16 sps:$4 sm:$0xff]  }
 0x118   :  { %3957 = vmatpush1.bf16.msra.mxu1 %v6126_v50  ;;  %3917 = vmatprep.subr.bf16.mxu0 %v6131_v52  ;;  %v6196_v50 = vld [vmem:[%s8912_s1 + $0x4ec] ss:$16 sps:$4 sm:$0xff]   ;;  %v6191_v52 = vld [vmem:[%s8912_s1 + $0x2e8] ss:$16 sps:$4 sm:$0xff]  }
 0x119   :  { %3958 = vmatprep.subr.bf16.mxu1 %v6134_v54  ;;  %v6194_v54 = vld [vmem:[%s8912_s1 + $0x4e8] ss:$16 sps:$4 sm:$0xff]  }
 0x11b   :  { %3918 = vmatpush1.bf16.msra.mxu0 %v6129_v55  ;;  %v7840_v55 = vcombine.low %v7622_v1, %v7622_v1  ;;  %v6200_v1 = vld [vmem:[%s8912_s1 + $0x4c8] ss:$16 sps:$4 sm:$0xff]  }
 0x11c   :  { %3959 = vmatpush1.bf16.msra.mxu1 %v6132_v56  ;;  %3919 = vmatprep.subr.bf16.mxu0 %v6137_v57  ;;  %v6199_v56 = vld [vmem:[%s8912_s1 + $0x2cc] ss:$16 sps:$4 sm:$0xff]  }
 0x11d   :  { %3960 = vmatprep.subr.bf16.mxu1 %v6140_v58  ;;  %v6202_v57 = vld [vmem:[%s8912_s1 + $0x4cc] ss:$16 sps:$4 sm:$0xff]   ;;  %v6197_v58 = vld [vmem:[%s8912_s1 + $0x2c8] ss:$16 sps:$4 sm:$0xff]  }
 0x11f   :  { %3920 = vmatpush1.bf16.msra.mxu0 %v6135_v60 }
 0x120   :  { %3961 = vmatpush1.bf16.msra.mxu1 %v6138_v61  ;;  %3921 = vmatprep.subr.bf16.mxu0 %v6143_v2 }
 0x121   :  { %3962 = vmatprep.subr.bf16.mxu1 %v6146_v3 }
 0x123   :  { %3922 = vmatpush2.bf16.msra.mxu0 %v6141_v35 }
 0x124   :  { %3963 = vmatpush2.bf16.msra.mxu1 %v6144_v40  ;;  %3923 = vmatprep.subr.bf16.mxu0 %v6149_v4  ;;  %v6205_v40 = vld [vmem:[%s8912_s1 + $0x2ac] ss:$16 sps:$4 sm:$0xff]  }
 0x125   :  { %3964 = vmatprep.subr.bf16.mxu1 %v6152_v5  ;;  %v6208_v4 = vld [vmem:[%s8912_s1 + $0x4ac] ss:$16 sps:$4 sm:$0xff]  }
 0x127   :  { %3924 = vmatpush2.bf16.msra.mxu0 %v6147_v9  ;;  %v6206_v9 = vld [vmem:[%s8912_s1 + $0x4a8] ss:$16 sps:$4 sm:$0xff]  }
 0x128   :  { %3965 = vmatpush2.bf16.msra.mxu1 %v6150_v10  ;;  %3925 = vmatprep.subr.bf16.mxu0 %v6155_v11 }
 0x129   :  { %3966 = vmatprep.subr.bf16.mxu1 %v6158_v12 }
 0x12b   :  { %3926 = vmatpush2.bf16.msra.mxu0 %v6153_v13 }
 0x12c   :  { %3967 = vmatpush2.bf16.msra.mxu1 %v6156_v14  ;;  %3927 = vmatprep.subr.bf16.mxu0 %v6161_v15  ;;  %v6211_v14 = vld [vmem:[%s8912_s1 + $0x28c] ss:$16 sps:$4 sm:$0xff]   ;;  %v6212_v15 = vld [vmem:[%s8912_s1 + $0x488] ss:$16 sps:$4 sm:$0xff]  }
 0x12d   :  { %3968 = vmatprep.subr.bf16.mxu1 %v6164_v18  ;;  %v6217_v18 = vld [vmem:[%s8912_s1 + $0x26c] ss:$16 sps:$4 sm:$0xff]  }
 0x12f   :  { %3928 = vmatpush2.bf16.msra.mxu0 %v6159_v19  ;;  %v6220_v19 = vld [vmem:[%s8912_s1 + $0x46c] ss:$16 sps:$4 sm:$0xff]  }
 0x130   :  { %3969 = vmatpush2.bf16.msra.mxu1 %v6162_v21  ;;  %3929 = vmatprep.subr.bf16.mxu0 %v6167_v26  ;;  %v6215_v21 = vld [vmem:[%s8912_s1 + $0x268] ss:$16 sps:$4 sm:$0xff]  }
 0x131   :  { %3970 = vmatprep.subr.bf16.mxu1 %v6170_v27  ;;  %v6218_v26 = vld [vmem:[%s8912_s1 + $0x468] ss:$16 sps:$4 sm:$0xff]   ;;  %v6223_v27 = vld [vmem:[%s8912_s1 + $0x24c] ss:$16 sps:$4 sm:$0xff]  }
 0x133   :  { %3930 = vmatpush2.bf16.msra.mxu0 %v6165_v29  ;;  %v6226_v29 = vld [vmem:[%s8912_s1 + $0x44c] ss:$16 sps:$4 sm:$0xff]  }
 0x134   :  { %3971 = vmatpush2.bf16.msra.mxu1 %v6168_v30  ;;  %3931 = vmatprep.subr.bf16.mxu0 %v6173_v31  ;;  %v6221_v30 = vld [vmem:[%s8912_s1 + $0x248] ss:$16 sps:$4 sm:$0xff]  }
 0x135   :  { %3972 = vmatprep.subr.bf16.mxu1 %v6176_v32  ;;  %v6224_v31 = vld [vmem:[%s8912_s1 + $0x448] ss:$16 sps:$4 sm:$0xff]   ;;  %v6229_v32 = vld [vmem:[%s8912_s1 + $0x22c] ss:$16 sps:$4 sm:$0xff]  }
 0x137   :  { %3932 = vmatpush2.bf16.msra.mxu0 %v6171_v47  ;;  %v6232_v47 = vld [vmem:[%s8912_s1 + $0x42c] ss:$16 sps:$4 sm:$0xff]  }
 0x138   :  { %3973 = vmatpush2.bf16.msra.mxu1 %v6174_v33  ;;  %3933 = vmatprep.subr.bf16.mxu0 %v6179_v34  ;;  %v6227_v33 = vld [vmem:[%s8912_s1 + $0x228] ss:$16 sps:$4 sm:$0xff]  }
 0x139   :  { %3974 = vmatprep.subr.bf16.mxu1 %v6182_v41  ;;  %v6230_v34 = vld [vmem:[%s8912_s1 + $0x428] ss:$16 sps:$4 sm:$0xff]   ;;  %v6235_v41 = vld [vmem:[%s8912_s1 + $0x20c] ss:$16 sps:$4 sm:$0xff]  }
 0x13b   :  { %3934 = vmatpush2.bf16.msra.mxu0 %v6177_v22  ;;  %v6238_v22 = vld [vmem:[%s8912_s1 + $0x40c] ss:$16 sps:$4 sm:$0xff]  }
 0x13c   :  { %3975 = vmatpush2.bf16.msra.mxu1 %v6180_v23  ;;  %3935 = vmatprep.subr.bf16.mxu0 %v6185_v44  ;;  %v6233_v23 = vld [vmem:[%s8912_s1 + $0x208] ss:$16 sps:$4 sm:$0xff]  }
 0x13d   :  { %3976 = vmatprep.subr.bf16.mxu1 %v6188_v45  ;;  %v6236_v44 = vld [vmem:[%s8912_s1 + $0x408] ss:$16 sps:$4 sm:$0xff]   ;;  %v6241_v45 = vld [vmem:[%s8912_s1 + $0x3ec] ss:$16 sps:$4 sm:$0xff]  }
 0x13f   :  { %3936 = vmatpush2.bf16.msra.mxu0 %v6183_v46  ;;  %v6244_v46 = vld [vmem:[%s8912_s1 + $0x5ec] ss:$16 sps:$4 sm:$0xff]  }
 0x140   :  { %3977 = vmatpush2.bf16.msra.mxu1 %v6186_v48  ;;  %3987 = vmatprep.subr.bf16.mxu0 %v6193_v49  ;;  %v6239_v48 = vld [vmem:[%s8912_s1 + $0x3e8] ss:$16 sps:$4 sm:$0xff]  }
 0x141   :  { %4028 = vmatprep.subr.bf16.mxu1 %v6196_v50  ;;  %v6242_v49 = vld [vmem:[%s8912_s1 + $0x5e8] ss:$16 sps:$4 sm:$0xff]   ;;  %v6247_v50 = vld [vmem:[%s8912_s1 + $0x3cc] ss:$16 sps:$4 sm:$0xff]  }
 0x142   :  { %v3693_v60 = vpop.f32.mrf.mxu0  ;;  %3938 = vmatmul.mubr.bf16.vlgmr.msra.gmra.mxu0 %v7840_v55 }
 0x143   :  { %v3734_v61 = vpop.f32.mrf.mxu1  ;;  %3979 = vmatmul.mubr.bf16.vlgmr.msra.gmra.mxu1 %v6942_v6  ;;  %v3694_v2 = vadd.f32 %v3693_v60, %v7658_v20  ;;  %3988 = vmatpush1.bf16.msra.mxu0 %v6191_v52  ;;  %v6203_v20 = vld [vmem:[%s8912_s1 + $0x2a8] ss:$16 sps:$4 sm:$0xff]   ;;  %v6250_v52 = vld [vmem:[%s8912_s1 + $0x5cc] ss:$16 sps:$4 sm:$0xff]  }
 0x144   :  { %4029 = vmatpush1.bf16.msra.mxu1 %v6194_v54  ;;  %v3695_v3 = vpop.f32.mrf.mxu0  ;;  %3989 = vmatprep.subr.bf16.mxu0 %v6199_v56  ;;  %v6245_v54 = vld [vmem:[%s8912_s1 + $0x3c8] ss:$16 sps:$4 sm:$0xff]  }
 0x145   :  { %v3736_v35 = vpop.f32.mrf.mxu1  ;;  %4030 = vmatprep.subr.bf16.mxu1 %v6202_v57  ;;  %v7863_v5 = vadd.f32 %v3734_v61, %v3694_v2  ;;  %v3696_v6 = vadd.f32 %v3695_v3, %v7662_v28  ;;  %4019 = vmatprep.mubr.bf16.mxu0 %v6884_v51  ;;  %v6214_v51 = vld [vmem:[%s8912_s1 + $0x48c] ss:$16 sps:$4 sm:$0xff]   ;;  %v6248_v56 = vld [vmem:[%s8912_s1 + $0x5c8] ss:$16 sps:$4 sm:$0xff]  }
 0x146   :  { %4060 = vmatprep.mubr.bf16.mxu1 %v7038_v36  ;;  %v3697_v10 = vpop.f32.mrf.mxu0  ;;  %v6209_v36 = vld [vmem:[%s8912_s1 + $0x288] ss:$16 sps:$4 sm:$0xff]   ;;  %v6253_v57 = vld [vmem:[%s8912_s1 + $0x3ac] ss:$16 sps:$4 sm:$0xff]  }
 0x147   :  { %v3738_v11 = vpop.f32.mrf.mxu1  ;;  %v7874_v12 = vadd.f32 %v3736_v35, %v3696_v6  ;;  %3990 = vmatpush1.bf16.msra.mxu0 %v6197_v58  ;;  %v6256_v58 = vld [vmem:[%s8912_s1 + $0x5ac] ss:$16 sps:$4 sm:$0xff]   ;;  %v6254_v60 = vld [vmem:[%s8912_s1 + $0x5a8] ss:$16 sps:$4 sm:$0xff]  }
 0x148   :  { %4031 = vmatpush1.bf16.msra.mxu1 %v6200_v1  ;;  %v3698_v13 = vpop.f32.mrf.mxu0  ;;  %3991 = vmatprep.subr.bf16.mxu0 %v6205_v40  ;;  %v6251_v1 = vld [vmem:[%s8912_s1 + $0x3a8] ss:$16 sps:$4 sm:$0xff]   ;;  %v6259_v61 = vld [vmem:[%s8912_s1 + $0x38c] ss:$16 sps:$4 sm:$0xff]  }
 0x149   :  { %v3739_v28 = vpop.f32.mrf.mxu1  ;;  %4032 = vmatprep.subr.bf16.mxu1 %v6208_v4  ;;  %v6262_v2 = vld [vmem:[%s8912_s1 + $0x58c] ss:$16 sps:$4 sm:$0xff]   ;;  %v6257_v3 = vld [vmem:[%s8912_s1 + $0x388] ss:$16 sps:$4 sm:$0xff]  }
 0x14a   :  { %v6260_v35 = vld [vmem:[%s8912_s1 + $0x588] ss:$16 sps:$4 sm:$0xff]   ;;  %v6265_v40 = vld [vmem:[%s8912_s1 + $0x36c] ss:$16 sps:$4 sm:$0xff]  }
 0x14b   :  { %3992 = vmatpush1.bf16.msra.mxu0 %v6203_v20  ;;  %v6268_v4 = vld [vmem:[%s8912_s1 + $0x56c] ss:$16 sps:$4 sm:$0xff]   ;;  %v6263_v6 = vld [vmem:[%s8912_s1 + $0x368] ss:$16 sps:$4 sm:$0xff]  }
 0x14c   :  { %4033 = vmatpush1.bf16.msra.mxu1 %v6206_v9  ;;  %3993 = vmatprep.subr.bf16.mxu0 %v6211_v14  ;;  %v6266_v20 = vld [vmem:[%s8912_s1 + $0x568] ss:$16 sps:$4 sm:$0xff]   ;;  %v6271_v9 = vld [vmem:[%s8912_s1 + $0x34c] ss:$16 sps:$4 sm:$0xff]  }
 0x14d   :  { %4034 = vmatprep.subr.bf16.mxu1 %v6214_v51  ;;  %v6274_v10 = vld [vmem:[%s8912_s1 + $0x54c] ss:$16 sps:$4 sm:$0xff]   ;;  %v6269_v11 = vld [vmem:[%s8912_s1 + $0x348] ss:$16 sps:$4 sm:$0xff]  }
 0x14e   :  { %v6272_v13 = vld [vmem:[%s8912_s1 + $0x548] ss:$16 sps:$4 sm:$0xff]   ;;  %v6277_v28 = vld [vmem:[%s8912_s1 + $0x32c] ss:$16 sps:$4 sm:$0xff]  }
 0x14f   :  { %3994 = vmatpush1.bf16.msra.mxu0 %v6209_v36  ;;  %v6280_v14 = vld [vmem:[%s8912_s1 + $0x52c] ss:$16 sps:$4 sm:$0xff]   ;;  %v6275_v51 = vld [vmem:[%s8912_s1 + $0x328] ss:$16 sps:$4 sm:$0xff]  }
 0x150   :  { %4035 = vmatpush1.bf16.msra.mxu1 %v6212_v15  ;;  %3995 = vmatprep.subr.bf16.mxu0 %v6217_v18  ;;  %v6278_v36 = vld [vmem:[%s8912_s1 + $0x528] ss:$16 sps:$4 sm:$0xff]   ;;  %v6283_v15 = vld [vmem:[%s8912_s1 + $0x30c] ss:$16 sps:$4 sm:$0xff]  }
 0x151   :  { %4036 = vmatprep.subr.bf16.mxu1 %v6220_v19  ;;  %v6286_v18 = vld [vmem:[%s8912_s1 + $0x50c] ss:$16 sps:$4 sm:$0xff]   ;;  %v6281_v19 = vld [vmem:[%s8912_s1 + $0x308] ss:$16 sps:$4 sm:$0xff]  }
 0x153   :  { %3996 = vmatpush1.bf16.msra.mxu0 %v6215_v21  ;;  %v6284_v21 = vld [vmem:[%s8912_s1 + $0x508] ss:$16 sps:$4 sm:$0xff]  }
 0x154   :  { %4037 = vmatpush1.bf16.msra.mxu1 %v6218_v26  ;;  %3997 = vmatprep.subr.bf16.mxu0 %v6223_v27  ;;  %v6289_v26 = vld [vmem:[%s8912_s1 + $0x6ec] ss:$16 sps:$4 sm:$0xff]  }
 0x155   :  { %4038 = vmatprep.subr.bf16.mxu1 %v6226_v29  ;;  %v6292_v27 = vld [vmem:[%s8912_s1 + $0x8ec] ss:$16 sps:$4 sm:$0xff]   ;;  %v6287_v29 = vld [vmem:[%s8912_s1 + $0x6e8] ss:$16 sps:$4 sm:$0xff]  }
 0x157   :  { %3998 = vmatpush1.bf16.msra.mxu0 %v6221_v30  ;;  %v6290_v30 = vld [vmem:[%s8912_s1 + $0x8e8] ss:$16 sps:$4 sm:$0xff]  }
 0x158   :  { %4039 = vmatpush1.bf16.msra.mxu1 %v6224_v31  ;;  %3999 = vmatprep.subr.bf16.mxu0 %v6229_v32  ;;  %v6295_v31 = vld [vmem:[%s8912_s1 + $0x6cc] ss:$16 sps:$4 sm:$0xff]  }
 0x159   :  { %4040 = vmatprep.subr.bf16.mxu1 %v6232_v47  ;;  %v6298_v32 = vld [vmem:[%s8912_s1 + $0x8cc] ss:$16 sps:$4 sm:$0xff]  }
 0x15b   :  { %4000 = vmatpush1.bf16.msra.mxu0 %v6227_v33 }
 0x15c   :  { %4041 = vmatpush1.bf16.msra.mxu1 %v6230_v34  ;;  %4001 = vmatprep.subr.bf16.mxu0 %v6235_v41  ;;  %v6293_v41 = vld [vmem:[%s8912_s1 + $0x6c8] ss:$16 sps:$4 sm:$0xff]  }
 0x15d   :  { %4042 = vmatprep.subr.bf16.mxu1 %v6238_v22  ;;  %v6296_v22 = vld [vmem:[%s8912_s1 + $0x8c8] ss:$16 sps:$4 sm:$0xff]  }
 0x15f   :  { %4002 = vmatpush1.bf16.msra.mxu0 %v6233_v23 }
 0x160   :  { %4043 = vmatpush1.bf16.msra.mxu1 %v6236_v44  ;;  %4003 = vmatprep.subr.bf16.mxu0 %v6241_v45 }
 0x161   :  { %4044 = vmatprep.subr.bf16.mxu1 %v6244_v46 }
 0x163   :  { %4004 = vmatpush2.bf16.msra.mxu0 %v6239_v48 }
 0x164   :  { %4045 = vmatpush2.bf16.msra.mxu1 %v6242_v49  ;;  %4005 = vmatprep.subr.bf16.mxu0 %v6247_v50  ;;  %v6299_v50 = vld [vmem:[%s8912_s1 + $0x6a8] ss:$16 sps:$4 sm:$0xff]  }
 0x165   :  { %4046 = vmatprep.subr.bf16.mxu1 %v6250_v52  ;;  %v6302_v52 = vld [vmem:[%s8912_s1 + $0x8a8] ss:$16 sps:$4 sm:$0xff]  }
 0x167   :  { %4006 = vmatpush2.bf16.msra.mxu0 %v6245_v54 }
 0x168   :  { %4047 = vmatpush2.bf16.msra.mxu1 %v6248_v56  ;;  %4007 = vmatprep.subr.bf16.mxu0 %v6253_v57  ;;  %v6305_v56 = vld [vmem:[%s8912_s1 + $0x688] ss:$16 sps:$4 sm:$0xff]  }
 0x169   :  { %4048 = vmatprep.subr.bf16.mxu1 %v6256_v58  ;;  %v6308_v57 = vld [vmem:[%s8912_s1 + $0x888] ss:$16 sps:$4 sm:$0xff]   ;;  %v6313_v58 = vld [vmem:[%s8912_s1 + $0x66c] ss:$16 sps:$4 sm:$0xff]  }
 0x16b   :  { %4008 = vmatpush2.bf16.msra.mxu0 %v6251_v1  ;;  %v6316_v1 = vld [vmem:[%s8912_s1 + $0x86c] ss:$16 sps:$4 sm:$0xff]  }
 0x16c   :  { %4049 = vmatpush2.bf16.msra.mxu1 %v6254_v60  ;;  %4009 = vmatprep.subr.bf16.mxu0 %v6259_v61  ;;  %v6311_v60 = vld [vmem:[%s8912_s1 + $0x668] ss:$16 sps:$4 sm:$0xff]  }
 0x16d   :  { %4050 = vmatprep.subr.bf16.mxu1 %v6262_v2  ;;  %v6314_v61 = vld [vmem:[%s8912_s1 + $0x868] ss:$16 sps:$4 sm:$0xff]   ;;  %v6319_v2 = vld [vmem:[%s8912_s1 + $0x64c] ss:$16 sps:$4 sm:$0xff]  }
 0x16f   :  { %4010 = vmatpush2.bf16.msra.mxu0 %v6257_v3  ;;  %v6322_v3 = vld [vmem:[%s8912_s1 + $0x84c] ss:$16 sps:$4 sm:$0xff]  }
 0x170   :  { %4051 = vmatpush2.bf16.msra.mxu1 %v6260_v35  ;;  %4011 = vmatprep.subr.bf16.mxu0 %v6265_v40  ;;  %v6317_v35 = vld [vmem:[%s8912_s1 + $0x648] ss:$16 sps:$4 sm:$0xff]  }
 0x171   :  { %4052 = vmatprep.subr.bf16.mxu1 %v6268_v4  ;;  %v6320_v40 = vld [vmem:[%s8912_s1 + $0x848] ss:$16 sps:$4 sm:$0xff]   ;;  %v6325_v4 = vld [vmem:[%s8912_s1 + $0x62c] ss:$16 sps:$4 sm:$0xff]  }
 0x173   :  { %4012 = vmatpush2.bf16.msra.mxu0 %v6263_v6  ;;  %v6328_v6 = vld [vmem:[%s8912_s1 + $0x82c] ss:$16 sps:$4 sm:$0xff]  }
 0x174   :  { %4053 = vmatpush2.bf16.msra.mxu1 %v6266_v20  ;;  %4013 = vmatprep.subr.bf16.mxu0 %v6271_v9  ;;  %v6323_v20 = vld [vmem:[%s8912_s1 + $0x628] ss:$16 sps:$4 sm:$0xff]  }
 0x175   :  { %4054 = vmatprep.subr.bf16.mxu1 %v6274_v10  ;;  %v6326_v9 = vld [vmem:[%s8912_s1 + $0x828] ss:$16 sps:$4 sm:$0xff]   ;;  %v6331_v10 = vld [vmem:[%s8912_s1 + $0x60c] ss:$16 sps:$4 sm:$0xff]  }
 0x177   :  { %4014 = vmatpush2.bf16.msra.mxu0 %v6269_v11  ;;  %v6334_v11 = vld [vmem:[%s8912_s1 + $0x80c] ss:$16 sps:$4 sm:$0xff]  }
 0x178   :  { %4055 = vmatpush2.bf16.msra.mxu1 %v6272_v13  ;;  %4015 = vmatprep.subr.bf16.mxu0 %v6277_v28  ;;  %v6329_v13 = vld [vmem:[%s8912_s1 + $0x608] ss:$16 sps:$4 sm:$0xff]  }
 0x179   :  { %4056 = vmatprep.subr.bf16.mxu1 %v6280_v14  ;;  %v6332_v28 = vld [vmem:[%s8912_s1 + $0x808] ss:$16 sps:$4 sm:$0xff]   ;;  %v6337_v14 = vld [vmem:[%s8912_s1 + $0x7ec] ss:$16 sps:$4 sm:$0xff]  }
 0x17b   :  { %4016 = vmatpush2.bf16.msra.mxu0 %v6275_v51  ;;  %v6340_v51 = vld [vmem:[%s8912_s1 + $0x9ec] ss:$16 sps:$4 sm:$0xff]  }
 0x17c   :  { %4057 = vmatpush2.bf16.msra.mxu1 %v6278_v36  ;;  %4017 = vmatprep.subr.bf16.mxu0 %v6283_v15  ;;  %v6335_v36 = vld [vmem:[%s8912_s1 + $0x7e8] ss:$16 sps:$4 sm:$0xff]  }
 0x17d   :  { %4058 = vmatprep.subr.bf16.mxu1 %v6286_v18  ;;  %v6338_v15 = vld [vmem:[%s8912_s1 + $0x9e8] ss:$16 sps:$4 sm:$0xff]   ;;  %v6343_v18 = vld [vmem:[%s8912_s1 + $0x7cc] ss:$16 sps:$4 sm:$0xff]  }
 0x17f   :  { %4018 = vmatpush2.bf16.msra.mxu0 %v6281_v19  ;;  %v6346_v19 = vld [vmem:[%s8912_s1 + $0x9cc] ss:$16 sps:$4 sm:$0xff]  }
 0x180   :  { %4059 = vmatpush2.bf16.msra.mxu1 %v6284_v21  ;;  %4069 = vmatprep.subr.bf16.mxu0 %v6289_v26  ;;  %v6341_v21 = vld [vmem:[%s8912_s1 + $0x7c8] ss:$16 sps:$4 sm:$0xff]  }
 0x181   :  { %4110 = vmatprep.subr.bf16.mxu1 %v6292_v27  ;;  %v6344_v26 = vld [vmem:[%s8912_s1 + $0x9c8] ss:$16 sps:$4 sm:$0xff]   ;;  %v6349_v27 = vld [vmem:[%s8912_s1 + $0x7ac] ss:$16 sps:$4 sm:$0xff]  }
 0x182   :  { %v3775_v47 = vpop.f32.mrf.mxu0  ;;  %4020 = vmatmul.mubr.bf16.vlgmr.msra.gmra.mxu0 %v6944_v7  ;;  %v6301_v7 = vld [vmem:[%s8912_s1 + $0x6ac] ss:$16 sps:$4 sm:$0xff]  }
 0x183   :  { %v3816_v33 = vpop.f32.mrf.mxu1  ;;  %4061 = vmatmul.mubr.bf16.vlgmr.msra.gmra.mxu1 %v7162_v16  ;;  %v3776_v34 = vadd.f32 %v3775_v47, %v7863_v5  ;;  %4070 = vmatpush1.bf16.msra.mxu0 %v6287_v29  ;;  %v6304_v16 = vld [vmem:[%s8912_s1 + $0x8ac] ss:$16 sps:$4 sm:$0xff]  }
 0x184   :  { %4111 = vmatpush1.bf16.msra.mxu1 %v6290_v30  ;;  %v3777_v23 = vpop.f32.mrf.mxu0  ;;  %4071 = vmatprep.subr.bf16.mxu0 %v6295_v31  ;;  %v6352_v29 = vld [vmem:[%s8912_s1 + $0x9ac] ss:$16 sps:$4 sm:$0xff]   ;;  %v6347_v30 = vld [vmem:[%s8912_s1 + $0x7a8] ss:$16 sps:$4 sm:$0xff]  }
 0x185   :  { %v3818_v44 = vpop.f32.mrf.mxu1  ;;  %4112 = vmatprep.subr.bf16.mxu1 %v6298_v32  ;;  %v8065_v5 = vadd.f32 %v3816_v33, %v3776_v34  ;;  %v3778_v45 = vadd.f32 %v3777_v23, %v7874_v12  ;;  %4101 = vmatprep.mubr.bf16.mxu0 %v7042_v37  ;;  %v6307_v37 = vld [vmem:[%s8912_s1 + $0x68c] ss:$16 sps:$4 sm:$0xff]   ;;  %v6350_v31 = vld [vmem:[%s8912_s1 + $0x9a8] ss:$16 sps:$4 sm:$0xff]  }
 0x186   :  { %4142 = vmatprep.mubr.bf16.mxu1 %v7192_v24  ;;  %v3779_v46 = vpop.f32.mrf.mxu0  ;;  %v6310_v24 = vld [vmem:[%s8912_s1 + $0x88c] ss:$16 sps:$4 sm:$0xff]   ;;  %v6353_v33 = vld [vmem:[%s8912_s1 + $0x788] ss:$16 sps:$4 sm:$0xff]  }
 0x187   :  { %v3820_v48 = vpop.f32.mrf.mxu1  ;;  %v8070_v49 = vadd.f32 %v3818_v44, %v3778_v45  ;;  %4072 = vmatpush1.bf16.msra.mxu0 %v6293_v41  ;;  %v6355_v32 = vld [vmem:[%s8912_s1 + $0x78c] ss:$16 sps:$4 sm:$0xff]   ;;  %v6356_v34 = vld [vmem:[%s8912_s1 + $0x988] ss:$16 sps:$4 sm:$0xff]  }
 0x188   :  { %4113 = vmatpush1.bf16.msra.mxu1 %v6296_v22  ;;  %v3780_v54 = vpop.f32.mrf.mxu0  ;;  %4073 = vmatprep.subr.bf16.mxu0 %v6301_v7  ;;  %v6358_v47 = vld [vmem:[%s8912_s1 + $0x98c] ss:$16 sps:$4 sm:$0xff]   ;;  %v6359_v23 = vld [vmem:[%s8912_s1 + $0x768] ss:$16 sps:$4 sm:$0xff]  }
 0x189   :  { %v3821_v12 = vpop.f32.mrf.mxu1  ;;  %4114 = vmatprep.subr.bf16.mxu1 %v6304_v16  ;;  %v6361_v41 = vld [vmem:[%s8912_s1 + $0x76c] ss:$16 sps:$4 sm:$0xff]   ;;  %v6362_v44 = vld [vmem:[%s8912_s1 + $0x968] ss:$16 sps:$4 sm:$0xff]  }
 0x18a   :  { %v6364_v22 = vld [vmem:[%s8912_s1 + $0x96c] ss:$16 sps:$4 sm:$0xff]   ;;  %v6365_v45 = vld [vmem:[%s8912_s1 + $0x748] ss:$16 sps:$4 sm:$0xff]  }
 0x18b   :  { %4074 = vmatpush1.bf16.msra.mxu0 %v6299_v50  ;;  %v6367_v7 = vld [vmem:[%s8912_s1 + $0x74c] ss:$16 sps:$4 sm:$0xff]   ;;  %v6368_v46 = vld [vmem:[%s8912_s1 + $0x948] ss:$16 sps:$4 sm:$0xff]  }
 0x18c   :  { %4115 = vmatpush1.bf16.msra.mxu1 %v6302_v52  ;;  %4075 = vmatprep.subr.bf16.mxu0 %v6307_v37  ;;  %v6370_v16 = vld [vmem:[%s8912_s1 + $0x94c] ss:$16 sps:$4 sm:$0xff]   ;;  %v6371_v52 = vld [vmem:[%s8912_s1 + $0x728] ss:$16 sps:$4 sm:$0xff]  }
 0x18d   :  { %4116 = vmatprep.subr.bf16.mxu1 %v6310_v24  ;;  %v6373_v48 = vld [vmem:[%s8912_s1 + $0x72c] ss:$16 sps:$4 sm:$0xff]   ;;  %v6374_v54 = vld [vmem:[%s8912_s1 + $0x928] ss:$16 sps:$4 sm:$0xff]  }
 0x18e   :  { %v6376_v50 = vld [vmem:[%s8912_s1 + $0x92c] ss:$16 sps:$4 sm:$0xff]   ;;  %v6377_v24 = vld [vmem:[%s8912_s1 + $0x708] ss:$16 sps:$4 sm:$0xff]  }
 0x18f   :  { %4076 = vmatpush1.bf16.msra.mxu0 %v6305_v56  ;;  %v6379_v12 = vld [vmem:[%s8912_s1 + $0x70c] ss:$16 sps:$4 sm:$0xff]   ;;  %v6380_v56 = vld [vmem:[%s8912_s1 + $0x908] ss:$16 sps:$4 sm:$0xff]  }
 0x190   :  { %4117 = vmatpush1.bf16.msra.mxu1 %v6308_v57  ;;  %4077 = vmatprep.subr.bf16.mxu0 %v6313_v58  ;;  %v6382_v37 = vld [vmem:[%s8912_s1 + $0x90c] ss:$16 sps:$4 sm:$0xff]  }
 0x191   :  { %4118 = vmatprep.subr.bf16.mxu1 %v6316_v1  ;;  %v6385_v57 = vld [vmem:[%s8912_s1 + $0xaec] ss:$16 sps:$4 sm:$0xff]   ;;  %v6383_v1 = vld [vmem:[%s8912_s1 + $0xae8] ss:$16 sps:$4 sm:$0xff]  }
 0x192   :  { %v6388_v58 = vld [vmem:[%s8912_s1 + $0xcec] ss:$16 sps:$4 sm:$0xff]  }
 0x193   :  { %4078 = vmatpush1.bf16.msra.mxu0 %v6311_v60  ;;  %v6386_v60 = vld [vmem:[%s8912_s1 + $0xce8] ss:$16 sps:$4 sm:$0xff]  }
 0x194   :  { %4119 = vmatpush1.bf16.msra.mxu1 %v6314_v61  ;;  %4079 = vmatprep.subr.bf16.mxu0 %v6319_v2  ;;  %v6391_v61 = vld [vmem:[%s8912_s1 + $0xacc] ss:$16 sps:$4 sm:$0xff]  }
 0x195   :  { %4120 = vmatprep.subr.bf16.mxu1 %v6322_v3  ;;  %v6394_v2 = vld [vmem:[%s8912_s1 + $0xccc] ss:$16 sps:$4 sm:$0xff]   ;;  %v6389_v3 = vld [vmem:[%s8912_s1 + $0xac8] ss:$16 sps:$4 sm:$0xff]  }
 0x197   :  { %4080 = vmatpush1.bf16.msra.mxu0 %v6317_v35  ;;  %v6392_v35 = vld [vmem:[%s8912_s1 + $0xcc8] ss:$16 sps:$4 sm:$0xff]  }
 0x198   :  { %4121 = vmatpush1.bf16.msra.mxu1 %v6320_v40  ;;  %4081 = vmatprep.subr.bf16.mxu0 %v6325_v4 }
 0x199   :  { %4122 = vmatprep.subr.bf16.mxu1 %v6328_v6  ;;  %v6397_v6 = vld [vmem:[%s8912_s1 + $0xaac] ss:$16 sps:$4 sm:$0xff]  }
 0x19b   :  { %4082 = vmatpush1.bf16.msra.mxu0 %v6323_v20 }
 0x19c   :  { %4123 = vmatpush1.bf16.msra.mxu1 %v6326_v9  ;;  %4083 = vmatprep.subr.bf16.mxu0 %v6331_v10 }
 0x19d   :  { %4124 = vmatprep.subr.bf16.mxu1 %v6334_v11  ;;  %v6400_v11 = vld [vmem:[%s8912_s1 + $0xcac] ss:$16 sps:$4 sm:$0xff]  }
 0x19f   :  { %4084 = vmatpush1.bf16.msra.mxu0 %v6329_v13 }
 0x1a0   :  { %4125 = vmatpush1.bf16.msra.mxu1 %v6332_v28  ;;  %4085 = vmatprep.subr.bf16.mxu0 %v6337_v14 }
 0x1a1   :  { %4126 = vmatprep.subr.bf16.mxu1 %v6340_v51 }
 0x1a3   :  { %4086 = vmatpush2.bf16.msra.mxu0 %v6335_v36 }
 0x1a4   :  { %4127 = vmatpush2.bf16.msra.mxu1 %v6338_v15  ;;  %4087 = vmatprep.subr.bf16.mxu0 %v6343_v18  ;;  %v6403_v15 = vld [vmem:[%s8912_s1 + $0xa8c] ss:$16 sps:$4 sm:$0xff]   ;;  %v6404_v18 = vld [vmem:[%s8912_s1 + $0xc88] ss:$16 sps:$4 sm:$0xff]  }
 0x1a5   :  { %4128 = vmatprep.subr.bf16.mxu1 %v6346_v19  ;;  %v6409_v19 = vld [vmem:[%s8912_s1 + $0xa6c] ss:$16 sps:$4 sm:$0xff]  }
 0x1a7   :  { %4088 = vmatpush2.bf16.msra.mxu0 %v6341_v21  ;;  %v6412_v21 = vld [vmem:[%s8912_s1 + $0xc6c] ss:$16 sps:$4 sm:$0xff]  }
 0x1a8   :  { %4129 = vmatpush2.bf16.msra.mxu1 %v6344_v26  ;;  %4089 = vmatprep.subr.bf16.mxu0 %v6349_v27  ;;  %v6407_v26 = vld [vmem:[%s8912_s1 + $0xa68] ss:$16 sps:$4 sm:$0xff]  }
 0x1a9   :  { %4130 = vmatprep.subr.bf16.mxu1 %v6352_v29  ;;  %v6410_v27 = vld [vmem:[%s8912_s1 + $0xc68] ss:$16 sps:$4 sm:$0xff]   ;;  %v6415_v29 = vld [vmem:[%s8912_s1 + $0xa4c] ss:$16 sps:$4 sm:$0xff]  }
 0x1ab   :  { %4090 = vmatpush2.bf16.msra.mxu0 %v6347_v30  ;;  %v6418_v30 = vld [vmem:[%s8912_s1 + $0xc4c] ss:$16 sps:$4 sm:$0xff]  }
 0x1ac   :  { %4131 = vmatpush2.bf16.msra.mxu1 %v6350_v31  ;;  %4091 = vmatprep.subr.bf16.mxu0 %v6355_v32  ;;  %v6413_v31 = vld [vmem:[%s8912_s1 + $0xa48] ss:$16 sps:$4 sm:$0xff]  }
 0x1ad   :  { %4132 = vmatprep.subr.bf16.mxu1 %v6358_v47  ;;  %v6416_v32 = vld [vmem:[%s8912_s1 + $0xc48] ss:$16 sps:$4 sm:$0xff]   ;;  %v6421_v47 = vld [vmem:[%s8912_s1 + $0xa2c] ss:$16 sps:$4 sm:$0xff]  }
 0x1af   :  { %4092 = vmatpush2.bf16.msra.mxu0 %v6353_v33  ;;  %v6424_v33 = vld [vmem:[%s8912_s1 + $0xc2c] ss:$16 sps:$4 sm:$0xff]  }
 0x1b0   :  { %4133 = vmatpush2.bf16.msra.mxu1 %v6356_v34  ;;  %4093 = vmatprep.subr.bf16.mxu0 %v6361_v41  ;;  %v6419_v34 = vld [vmem:[%s8912_s1 + $0xa28] ss:$16 sps:$4 sm:$0xff]  }
 0x1b1   :  { %4134 = vmatprep.subr.bf16.mxu1 %v6364_v22  ;;  %v6422_v41 = vld [vmem:[%s8912_s1 + $0xc28] ss:$16 sps:$4 sm:$0xff]   ;;  %v6427_v22 = vld [vmem:[%s8912_s1 + $0xa0c] ss:$16 sps:$4 sm:$0xff]  }
 0x1b3   :  { %4094 = vmatpush2.bf16.msra.mxu0 %v6359_v23  ;;  %v6430_v23 = vld [vmem:[%s8912_s1 + $0xc0c] ss:$16 sps:$4 sm:$0xff]  }
 0x1b4   :  { %4135 = vmatpush2.bf16.msra.mxu1 %v6362_v44  ;;  %4095 = vmatprep.subr.bf16.mxu0 %v6367_v7  ;;  %v6425_v44 = vld [vmem:[%s8912_s1 + $0xa08] ss:$16 sps:$4 sm:$0xff]  }
 0x1b5   :  { %4136 = vmatprep.subr.bf16.mxu1 %v6370_v16  ;;  %v6428_v7 = vld [vmem:[%s8912_s1 + $0xc08] ss:$16 sps:$4 sm:$0xff]   ;;  %v6433_v16 = vld [vmem:[%s8912_s1 + $0xbec] ss:$16 sps:$4 sm:$0xff]  }
 0x1b7   :  { %4096 = vmatpush2.bf16.msra.mxu0 %v6365_v45  ;;  %v6436_v45 = vld [vmem:[%s8912_s1 + $0xdec] ss:$16 sps:$4 sm:$0xff]  }
 0x1b8   :  { %4137 = vmatpush2.bf16.msra.mxu1 %v6368_v46  ;;  %4097 = vmatprep.subr.bf16.mxu0 %v6373_v48  ;;  %v6431_v46 = vld [vmem:[%s8912_s1 + $0xbe8] ss:$16 sps:$4 sm:$0xff]  }
 0x1b9   :  { %4138 = vmatprep.subr.bf16.mxu1 %v6376_v50  ;;  %v6434_v48 = vld [vmem:[%s8912_s1 + $0xde8] ss:$16 sps:$4 sm:$0xff]   ;;  %v6439_v50 = vld [vmem:[%s8912_s1 + $0xbcc] ss:$16 sps:$4 sm:$0xff]  }
 0x1bb   :  { %4098 = vmatpush2.bf16.msra.mxu0 %v6371_v52  ;;  %v6442_v52 = vld [vmem:[%s8912_s1 + $0xdcc] ss:$16 sps:$4 sm:$0xff]  }
 0x1bc   :  { %4139 = vmatpush2.bf16.msra.mxu1 %v6374_v54  ;;  %4099 = vmatprep.subr.bf16.mxu0 %v6379_v12  ;;  %v6437_v54 = vld [vmem:[%s8912_s1 + $0xbc8] ss:$16 sps:$4 sm:$0xff]  }
 0x1bd   :  { %4140 = vmatprep.subr.bf16.mxu1 %v6382_v37  ;;  %v6440_v12 = vld [vmem:[%s8912_s1 + $0xdc8] ss:$16 sps:$4 sm:$0xff]   ;;  %v6445_v37 = vld [vmem:[%s8912_s1 + $0xbac] ss:$16 sps:$4 sm:$0xff]  }
 0x1bf   :  { %4100 = vmatpush2.bf16.msra.mxu0 %v6377_v24  ;;  %v6448_v24 = vld [vmem:[%s8912_s1 + $0xdac] ss:$16 sps:$4 sm:$0xff]  }
 0x1c0   :  { %4141 = vmatpush2.bf16.msra.mxu1 %v6380_v56  ;;  %4151 = vmatprep.subr.bf16.mxu0 %v6385_v57  ;;  %v6443_v56 = vld [vmem:[%s8912_s1 + $0xba8] ss:$16 sps:$4 sm:$0xff]  }
 0x1c1   :  { %4192 = vmatprep.subr.bf16.mxu1 %v6388_v58  ;;  %v6446_v57 = vld [vmem:[%s8912_s1 + $0xda8] ss:$16 sps:$4 sm:$0xff]   ;;  %v6451_v58 = vld [vmem:[%s8912_s1 + $0xb8c] ss:$16 sps:$4 sm:$0xff]  }
 0x1c2   :  { %v3857_v40 = vpop.f32.mrf.mxu0  ;;  %4102 = vmatmul.mubr.bf16.vlgmr.msra.gmra.mxu0 %v7166_v17 }
 0x1c3   :  { %v3898_v4 = vpop.f32.mrf.mxu1  ;;  %4143 = vmatmul.mubr.bf16.vlgmr.msra.gmra.mxu1 %v7392_v38  ;;  %v3858_v20 = vadd.f32 %v3857_v40, %v8065_v5  ;;  %4152 = vmatpush1.bf16.msra.mxu0 %v6383_v1  ;;  %v6395_v38 = vld [vmem:[%s8912_s1 + $0xaa8] ss:$16 sps:$4 sm:$0xff]   ;;  %v6454_v1 = vld [vmem:[%s8912_s1 + $0xd8c] ss:$16 sps:$4 sm:$0xff]  }
 0x1c4   :  { %4193 = vmatpush1.bf16.msra.mxu1 %v6386_v60  ;;  %v3859_v9 = vpop.f32.mrf.mxu0  ;;  %4153 = vmatprep.subr.bf16.mxu0 %v6391_v61  ;;  %v6398_v5 = vld [vmem:[%s8912_s1 + $0xca8] ss:$16 sps:$4 sm:$0xff]  }
 0x1c5   :  { %v3900_v10 = vpop.f32.mrf.mxu1  ;;  %4194 = vmatprep.subr.bf16.mxu1 %v6394_v2  ;;  %v8267_v13 = vadd.f32 %v3898_v4, %v3858_v20  ;;  %v3860_v17 = vadd.f32 %v3859_v9, %v8070_v49  ;;  %4183 = vmatprep.mubr.bf16.mxu0 %v7196_v25  ;;  %v6406_v25 = vld [vmem:[%s8912_s1 + $0xc8c] ss:$16 sps:$4 sm:$0xff]   ;;  %v6449_v60 = vld [vmem:[%s8912_s1 + $0xb88] ss:$16 sps:$4 sm:$0xff]  }
 0x1c6   :  { %4224 = vmatprep.mubr.bf16.mxu1 %v7414_v42  ;;  %v3861_v28 = vpop.f32.mrf.mxu0  ;;  %v6401_v42 = vld [vmem:[%s8912_s1 + $0xa88] ss:$16 sps:$4 sm:$0xff]   ;;  %v6457_v2 = vld [vmem:[%s8912_s1 + $0xb6c] ss:$16 sps:$4 sm:$0xff]  }
 0x1c7   :  { %v3902_v14 = vpop.f32.mrf.mxu1  ;;  %v8278_v51 = vadd.f32 %v3900_v10, %v3860_v17  ;;  %4154 = vmatpush1.bf16.msra.mxu0 %v6389_v3  ;;  %v6452_v61 = vld [vmem:[%s8912_s1 + $0xd88] ss:$16 sps:$4 sm:$0xff]   ;;  %v6460_v3 = vld [vmem:[%s8912_s1 + $0xd6c] ss:$16 sps:$4 sm:$0xff]  }
 0x1c8   :  { %4195 = vmatpush1.bf16.msra.mxu1 %v6392_v35  ;;  %v3862_v36 = vpop.f32.mrf.mxu0  ;;  %4155 = vmatprep.subr.bf16.mxu0 %v6397_v6  ;;  %v6455_v35 = vld [vmem:[%s8912_s1 + $0xb68] ss:$16 sps:$4 sm:$0xff]   ;;  %v6463_v4 = vld [vmem:[%s8912_s1 + $0xb4c] ss:$16 sps:$4 sm:$0xff]  }
 0x1c9   :  { %v3903_v49 = vpop.f32.mrf.mxu1  ;;  %4196 = vmatprep.subr.bf16.mxu1 %v6400_v11  ;;  %v6458_v40 = vld [vmem:[%s8912_s1 + $0xd68] ss:$16 sps:$4 sm:$0xff]   ;;  %v6466_v6 = vld [vmem:[%s8912_s1 + $0xd4c] ss:$16 sps:$4 sm:$0xff]  }
 0x1ca   :  { %v6461_v20 = vld [vmem:[%s8912_s1 + $0xb48] ss:$16 sps:$4 sm:$0xff]   ;;  %v6469_v10 = vld [vmem:[%s8912_s1 + $0xb2c] ss:$16 sps:$4 sm:$0xff]  }
 0x1cb   :  { %4156 = vmatpush1.bf16.msra.mxu0 %v6395_v38  ;;  %v6464_v9 = vld [vmem:[%s8912_s1 + $0xd48] ss:$16 sps:$4 sm:$0xff]   ;;  %v6472_v11 = vld [vmem:[%s8912_s1 + $0xd2c] ss:$16 sps:$4 sm:$0xff]  }
 0x1cc   :  { %4197 = vmatpush1.bf16.msra.mxu1 %v6398_v5  ;;  %4157 = vmatprep.subr.bf16.mxu0 %v6403_v15  ;;  %v6467_v17 = vld [vmem:[%s8912_s1 + $0xb28] ss:$16 sps:$4 sm:$0xff]   ;;  %v6475_v5 = vld [vmem:[%s8912_s1 + $0xb0c] ss:$16 sps:$4 sm:$0xff]  }
 0x1cd   :  { %4198 = vmatprep.subr.bf16.mxu1 %v6406_v25  ;;  %v6470_v38 = vld [vmem:[%s8912_s1 + $0xd28] ss:$16 sps:$4 sm:$0xff]   ;;  %v6478_v28 = vld [vmem:[%s8912_s1 + $0xd0c] ss:$16 sps:$4 sm:$0xff]  }
 0x1ce   :  { %v6473_v14 = vld [vmem:[%s8912_s1 + $0xb08] ss:$16 sps:$4 sm:$0xff]   ;;  %v6481_v49 = vld [vmem:[%s8912_s1 + $0xeec] ss:$16 sps:$4 sm:$0xff]  }
 0x1cf   :  { %4158 = vmatpush1.bf16.msra.mxu0 %v6401_v42  ;;  %v6476_v36 = vld [vmem:[%s8912_s1 + $0xd08] ss:$16 sps:$4 sm:$0xff]   ;;  %v6484_v15 = vld [vmem:[%s8912_s1 + $0x10ec] ss:$16 sps:$4 sm:$0xff]  }
 0x1d0   :  { %4199 = vmatpush1.bf16.msra.mxu1 %v6404_v18  ;;  %4159 = vmatprep.subr.bf16.mxu0 %v6409_v19  ;;  %v6479_v25 = vld [vmem:[%s8912_s1 + $0xee8] ss:$16 sps:$4 sm:$0xff]   ;;  %v6487_v18 = vld [vmem:[%s8912_s1 + $0xecc] ss:$16 sps:$4 sm:$0xff]  }
 0x1d1   :  { %4200 = vmatprep.subr.bf16.mxu1 %v6412_v21  ;;  %v6482_v42 = vld [vmem:[%s8912_s1 + $0x10e8] ss:$16 sps:$4 sm:$0xff]   ;;  %v6490_v19 = vld [vmem:[%s8912_s1 + $0x10cc] ss:$16 sps:$4 sm:$0xff]  }
 0x1d3   :  { %4160 = vmatpush1.bf16.msra.mxu0 %v6407_v26 }
 0x1d4   :  { %4201 = vmatpush1.bf16.msra.mxu1 %v6410_v27  ;;  %4161 = vmatprep.subr.bf16.mxu0 %v6415_v29  ;;  %v6485_v29 = vld [vmem:[%s8912_s1 + $0xec8] ss:$16 sps:$4 sm:$0xff]  }
 0x1d5   :  { %4202 = vmatprep.subr.bf16.mxu1 %v6418_v30  ;;  %v6488_v30 = vld [vmem:[%s8912_s1 + $0x10c8] ss:$16 sps:$4 sm:$0xff]  }
 0x1d7   :  { %4162 = vmatpush1.bf16.msra.mxu0 %v6413_v31 }
 0x1d8   :  { %4203 = vmatpush1.bf16.msra.mxu1 %v6416_v32  ;;  %4163 = vmatprep.subr.bf16.mxu0 %v6421_v47 }
 0x1d9   :  { %4204 = vmatprep.subr.bf16.mxu1 %v6424_v33  ;;  %v6491_v33 = vld [vmem:[%s8912_s1 + $0xea8] ss:$16 sps:$4 sm:$0xff]  }
 0x1db   :  { %4164 = vmatpush1.bf16.msra.mxu0 %v6419_v34  ;;  %v6494_v34 = vld [vmem:[%s8912_s1 + $0x10a8] ss:$16 sps:$4 sm:$0xff]  }
 0x1dc   :  { %4205 = vmatpush1.bf16.msra.mxu1 %v6422_v41  ;;  %4165 = vmatprep.subr.bf16.mxu0 %v6427_v22 }
 0x1dd   :  { %4206 = vmatprep.subr.bf16.mxu1 %v6430_v23  ;;  %v6497_v23 = vld [vmem:[%s8912_s1 + $0xe88] ss:$16 sps:$4 sm:$0xff]  }
 0x1df   :  { %4166 = vmatpush1.bf16.msra.mxu0 %v6425_v44  ;;  %v6500_v44 = vld [vmem:[%s8912_s1 + $0x1088] ss:$16 sps:$4 sm:$0xff]  }
 0x1e0   :  { %4207 = vmatpush1.bf16.msra.mxu1 %v6428_v7  ;;  %4167 = vmatprep.subr.bf16.mxu0 %v6433_v16  ;;  %v6505_v7 = vld [vmem:[%s8912_s1 + $0xe6c] ss:$16 sps:$4 sm:$0xff]  }
 0x1e1   :  { %4208 = vmatprep.subr.bf16.mxu1 %v6436_v45  ;;  %v6508_v16 = vld [vmem:[%s8912_s1 + $0x106c] ss:$16 sps:$4 sm:$0xff]   ;;  %v6503_v45 = vld [vmem:[%s8912_s1 + $0xe68] ss:$16 sps:$4 sm:$0xff]  }
 0x1e3   :  { %4168 = vmatpush2.bf16.msra.mxu0 %v6431_v46  ;;  %v6506_v46 = vld [vmem:[%s8912_s1 + $0x1068] ss:$16 sps:$4 sm:$0xff]  }
 0x1e4   :  { %4209 = vmatpush2.bf16.msra.mxu1 %v6434_v48  ;;  %4169 = vmatprep.subr.bf16.mxu0 %v6439_v50  ;;  %v6511_v48 = vld [vmem:[%s8912_s1 + $0xe4c] ss:$16 sps:$4 sm:$0xff]  }
 0x1e5   :  { %4210 = vmatprep.subr.bf16.mxu1 %v6442_v52  ;;  %v6514_v50 = vld [vmem:[%s8912_s1 + $0x104c] ss:$16 sps:$4 sm:$0xff]   ;;  %v6509_v52 = vld [vmem:[%s8912_s1 + $0xe48] ss:$16 sps:$4 sm:$0xff]  }
 0x1e7   :  { %4170 = vmatpush2.bf16.msra.mxu0 %v6437_v54  ;;  %v6512_v54 = vld [vmem:[%s8912_s1 + $0x1048] ss:$16 sps:$4 sm:$0xff]  }
 0x1e8   :  { %4211 = vmatpush2.bf16.msra.mxu1 %v6440_v12  ;;  %4171 = vmatprep.subr.bf16.mxu0 %v6445_v37  ;;  %v6517_v12 = vld [vmem:[%s8912_s1 + $0xe2c] ss:$16 sps:$4 sm:$0xff]  }
 0x1e9   :  { %4212 = vmatprep.subr.bf16.mxu1 %v6448_v24  ;;  %v6520_v37 = vld [vmem:[%s8912_s1 + $0x102c] ss:$16 sps:$4 sm:$0xff]   ;;  %v6515_v24 = vld [vmem:[%s8912_s1 + $0xe28] ss:$16 sps:$4 sm:$0xff]  }
 0x1eb   :  { %4172 = vmatpush2.bf16.msra.mxu0 %v6443_v56  ;;  %v6518_v56 = vld [vmem:[%s8912_s1 + $0x1028] ss:$16 sps:$4 sm:$0xff]  }
 0x1ec   :  { %4213 = vmatpush2.bf16.msra.mxu1 %v6446_v57  ;;  %4173 = vmatprep.subr.bf16.mxu0 %v6451_v58  ;;  %v6523_v57 = vld [vmem:[%s8912_s1 + $0xe0c] ss:$16 sps:$4 sm:$0xff]  }
 0x1ed   :  { %4214 = vmatprep.subr.bf16.mxu1 %v6454_v1  ;;  %v6526_v58 = vld [vmem:[%s8912_s1 + $0x100c] ss:$16 sps:$4 sm:$0xff]   ;;  %v6521_v1 = vld [vmem:[%s8912_s1 + $0xe08] ss:$16 sps:$4 sm:$0xff]  }
 0x1ef   :  { %4174 = vmatpush2.bf16.msra.mxu0 %v6449_v60  ;;  %v6524_v60 = vld [vmem:[%s8912_s1 + $0x1008] ss:$16 sps:$4 sm:$0xff]  }
 0x1f0   :  { %4215 = vmatpush2.bf16.msra.mxu1 %v6452_v61  ;;  %4175 = vmatprep.subr.bf16.mxu0 %v6457_v2  ;;  %v6529_v61 = vld [vmem:[%s8912_s1 + $0xfec] ss:$16 sps:$4 sm:$0xff]  }
 0x1f1   :  { %4216 = vmatprep.subr.bf16.mxu1 %v6460_v3  ;;  %v6532_v2 = vld [vmem:[%s8912_s1 + $0x11ec] ss:$16 sps:$4 sm:$0xff]   ;;  %v6527_v3 = vld [vmem:[%s8912_s1 + $0xfe8] ss:$16 sps:$4 sm:$0xff]  }
 0x1f3   :  { %4176 = vmatpush2.bf16.msra.mxu0 %v6455_v35  ;;  %v6530_v35 = vld [vmem:[%s8912_s1 + $0x11e8] ss:$16 sps:$4 sm:$0xff]  }
 0x1f4   :  { %4217 = vmatpush2.bf16.msra.mxu1 %v6458_v40  ;;  %4177 = vmatprep.subr.bf16.mxu0 %v6463_v4  ;;  %v6535_v40 = vld [vmem:[%s8912_s1 + $0xfcc] ss:$16 sps:$4 sm:$0xff]  }
 0x1f5   :  { %4218 = vmatprep.subr.bf16.mxu1 %v6466_v6  ;;  %v6538_v4 = vld [vmem:[%s8912_s1 + $0x11cc] ss:$16 sps:$4 sm:$0xff]   ;;  %v6533_v6 = vld [vmem:[%s8912_s1 + $0xfc8] ss:$16 sps:$4 sm:$0xff]  }
 0x1f7   :  { %4178 = vmatpush2.bf16.msra.mxu0 %v6461_v20  ;;  %v6536_v20 = vld [vmem:[%s8912_s1 + $0x11c8] ss:$16 sps:$4 sm:$0xff]  }
 0x1f8   :  { %4219 = vmatpush2.bf16.msra.mxu1 %v6464_v9  ;;  %4179 = vmatprep.subr.bf16.mxu0 %v6469_v10  ;;  %v6541_v9 = vld [vmem:[%s8912_s1 + $0xfac] ss:$16 sps:$4 sm:$0xff]  }
 0x1f9   :  { %4220 = vmatprep.subr.bf16.mxu1 %v6472_v11  ;;  %v6544_v10 = vld [vmem:[%s8912_s1 + $0x11ac] ss:$16 sps:$4 sm:$0xff]   ;;  %v6539_v11 = vld [vmem:[%s8912_s1 + $0xfa8] ss:$16 sps:$4 sm:$0xff]  }
 0x1fb   :  { %4180 = vmatpush2.bf16.msra.mxu0 %v6467_v17  ;;  %v6542_v17 = vld [vmem:[%s8912_s1 + $0x11a8] ss:$16 sps:$4 sm:$0xff]  }
 0x1fc   :  { %4221 = vmatpush2.bf16.msra.mxu1 %v6470_v38  ;;  %4181 = vmatprep.subr.bf16.mxu0 %v6475_v5  ;;  %v6547_v38 = vld [vmem:[%s8912_s1 + $0xf8c] ss:$16 sps:$4 sm:$0xff]  }
 0x1fd   :  { %4222 = vmatprep.subr.bf16.mxu1 %v6478_v28  ;;  %v6550_v5 = vld [vmem:[%s8912_s1 + $0x118c] ss:$16 sps:$4 sm:$0xff]   ;;  %v6545_v28 = vld [vmem:[%s8912_s1 + $0xf88] ss:$16 sps:$4 sm:$0xff]  }
 0x1ff   :  { %4182 = vmatpush2.bf16.msra.mxu0 %v6473_v14  ;;  %v6548_v14 = vld [vmem:[%s8912_s1 + $0x1188] ss:$16 sps:$4 sm:$0xff]  }
 0x200   :  { %4223 = vmatpush2.bf16.msra.mxu1 %v6476_v36  ;;  %4233 = vmatprep.subr.bf16.mxu0 %v6481_v49  ;;  %v6553_v36 = vld [vmem:[%s8912_s1 + $0xf6c] ss:$16 sps:$4 sm:$0xff]  }
 0x201   :  { %4274 = vmatprep.subr.bf16.mxu1 %v6484_v15  ;;  %v6556_v49 = vld [vmem:[%s8912_s1 + $0x116c] ss:$16 sps:$4 sm:$0xff]   ;;  %v6551_v15 = vld [vmem:[%s8912_s1 + $0xf68] ss:$16 sps:$4 sm:$0xff]  }
 0x202   :  { %v3939_v21 = vpop.f32.mrf.mxu0  ;;  %4184 = vmatmul.mubr.bf16.vlgmr.msra.gmra.mxu0 %v7396_v39  ;;  %v6493_v39 = vld [vmem:[%s8912_s1 + $0xeac] ss:$16 sps:$4 sm:$0xff]  }
 0x203   :  { %v8454_v26 = vpop.f32.mrf.mxu1  ;;  %4225 = vmatmul.mubr.bf16.vlgmr.msra.gmra.mxu1 %v7613_v63  ;;  %v8459_v27 = vadd.f32 %v3939_v21, %v8267_v13  ;;  %4234 = vmatpush1.bf16.msra.mxu0 %v6479_v25  ;;  %v6496_v63 = vld [vmem:[%s8912_s1 + $0x10ac] ss:$16 sps:$4 sm:$0xff]   ;;  %v6554_v25 = vld [vmem:[%s8912_s1 + $0x1168] ss:$16 sps:$4 sm:$0xff]  }
 0x204   :  { %4275 = vmatpush1.bf16.msra.mxu1 %v6482_v42  ;;  %v8467_v31 = vpop.f32.mrf.mxu0  ;;  %4235 = vmatprep.subr.bf16.mxu0 %v6487_v18  ;;  %v6559_v42 = vld [vmem:[%s8912_s1 + $0xf4c] ss:$16 sps:$4 sm:$0xff]   ;;  %v6560_v21 = vld [vmem:[%s8912_s1 + $0x1148] ss:$16 sps:$4 sm:$0xff]  }
 0x205   :  { %v8469_v32 = vpop.f32.mrf.mxu1  ;;  %4276 = vmatprep.subr.bf16.mxu1 %v6490_v19  ;;  %4265 = vmatprep.mubr.bf16.mxu0 %v7418_v43  ;;  %v6499_v43 = vld [vmem:[%s8912_s1 + $0xe8c] ss:$16 sps:$4 sm:$0xff]   ;;  %v6557_v19 = vld [vmem:[%s8912_s1 + $0xf48] ss:$16 sps:$4 sm:$0xff]  }
 0x206   :  { %4306 = vmatprep.mubr.bf16.mxu1 %v7642_v8  ;;  %v3943_v13 = vpop.f32.mrf.mxu0  ;;  %v6502_v8 = vld [vmem:[%s8912_s1 + $0x108c] ss:$16 sps:$4 sm:$0xff]  }
 0x207   :  { %v3984_v47 = vpop.f32.mrf.mxu1  ;;  %4236 = vmatpush1.bf16.msra.mxu0 %v6485_v29  ;;  %v6562_v18 = vld [vmem:[%s8912_s1 + $0x114c] ss:$16 sps:$4 sm:$0xff]  }
 0x208   :  { %4277 = vmatpush1.bf16.msra.mxu1 %v6488_v30  ;;  %v3944_v41 = vpop.f32.mrf.mxu0  ;;  %4237 = vmatprep.subr.bf16.mxu0 %v6493_v39  ;;  %v6565_v29 = vld [vmem:[%s8912_s1 + $0xf2c] ss:$16 sps:$4 sm:$0xff]   ;;  %v6563_v39 = vld [vmem:[%s8912_s1 + $0xf28] ss:$16 sps:$4 sm:$0xff]  }
 0x209   :  { %v3985_v22 = vpop.f32.mrf.mxu1  ;;  %4278 = vmatprep.subr.bf16.mxu1 %v6496_v63  ;;  %v6568_v30 = vld [vmem:[%s8912_s1 + $0x112c] ss:$16 sps:$4 sm:$0xff]   ;;  %v6566_v63 = vld [vmem:[%s8912_s1 + $0x1128] ss:$16 sps:$4 sm:$0xff]   ;;  %v628_v41 = vsub.s32 3, %v7586_v53 }
 0x20a   :  { %v6571_v13 = vld [vmem:[%s8912_s1 + $0xf0c] ss:$16 sps:$4 sm:$0xff]   ;;  %v6569_v22 = vld [vmem:[%s8912_s1 + $0xf08] ss:$16 sps:$4 sm:$0xff]  }
 0x20b   :  { %4238 = vmatpush1.bf16.msra.mxu0 %v6491_v33  ;;  %v6574_v47 = vld [vmem:[%s8912_s1 + $0x110c] ss:$16 sps:$4 sm:$0xff]   ;;  %v624_v33 = vsub.s32 2, %v7586_v53  ;;  %v5654_v53 = vld [vmem:[%s8918_s6] ss:$0 sm:$0xff] }
 0x20c   :  { %4279 = vmatpush1.bf16.msra.mxu1 %v6494_v34  ;;  %4239 = vmatprep.subr.bf16.mxu0 %v6499_v43  ;;  %v3942_v34 = vadd.f32 %v8467_v31, %v8278_v51  ;;  %v6572_v43 = vld [vmem:[%s8912_s1 + $0x1108] ss:$16 sps:$4 sm:$0xff]   ;;  %v6691_v51 = vld [vmem:[%s8914_s2] sm:$0xf] }
 0x20d   :  { %4280 = vmatprep.subr.bf16.mxu1 %v6502_v8  ;;  %v6577_v8 = vld [vmem:[%s8915_s3 + $0x74] ss:$8 sps:$4 sm:$0xff]   ;;  %v625_v31 = vrot.slane %v6691_v51, %v624_v33 }
 0x20e   :  { %v6607_v33 = vld [vmem:[%s8915_s3 + $0xd4] ss:$8 sps:$4 sm:$0xff]  }
 0x20f   :  { %4240 = vmatpush1.bf16.msra.mxu0 %v6497_v23  ;;  %v4316_v23 = vmax.f32 %v3942_v34, 0.0  ;;  %v6649_v34 = vld [vmem:[%s8915_s3 + $0x1f4] ss:$8 sps:$4 sm:$0xff]  }
 0x210   :  { %4281 = vmatpush1.bf16.msra.mxu1 %v6500_v44  ;;  %4241 = vmatprep.subr.bf16.mxu0 %v6505_v7  ;;  %v629_v44 = vrot.slane %v6691_v51, %v628_v41  ;;  %v6575_v7 = vld [vmem:[%s8915_s3 + $0x70] ss:$8 sps:$4 sm:$0xff]   ;;  %v6608_v51 = vld [vmem:[%s8915_s3 + $0xc0] ss:$8 sps:$4 sm:$0xff]  }
 0x211   :  { %4282 = vmatprep.subr.bf16.mxu1 %v6508_v16  ;;  %v6580_v16 = vld [vmem:[%s8915_s3 + $0x64] ss:$8 sps:$4 sm:$0xff]   ;;  %v6605_v41 = vld [vmem:[%s8915_s3 + $0xd0] ss:$8 sps:$4 sm:$0xff]  }
 0x213   :  { %4242 = vmatpush1.bf16.msra.mxu0 %v6503_v45  ;;  %v3981_v45 = vadd.f32 %v8454_v26, %v625_v31  ;;  %v6583_v26 = vld [vmem:[%s8915_s3 + $0x54] ss:$8 sps:$4 sm:$0xff]   ;;  %v6650_v31 = vld [vmem:[%s8915_s3 + $0x1e0] ss:$8 sps:$4 sm:$0xff]  }
 0x214   :  { %4283 = vmatpush1.bf16.msra.mxu1 %v6506_v46  ;;  %4243 = vmatprep.subr.bf16.mxu0 %v6511_v48  ;;  %v4320_v46 = vpack.c.bf16 %v4316_v23, %v4316_v23  ;;  %v6613_v23 = vld [vmem:[%s8915_s3 + $0xb4] ss:$8 sps:$4 sm:$0xff]  }
 0x215   :  { %4284 = vmatprep.subr.bf16.mxu1 %v6514_v50 }
 0x217   :  { %4244 = vmatpush1.bf16.msra.mxu0 %v6509_v52  ;;  %v3983_v52 = vadd.f32 %v8469_v32, %v629_v44  ;;  %v6655_v44 = vld [vmem:[%s8915_s3 + $0x1d4] ss:$8 sps:$4 sm:$0xff]  }
 0x218   :  { %4285 = vmatpush1.bf16.msra.mxu1 %v6512_v54  ;;  %4245 = vmatprep.subr.bf16.mxu0 %v6517_v12  ;;  %v6578_v12 = vld [vmem:[%s8915_s3 + $0x60] ss:$8 sps:$4 sm:$0xff]  }
 0x219   :  { %4286 = vmatprep.subr.bf16.mxu1 %v6520_v37 }
 0x21b   :  { %4246 = vmatpush1.bf16.msra.mxu0 %v6515_v24 }
 0x21c   :  { %4287 = vmatpush1.bf16.msra.mxu1 %v6518_v56  ;;  %4247 = vmatprep.subr.bf16.mxu0 %v6523_v57 }
 0x21d   :  { %4288 = vmatprep.subr.bf16.mxu1 %v6526_v58  ;;  %v6581_v58 = vld [vmem:[%s8915_s3 + $0x50] ss:$8 sps:$4 sm:$0xff]  }
 0x21f   :  { %4248 = vmatpush1.bf16.msra.mxu0 %v6521_v1 }
 0x220   :  { %4289 = vmatpush1.bf16.msra.mxu1 %v6524_v60  ;;  %4249 = vmatprep.subr.bf16.mxu0 %v6529_v61  ;;  %v6586_v61 = vld [vmem:[%s8915_s3 + $0x44] ss:$8 sps:$4 sm:$0xff]  }
 0x221   :  { %4290 = vmatprep.subr.bf16.mxu1 %v6532_v2  ;;  %v6623_v2 = vld [vmem:[%s8915_s3 + $0x170] ss:$8 sps:$4 sm:$0xff]  }
 0x223   :  { %4250 = vmatpush2.bf16.msra.mxu0 %v6527_v3  ;;  %v6625_v3 = vld [vmem:[%s8915_s3 + $0x174] ss:$8 sps:$4 sm:$0xff]  }
 0x224   :  { %4291 = vmatpush2.bf16.msra.mxu1 %v6530_v35  ;;  %4251 = vmatprep.subr.bf16.mxu0 %v6535_v40  ;;  %v6628_v35 = vld [vmem:[%s8915_s3 + $0x164] ss:$8 sps:$4 sm:$0xff]   ;;  %v6584_v40 = vld [vmem:[%s8915_s3 + $0x40] ss:$8 sps:$4 sm:$0xff]  }
 0x225   :  { %4292 = vmatprep.subr.bf16.mxu1 %v6538_v4  ;;  %v6626_v4 = vld [vmem:[%s8915_s3 + $0x160] ss:$8 sps:$4 sm:$0xff]  }
 0x227   :  { %4252 = vmatpush2.bf16.msra.mxu0 %v6533_v6  ;;  %v6589_v6 = vld [vmem:[%s8915_s3 + $0x34] ss:$8 sps:$4 sm:$0xff]  }
 0x228   :  { %4293 = vmatpush2.bf16.msra.mxu1 %v6536_v20  ;;  %4253 = vmatprep.subr.bf16.mxu0 %v6541_v9  ;;  %v6631_v20 = vld [vmem:[%s8915_s3 + $0x154] ss:$8 sps:$4 sm:$0xff]   ;;  %v6587_v9 = vld [vmem:[%s8915_s3 + $0x30] ss:$8 sps:$4 sm:$0xff]  }
 0x229   :  { %4294 = vmatprep.subr.bf16.mxu1 %v6544_v10  ;;  %v6629_v10 = vld [vmem:[%s8915_s3 + $0x150] ss:$8 sps:$4 sm:$0xff]  }
 0x22b   :  { %4254 = vmatpush2.bf16.msra.mxu0 %v6539_v11  ;;  %v6592_v11 = vld [vmem:[%s8915_s3 + $0x24] ss:$8 sps:$4 sm:$0xff]  }
 0x22c   :  { %4295 = vmatpush2.bf16.msra.mxu1 %v6542_v17  ;;  %4255 = vmatprep.subr.bf16.mxu0 %v6547_v38  ;;  %v6634_v17 = vld [vmem:[%s8915_s3 + $0x144] ss:$8 sps:$4 sm:$0xff]   ;;  %v6590_v38 = vld [vmem:[%s8915_s3 + $0x20] ss:$8 sps:$4 sm:$0xff]  }
 0x22d   :  { %4296 = vmatprep.subr.bf16.mxu1 %v6550_v5  ;;  %v6632_v5 = vld [vmem:[%s8915_s3 + $0x140] ss:$8 sps:$4 sm:$0xff]  }
 0x22f   :  { %4256 = vmatpush2.bf16.msra.mxu0 %v6545_v28  ;;  %v6595_v28 = vld [vmem:[%s8915_s3 + $0x14] ss:$8 sps:$4 sm:$0xff]  }
 0x230   :  { %4297 = vmatpush2.bf16.msra.mxu1 %v6548_v14  ;;  %4257 = vmatprep.subr.bf16.mxu0 %v6553_v36  ;;  %v6637_v14 = vld [vmem:[%s8915_s3 + $0x134] ss:$8 sps:$4 sm:$0xff]   ;;  %v6593_v36 = vld [vmem:[%s8915_s3 + $0x10] ss:$8 sps:$4 sm:$0xff]  }
 0x231   :  { %4298 = vmatprep.subr.bf16.mxu1 %v6556_v49  ;;  %v6635_v49 = vld [vmem:[%s8915_s3 + $0x130] ss:$8 sps:$4 sm:$0xff]  }
 0x233   :  { %4258 = vmatpush2.bf16.msra.mxu0 %v6551_v15  ;;  %v6598_v15 = vld [vmem:[%s8915_s3 + $0x4] ss:$8 sps:$4 sm:$0xff]  }
 0x234   :  { %4299 = vmatpush2.bf16.msra.mxu1 %v6554_v25  ;;  %4259 = vmatprep.subr.bf16.mxu0 %v6559_v42  ;;  %v6640_v25 = vld [vmem:[%s8915_s3 + $0x124] ss:$8 sps:$4 sm:$0xff]   ;;  %v6596_v42 = vld [vmem:[%s8915_s3] ss:$8 sps:$4 sm:$0xff]  }
 0x235   :  { %4300 = vmatprep.subr.bf16.mxu1 %v6562_v18  ;;  %v6638_v18 = vld [vmem:[%s8915_s3 + $0x120] ss:$8 sps:$4 sm:$0xff]  }
 0x237   :  { %4260 = vmatpush2.bf16.msra.mxu0 %v6557_v19  ;;  %v6601_v19 = vld [vmem:[%s8915_s3 + $0xf4] ss:$8 sps:$4 sm:$0xff]  }
 0x238   :  { %4301 = vmatpush2.bf16.msra.mxu1 %v6560_v21  ;;  %4261 = vmatprep.subr.bf16.mxu0 %v6565_v29  ;;  %v6643_v21 = vld [vmem:[%s8915_s3 + $0x114] ss:$8 sps:$4 sm:$0xff]   ;;  %v6599_v29 = vld [vmem:[%s8915_s3 + $0xf0] ss:$8 sps:$4 sm:$0xff]  }
 0x239   :  { %4302 = vmatprep.subr.bf16.mxu1 %v6568_v30  ;;  %v6641_v30 = vld [vmem:[%s8915_s3 + $0x110] ss:$8 sps:$4 sm:$0xff]  }
 0x23b   :  { %4262 = vmatpush2.bf16.msra.mxu0 %v6563_v39  ;;  %v6604_v39 = vld [vmem:[%s8915_s3 + $0xe4] ss:$8 sps:$4 sm:$0xff]  }
 0x23c   :  { %4303 = vmatpush2.bf16.msra.mxu1 %v6566_v63  ;;  %4263 = vmatprep.subr.bf16.mxu0 %v6571_v13  ;;  %v6646_v63 = vld [vmem:[%s8915_s3 + $0x104] ss:$8 sps:$4 sm:$0xff]   ;;  %v6602_v13 = vld [vmem:[%s8915_s3 + $0xe0] ss:$8 sps:$4 sm:$0xff]  }
 0x23d   :  { %4304 = vmatprep.subr.bf16.mxu1 %v6574_v47  ;;  %v6644_v47 = vld [vmem:[%s8915_s3 + $0x100] ss:$8 sps:$4 sm:$0xff]  }
 0x23f   :  { %4264 = vmatpush2.bf16.msra.mxu0 %v6569_v22  ;;  %v6647_v22 = vld [vmem:[%s8915_s3 + $0x1f0] ss:$8 sps:$4 sm:$0xff]  }
 0x240   :  { %4305 = vmatpush2.bf16.msra.mxu1 %v6572_v43  ;;  %4719 = vmatprep.subr.bf16.mxu0 %v6577_v8  ;;  %v6610_v43 = vld [vmem:[%s8915_s3 + $0xc4] ss:$8 sps:$4 sm:$0xff]  }
 0x241   :  { %4760 = vmatprep.subr.bf16.mxu1 %v6625_v3  ;;  %v6652_v8 = vld [vmem:[%s8915_s3 + $0x1e4] ss:$8 sps:$4 sm:$0xff]   ;;  %v6667_v3 = vld [vmem:[%s8915_s3 + $0x194] ss:$8 sps:$4 sm:$0xff]  }
 0x242   :  { %v4021_v48 = vpop.f32.mrf.mxu0  ;;  %4266 = vmatmul.mubr.bf16.vlgmr.msra.gmra.mxu0 %v7617_v0 }
 0x243   :  { %v4062_v50 = vpop.f32.mrf.mxu1  ;;  %4307 = vmatmul.mubr.bf16.vlgmr.msra.gmra.mxu1 %v7840_v55  ;;  %v4022_v54 = vadd.f32 %v4021_v48, %v3981_v45  ;;  %4720 = vmatpush1.bf16.msra.mxu0 %v6575_v7  ;;  %v6611_v7 = vld [vmem:[%s8915_s3 + $0xb0] ss:$8 sps:$4 sm:$0xff]   ;;  %v6616_v45 = vld [vmem:[%s8915_s3 + $0xa4] ss:$8 sps:$4 sm:$0xff]   ;;  %v6614_v48 = vld [vmem:[%s8915_s3 + $0xa0] ss:$8 sps:$4 sm:$0xff]  }
 0x244   :  { %4751 = vmatprep.mubr.bf16.mxu0 %v4320_v46  ;;  %v4023_v37 = vpop.f32.mrf.mxu0  ;;  %4721 = vmatprep.subr.bf16.mxu0 %v6580_v16  ;;  %v6653_v16 = vld [vmem:[%s8915_s3 + $0x1d0] ss:$8 sps:$4 sm:$0xff]   ;;  %v6658_v46 = vld [vmem:[%s8915_s3 + $0x1c4] ss:$8 sps:$4 sm:$0xff]  }
 0x245   :  { %v4064_v24 = vpop.f32.mrf.mxu1  ;;  %v8667_v56 = vadd.f32 %v4062_v50, %v4022_v54  ;;  %v4024_v0 = vadd.f32 %v4023_v37, %v3983_v52  ;;  %4761 = vmatpush1.bf16.msra.mxu1 %v6623_v2  ;;  %v6656_v50 = vld [vmem:[%s8915_s3 + $0x1c0] ss:$8 sps:$4 sm:$0xff]   ;;  %v6619_v52 = vld [vmem:[%s8915_s3 + $0x94] ss:$8 sps:$4 sm:$0xff]   ;;  %v6659_v37 = vld [vmem:[%s8915_s3 + $0x1b0] ss:$8 sps:$4 sm:$0xff]  }
 0x246   :  { %v4025_v55 = vpop.f32.mrf.mxu0  ;;  %4762 = vmatprep.subr.bf16.mxu1 %v6628_v35  ;;  %v6661_v54 = vld [vmem:[%s8915_s3 + $0x1b4] ss:$8 sps:$4 sm:$0xff]  }
 0x247   :  { %v4066_v57 = vpop.f32.mrf.mxu1  ;;  %v8669_v32 = vadd.f32 %v4064_v24, %v4024_v0  ;;  %4722 = vmatpush1.bf16.msra.mxu0 %v6578_v12  ;;  %v6617_v12 = vld [vmem:[%s8915_s3 + $0x90] ss:$8 sps:$4 sm:$0xff]   ;;  %v6622_v24 = vld [vmem:[%s8915_s3 + $0x84] ss:$8 sps:$4 sm:$0xff]   ;;  %v4315_v0 = vmax.f32 %v8459_v27, 0.0 }
 0x248   :  { %v4026_v1 = vpop.f32.mrf.mxu0  ;;  %4723 = vmatprep.subr.bf16.mxu0 %v6583_v26  ;;  %v6620_v26 = vld [vmem:[%s8915_s3 + $0x80] ss:$8 sps:$4 sm:$0xff]   ;;  %v6664_v57 = vld [vmem:[%s8915_s3 + $0x1a4] ss:$8 sps:$4 sm:$0xff]  }
 0x249   :  { %v4067_v60 = vpop.f32.mrf.mxu1  ;;  %4763 = vmatpush1.bf16.msra.mxu1 %v6626_v4  ;;  %v4319_v55 = vpack.c.bf16 %v4315_v0, %v4315_v0  ;;  %v6665_v4 = vld [vmem:[%s8915_s3 + $0x190] ss:$8 sps:$4 sm:$0xff]  }
 0x24a   :  { %4764 = vmatprep.subr.bf16.mxu1 %v6631_v20 }
 0x24b   :  { %4724 = vmatpush1.bf16.msra.mxu0 %v6581_v58  ;;  %v6662_v58 = vld [vmem:[%s8915_s3 + $0x1a0] ss:$8 sps:$4 sm:$0xff]  }
 0x24c   :  { %4725 = vmatprep.subr.bf16.mxu0 %v6586_v61 }
 0x24d   :  { %4765 = vmatpush1.bf16.msra.mxu1 %v6629_v10 }
 0x24e   :  { %4766 = vmatprep.subr.bf16.mxu1 %v6634_v17  ;;  %v6668_v17 = vld [vmem:[%s8915_s3 + $0x180] ss:$8 sps:$4 sm:$0xff]  }
 0x24f   :  { %4726 = vmatpush1.bf16.msra.mxu0 %v6584_v40 }
 0x250   :  { %4727 = vmatprep.subr.bf16.mxu0 %v6589_v6 }
 0x251   :  { %4767 = vmatpush1.bf16.msra.mxu1 %v6632_v5 }
 0x252   :  { %4768 = vmatprep.subr.bf16.mxu1 %v6637_v14 }
 0x253   :  { %4728 = vmatpush1.bf16.msra.mxu0 %v6587_v9 }
 0x254   :  { %4729 = vmatprep.subr.bf16.mxu0 %v6592_v11  ;;  %v6670_v11 = vld [vmem:[%s8915_s3 + $0x184] ss:$8 sps:$4 sm:$0xff]  }
 0x255   :  { %4769 = vmatpush1.bf16.msra.mxu1 %v6635_v49 }
 0x256   :  { %4770 = vmatprep.subr.bf16.mxu1 %v6640_v25 }
 0x257   :  { %4730 = vmatpush1.bf16.msra.mxu0 %v6590_v38 }
 0x258   :  { %4731 = vmatprep.subr.bf16.mxu0 %v6595_v28 }
 0x259   :  { %4771 = vmatpush1.bf16.msra.mxu1 %v6638_v18  ;;  %v6671_v18 = vld [vmem:[%s8916_s5 + $0x78] sm:$0xff]  }
 0x25a   :  { %4772 = vmatprep.subr.bf16.mxu1 %v6643_v21  ;;  %v6673_v21 = vld [vmem:[%s8916_s5 + $0x70] sm:$0xff]  }
 0x25b   :  { %4732 = vmatpush1.bf16.msra.mxu0 %v6593_v36 }
 0x25c   :  { %4733 = vmatprep.subr.bf16.mxu0 %v6598_v15 }
 0x25d   :  { %4773 = vmatpush1.bf16.msra.mxu1 %v6641_v30  ;;  %v6675_v30 = vld [vmem:[%s8916_s5 + $0x68] sm:$0xff]  }
 0x25e   :  { %4774 = vmatprep.subr.bf16.mxu1 %v6646_v63  ;;  %v6677_v63 = vld [vmem:[%s8916_s5 + $0x60] sm:$0xff]  }
 0x25f   :  { %4734 = vmatpush1.bf16.msra.mxu0 %v6596_v42 }
 0x260   :  { %4735 = vmatprep.subr.bf16.mxu0 %v6601_v19  ;;  %v6672_v19 = vld [vmem:[%s8916_s5 + $0x38] sm:$0xff]  }
 0x261   :  { %4775 = vmatpush1.bf16.msra.mxu1 %v6644_v47  ;;  %v6679_v47 = vld [vmem:[%s8916_s5 + $0x58] sm:$0xff]  }
 0x262   :  { %4776 = vmatprep.subr.bf16.mxu1 %v6649_v34  ;;  %v6681_v34 = vld [vmem:[%s8916_s5 + $0x50] sm:$0xff]  }
 0x263   :  { %4736 = vmatpush2.bf16.msra.mxu0 %v6599_v29  ;;  %v6674_v29 = vld [vmem:[%s8916_s5 + $0x30] sm:$0xff]  }
 0x264   :  { %4737 = vmatprep.subr.bf16.mxu0 %v6604_v39  ;;  %v6676_v39 = vld [vmem:[%s8916_s5 + $0x28] sm:$0xff]  }
 0x265   :  { %4777 = vmatpush2.bf16.msra.mxu1 %v6647_v22 }
 0x266   :  { %4778 = vmatprep.subr.bf16.mxu1 %v6652_v8 }
 0x267   :  { %4738 = vmatpush2.bf16.msra.mxu0 %v6602_v13  ;;  %v6678_v13 = vld [vmem:[%s8916_s5 + $0x20] sm:$0xff]  }
 0x268   :  { %4739 = vmatprep.subr.bf16.mxu0 %v6607_v33  ;;  %v6680_v33 = vld [vmem:[%s8916_s5 + $0x18] sm:$0xff]  }
 0x269   :  { %4779 = vmatpush2.bf16.msra.mxu1 %v6650_v31 }
 0x26a   :  { %4780 = vmatprep.subr.bf16.mxu1 %v6655_v44 }
 0x26b   :  { %4740 = vmatpush2.bf16.msra.mxu0 %v6605_v41  ;;  %v6682_v41 = vld [vmem:[%s8916_s5 + $0x10] sm:$0xff]  }
 0x26c   :  { %4741 = vmatprep.subr.bf16.mxu0 %v6610_v43 }
 0x26d   :  { %4781 = vmatpush2.bf16.msra.mxu1 %v6653_v16 }
 0x26e   :  { %4782 = vmatprep.subr.bf16.mxu1 %v6658_v46 }
 0x26f   :  { %4742 = vmatpush2.bf16.msra.mxu0 %v6608_v51 }
 0x270   :  { %4743 = vmatprep.subr.bf16.mxu0 %v6613_v23 }
 0x271   :  { %4783 = vmatpush2.bf16.msra.mxu1 %v6656_v50 }
 0x272   :  { %4784 = vmatprep.subr.bf16.mxu1 %v6661_v54 }
 0x273   :  { %4744 = vmatpush2.bf16.msra.mxu0 %v6611_v7 }
 0x274   :  { %4745 = vmatprep.subr.bf16.mxu0 %v6616_v45 }
 0x275   :  { %4785 = vmatpush2.bf16.msra.mxu1 %v6659_v37 }
 0x276   :  { %4786 = vmatprep.subr.bf16.mxu1 %v6664_v57 }
 0x277   :  { %4746 = vmatpush2.bf16.msra.mxu0 %v6614_v48 }
 0x278   :  { %4747 = vmatprep.subr.bf16.mxu0 %v6619_v52 }
 0x279   :  { %4787 = vmatpush2.bf16.msra.mxu1 %v6662_v58  ;;  %v6683_v58 = vld [vmem:[%s8916_s5 + $0x48] sm:$0xff]  }
 0x27a   :  { %4788 = vmatprep.subr.bf16.mxu1 %v6667_v3 }
 0x27b   :  { %4748 = vmatpush2.bf16.msra.mxu0 %v6617_v12 }
 0x27c   :  { %4749 = vmatprep.subr.bf16.mxu0 %v6622_v24 }
 0x27d   :  { %4789 = vmatpush2.bf16.msra.mxu1 %v6665_v4 }
 0x27e   :  { %4790 = vmatprep.subr.bf16.mxu1 %v6670_v11 }
 0x27f   :  { %4750 = vmatpush2.bf16.msra.mxu0 %v6620_v26 }
 0x280   :  { %5671 = vmatprep.subr.bf16.mxu0 %v6671_v18 }
 0x281   :  { %4791 = vmatpush2.bf16.msra.mxu1 %v6668_v17 }
 0x282   :  { %v4103_v1 = vpop.f32.mrf.mxu0  ;;  %4752 = vmatmul.mubr.bf16.vlgmr.msra.gmra.mxu0 %v4319_v55 }
 0x283   :  { %v4144_v60 = vpop.f32.mrf.mxu1  ;;  %v4104_v61 = vadd.f32 %v4103_v1, %v8667_v56  ;;  %5672 = vmatpush3.bf16.msra.mxu0 %v6672_v19  ;;  %v6684_v1 = vld [vmem:[%s8916_s5 + $0x8] sm:$0xff]  }
 0x284   :  { %v4105_v2 = vpop.f32.mrf.mxu0  ;;  %5673 = vmatprep.subr.bf16.mxu0 %v6673_v21 }
 0x285   :  { %v4146_v27 = vpop.f32.mrf.mxu1  ;;  %v4145_v35 = vadd.f32 %v4144_v60, %v4104_v61  ;;  %v4106_v40 = vadd.f32 %v4105_v2, %v8669_v32  ;;  %v6685_v60 = vld [vmem:[%s8916_s5 + $0x40] sm:$0xff]  }
 0x286   :  { %v4107_v6 = vpop.f32.mrf.mxu0  ;;  %v6686_v61 = vld [vmem:[%s8916_s5] sm:$0xff]  }
 0x287   :  { %v4148_v20 = vpop.f32.mrf.mxu1  ;;  %v4147_v9 = vadd.f32 %v4146_v27, %v4106_v40  ;;  %5674 = vmatpush3.bf16.msra.mxu0 %v6674_v29  ;;  %v4387_v2 = vld [vmem:[%s8917_s4] sm:$0x3] }
 0x288   :  { %v4108_v56 = vpop.f32.mrf.mxu0  ;;  %5675 = vmatprep.subr.bf16.mxu0 %v6675_v30  ;;  %v4392_v27 = vrot.slane %v4387_v2, %v616_v59  ;;  %v4396_v3 = vrot.slane %v4387_v2, %v620_v62 }
 0x289   :  { %v4149_v10 = vpop.f32.mrf.mxu1 }
 0x28b   :  { %5676 = vmatpush3.bf16.msra.mxu0 %v6676_v39 }
 0x28c   :  { %5677 = vmatprep.subr.bf16.mxu0 %v6677_v63 }
 0x28f   :  { %5678 = vmatpush3.bf16.msra.mxu0 %v6678_v13 }
 0x290   :  { %5679 = vmatprep.subr.bf16.mxu0 %v6679_v47 }
 0x293   :  { %5680 = vmatpush3.bf16.msra.mxu0 %v6680_v33 }
 0x294   :  { %5681 = vmatprep.subr.bf16.mxu0 %v6681_v34 }
 0x297   :  { %5682 = vmatpush3.bf16.msra.mxu0 %v6682_v41 }
 0x298   :  { %5683 = vmatprep.subr.bf16.mxu0 %v6683_v58 }
 0x29b   :  { %5684 = vmatpush3.bf16.msra.mxu0 %v6684_v1 }
 0x29c   :  { %5685 = vmatprep.subr.bf16.mxu0 %v6685_v60 }
 0x29f   :  { %5686 = vmatpush3.bf16.msra.mxu0 %v6686_v61 }
 0x2c2   :  { %v4185_v32 = vpop.f32.mrf.mxu0 }
 0x2c3   :  { %v4226_v38 = vpop.f32.mrf.mxu1  ;;  %v4186_v5 = vadd.f32 %v4185_v32, %v4145_v35 }
 0x2c4   :  { %v4187_v28 = vpop.f32.mrf.mxu0 }
 0x2c5   :  { %v4228_v14 = vpop.f32.mrf.mxu1  ;;  %v4227_v36 = vadd.f32 %v4226_v38, %v4186_v5  ;;  %v4188_v22 = vadd.f32 %v4187_v28, %v4147_v9 }
 0x2c6   :  { %v4189_v49 = vpop.f32.mrf.mxu0 }
 0x2c7   :  { %v4230_v15 = vpop.f32.mrf.mxu1  ;;  %v4229_v51 = vadd.f32 %v4228_v14, %v4188_v22 }
 0x2c8   :  { %v4190_v25 = vpop.f32.mrf.mxu0 }
 0x2c9   :  { %v4231_v42 = vpop.f32.mrf.mxu1 }
 0x302   :  { %v4267_v43 = vpop.f32.mrf.mxu0 }
 0x303   :  { %v4308_v8 = vpop.f32.mrf.mxu1  ;;  %v4268_v31 = vadd.f32 %v4267_v43, %v4227_v36 }
 0x304   :  { %v4269_v23 = vpop.f32.mrf.mxu0 }
 0x305   :  { %v4310_v44 = vpop.f32.mrf.mxu1  ;;  %v4309_v7 = vadd.f32 %v4308_v8, %v4268_v31  ;;  %v4270_v16 = vadd.f32 %v4269_v23, %v4229_v51 }
 0x306   :  { %v4271_v45 = vpop.f32.mrf.mxu0 }
 0x307   :  { %v4312_v46 = vpop.f32.mrf.mxu1  ;;  %v4311_v48 = vadd.f32 %v4310_v44, %v4270_v16  ;;  %v4317_v50 = vmax.f32 %v4309_v7, 0.0 }
 0x308   :  { %v4272_v52 = vpop.f32.mrf.mxu0 }
 0x309   :  { %v4313_v54 = vpop.f32.mrf.mxu1  ;;  %v4318_v12 = vmax.f32 %v4311_v48, 0.0  ;;  %v4321_v24 = vpack.c.bf16 %v4317_v50, %v4317_v50 }
 0x30b   :  { %v4322_v37 = vpack.c.bf16 %v4318_v12, %v4318_v12 }
 0x30d   :  { %4792 = vmatprep.mubr.bf16.mxu1 %v4322_v37 }
 0x30e   :  { %4793 = vmatmul.mubr.bf16.vlgmr.msra.gmra.mxu1 %v4321_v24 }
 0x342   :  { %v4753_v26 = vpop.f32.mrf.mxu0 }
 0x343   :  { %v4754_v35 = vadd.f32 %v4753_v26, %v4392_v27 }
 0x344   :  { %v4755_v0 = vpop.f32.mrf.mxu0 }
 0x345   :  { %v4756_v4 = vadd.f32 %v4755_v0, %v4396_v3 }
 0x346   :  { %v4757_v55 = vpop.f32.mrf.mxu0 }
 0x348   :  { %v4758_v57 = vpop.f32.mrf.mxu0 }
 0x3ce   :  { %v4794_v40 = vpop.f32.mrf.mxu1 }
 0x3cf   :  { %v4795_v6 = vadd.f32 %v4794_v40, %v4754_v35 }
 0x3d0   :  { %v4796_v20 = vpop.f32.mrf.mxu1 }
 0x3d1   :  { %v4797_v9 = vadd.f32 %v4796_v20, %v4756_v4  ;;  %v4801_v56 = vmax.f32 %v4795_v6, 0.0 }
 0x3d2   :  { %v4798_v10 = vpop.f32.mrf.mxu1 }
 0x3d3   :  { %v4802_v11 = vmax.f32 %v4797_v9, 0.0  ;;  %v4803_v38 = vpack.c.bf16 %v4801_v56, %v4801_v56 }
 0x3d4   :  { %v4799_v17 = vpop.f32.mrf.mxu1 }
 0x3d5   :  { %v4804_v32 = vpack.c.bf16 %v4802_v11, %v4802_v11 }
 0x3d7   :  { %4972 = vmatprep.mubr.bf16.mxu0 %v4804_v32 }
 0x3d8   :  { %4973 = vmatmul.mubr.bf16.vlgmr.msra.gmra.mxu0 %v4803_v38 }
 0x498   :  { %v5687_v5 = vpop.f32.mrf.mxu0 }
 0x49a   :  { %v5688_v59 = vpop.f32.mrf.mxu0 }
 0x49b   :  { %v5689_v62 = vadd.f32 %v5688_v59, %v5687_v5 }
 0x49c   :  { %v5690_v28 = vpop.f32.mrf.mxu0 }
 0x49d   :  { %v4975_v14 = vadd.f32 %v5689_v62, %v5654_v53 }
 0x49e   :  { %v5691_v36 = vpop.f32.mrf.mxu0 }
 0x49f   :  { %v4980_v49 = vand.u32 2147483647, %v4975_v14  ;;  %vm4984_vm1 = vcmp.ge.f32.partialorder %v4975_v14, 0.0 }
 0x4a1   :  { %v4981_v15 = vsub.f32 0.0, %v4980_v49 }
 0x4a3   :  { %v4982_v25 = vmul.f32 1.442695, %v4981_v15 }
 0x4a5   :  { %6687 = vpow2.f32 %v4982_v25 }
 0x4b2   :  { %v6688_v42 = vpop.eup %6687 }
 0x4b3   :  { %v4985_v18 = vadd.f32 1.0, %v6688_v42 }
 0x4b5   :  { %6689 = vrcp.f32 %v4985_v18 }
 0x4c2   :  { %v6690_v19 = vpop.eup %6689 }
 0x4c3   :  { %v4988_v21 = vmul.f32 %v6690_v19, %v6688_v42 }
 0x4c5   :  { %v4989_v29 = vsel %vm4984_vm1, %v6690_v19, %v4988_v21 }
 0x4c6   :  { %4991 = vst.msk [vmem:[%s8919_s7] sm:$0xff] %vm4990_vm0, %v4989_v29 }

</bundles_post_ra>
